<compile_context>
chip_gen: v7x
topology: tpu7x:2x2x1
jax: 0.10.0
libtpu: 0.0.40
codegen_flags: <defaults>
</compile_context>

<pallas_src>
import math
import functools
import numpy as np

import jax
import jax.numpy as jnp
from jax import lax
from jax.experimental import pallas as pl
from jax.experimental.pallas import tpu as pltpu

NEG_INF = -1e9
LN_EPS = 1e-6          # matches the common AIAYN reference impl (torch default 1e-5)
APPROX_RECIP = True    # set False for an exact softmax denominator during validation


# ----------------------------- tiling helpers ------------------------------

def _tile(dim, preferred, align):
    """Largest multiple of `align` <= `preferred` that evenly divides `dim`,
    else the full dim (Pallas wants last-two block dims (8,128)-aligned or full)."""
    if dim <= preferred:
        return dim
    t = (preferred // align) * align
    while t >= align:
        if dim % t == 0:
            return t
        t -= align
    return dim


def _row_tile(m, cap=256):
    """Row tile; try to give at least 2 grid steps so both v7x TCs get work."""
    t = _tile(m, cap, 8)
    if t == m and m >= 16 and (m % 2 == 0) and ((m // 2) % 8 == 0):
        t = m // 2
    return t


def _bf16(x):
    return x.astype(jnp.bfloat16)


def _layer_norm(y, g, b, eps):
    mu = jnp.mean(y, axis=-1, keepdims=True)
    var = jnp.mean((y - mu) ** 2, axis=-1, keepdims=True)
    return (y - mu) * lax.rsqrt(var + eps) * g + b


def _softmax_lastdim(s):
    s = s - jnp.max(s, axis=-1, keepdims=True)
    p = jnp.exp(s)
    denom = jnp.sum(p, axis=-1, keepdims=True)
    if APPROX_RECIP:
        return p * pl.reciprocal(denom, approx=True)
    return p / denom


# ----------------------------- Pallas kernels ------------------------------

def _linear_kernel(x_ref, w_ref, *rest, activation, has_bias):
    """Tiled  y = x @ w (+ b) (+ ReLU).  bf16 MXU inputs, f32 accumulator.
    K axis = grid axis 2."""
    if has_bias:
        b_ref, o_ref, acc_ref = rest
    else:
        o_ref, acc_ref = rest

    @pl.when(pl.program_id(2) == 0)
    def _():
        acc_ref[...] = jnp.zeros_like(acc_ref)

    acc_ref[...] += jnp.dot(_bf16(x_ref[...]), _bf16(w_ref[...]),
                            preferred_element_type=jnp.float32)

    @pl.when(pl.program_id(2) == pl.num_programs(2) - 1)
    def _():
        y = acc_ref[...]
        if has_bias:
            y = y + b_ref[...]
        if activation == "relu":
            y = jnp.maximum(y, 0.0)
        o_ref[...] = y.astype(o_ref.dtype)


def linear(x, w, b=None, activation=None):
    """x: (M, K) @ w: (K, N) (+ b), optional ReLU.  Tiled + pipelined."""
    M, K = x.shape
    N = w.shape[1]
    has_bias = b is not None
    tm = _row_tile(M, 256)
    tn = _tile(N, 512, 128)
    tk = _tile(K, 1024, 128)
    grid = (M // tm, N // tn, K // tk)

    in_specs = [pl.BlockSpec((tm, tk), lambda i, j, k: (i, k)),
                pl.BlockSpec((tk, tn), lambda i, j, k: (k, j))]
    args = [x, w]
    if has_bias:
        in_specs.append(pl.BlockSpec((1, tn), lambda i, j, k: (0, j)))
        args.append(b.reshape(1, N))

    return pl.pallas_call(
        functools.partial(_linear_kernel, activation=activation, has_bias=has_bias),
        out_shape=jax.ShapeDtypeStruct((M, N), jnp.float32),
        grid=grid,
        in_specs=in_specs,
        out_specs=pl.BlockSpec((tm, tn), lambda i, j, k: (i, j)),
        scratch_shapes=[pltpu.VMEM((tm, tn), jnp.float32)],
        compiler_params=pltpu.CompilerParams(
            dimension_semantics=("parallel", "parallel", "arbitrary")),
    )(*args)


def _embed_pos_ln_kernel(e_ref, p_ref, g_ref, b_ref, o_ref, *, eps):
    x = e_ref[0] + p_ref[...]
    o_ref[0] = _layer_norm(x, g_ref[...], b_ref[...], eps).astype(o_ref.dtype)


def embed_pos_ln(emb, pos, g, b, eps=LN_EPS):
    """Fused (embedding + positional encoding) add + LayerNorm, row-tiled."""
    B, L, E = emb.shape
    ts = _tile(L, 256, 8)
    return pl.pallas_call(
        functools.partial(_embed_pos_ln_kernel, eps=eps),
        out_shape=jax.ShapeDtypeStruct((B, L, E), jnp.float32),
        grid=(B, L // ts),
        in_specs=[pl.BlockSpec((1, ts, E), lambda bb, s: (bb, s, 0)),
                  pl.BlockSpec((ts, E), lambda bb, s: (s, 0)),
                  pl.BlockSpec((1, E), lambda bb, s: (0, 0)),
                  pl.BlockSpec((1, E), lambda bb, s: (0, 0))],
        out_specs=pl.BlockSpec((1, ts, E), lambda bb, s: (bb, s, 0)),
        compiler_params=pltpu.CompilerParams(
            dimension_semantics=("parallel", "parallel")),
    )(emb, pos, g.reshape(1, E), b.reshape(1, E))


def _mha_ln_core(xq, xkv, wq_ref, wk_ref, wv_ref, bq_ref, bk_ref, bv_ref,
                 wo_ref, bo_ref, g_ref, beta_ref, o_ref, pad_bias, *,
                 H, dk, scale, causal, eps):
    """All heads for one batch element.

    Per-head weights are indexed along the LEADING axis (no lane slicing);
    each head's contribution is folded into a full-width (Lq, E) accumulator
    via its wo slice (no concatenate, no H live output tiles)."""
    Lq, E = xq.shape
    Lk = xkv.shape[0]
    xqb = _bf16(xq)
    xkb = _bf16(xkv)

    if causal:
        row = lax.broadcasted_iota(jnp.int32, (Lq, Lk), 0)
        col = lax.broadcasted_iota(jnp.int32, (Lq, Lk), 1)
        causal_ok = row >= col

    acc = jnp.zeros((Lq, E), jnp.float32)
    for h in range(H):                                   # static unroll, H small
        q = jnp.dot(xqb, _bf16(wq_ref[h]),
                    preferred_element_type=jnp.float32) + bq_ref[h]   # (Lq, dk)
        k = jnp.dot(xkb, _bf16(wk_ref[h]),
                    preferred_element_type=jnp.float32) + bk_ref[h]   # (Lk, dk)
        v = jnp.dot(xkb, _bf16(wv_ref[h]),
                    preferred_element_type=jnp.float32) + bv_ref[h]   # (Lk, dk)

        s = lax.dot_general(_bf16(q), _bf16(k), (((1,), (1,)), ((), ())),
                            preferred_element_type=jnp.float32) * scale  # (Lq, Lk)
        if pad_bias is not None:
            s = s + pad_bias                               # (1, Lk) broadcast
        if causal:
            s = jnp.where(causal_ok, s, NEG_INF)

        p = _softmax_lastdim(s)
        out_h = jnp.dot(_bf16(p), _bf16(v),
                        preferred_element_type=jnp.float32)            # (Lq, dk)
        acc = acc + jnp.dot(_bf16(out_h), _bf16(wo_ref[h]),
                            preferred_element_type=jnp.float32)        # (Lq, E)

    y = acc + bo_ref[...] + xq                             # residual
    o_ref[0] = _layer_norm(y, g_ref[...], beta_ref[...], eps).astype(o_ref.dtype)


def _self_attn_sublayer_kernel(*refs, H, dk, scale, causal, use_pad, eps):
    if use_pad:
        (x_ref, wq, wk, wv, bq, bk, bv, wo, bo, g, beta, pad_ref, o_ref) = refs
        pad_bias = pad_ref[0]                              # (1, Lk)
    else:
        (x_ref, wq, wk, wv, bq, bk, bv, wo, bo, g, beta, o_ref) = refs
        pad_bias = None
    x = x_ref[0]
    _mha_ln_core(x, x, wq, wk, wv, bq, bk, bv, wo, bo, g, beta, o_ref, pad_bias,
                 H=H, dk=dk, scale=scale, causal=causal, eps=eps)


def _cross_attn_sublayer_kernel(*refs, H, dk, scale, use_pad, eps):
    if use_pad:
        (x_ref, enc_ref, wq, wk, wv, bq, bk, bv, wo, bo, g, beta, pad_ref, o_ref) = refs
        pad_bias = pad_ref[0]
    else:
        (x_ref, enc_ref, wq, wk, wv, bq, bk, bv, wo, bo, g, beta, o_ref) = refs
        pad_bias = None
    _mha_ln_core(x_ref[0], enc_ref[0], wq, wk, wv, bq, bk, bv, wo, bo, g, beta,
                 o_ref, pad_bias, H=H, dk=dk, scale=scale, causal=False, eps=eps)


def _attn_weight_specs(H, E, dk):
    return [pl.BlockSpec((H, E, dk), lambda b: (0, 0, 0)),    # wq
            pl.BlockSpec((H, E, dk), lambda b: (0, 0, 0)),    # wk
            pl.BlockSpec((H, E, dk), lambda b: (0, 0, 0)),    # wv
            pl.BlockSpec((H, 1, dk), lambda b: (0, 0, 0)),    # bq
            pl.BlockSpec((H, 1, dk), lambda b: (0, 0, 0)),    # bk
            pl.BlockSpec((H, 1, dk), lambda b: (0, 0, 0)),    # bv
            pl.BlockSpec((H, dk, E), lambda b: (0, 0, 0)),    # wo
            pl.BlockSpec((1, E), lambda b: (0, 0)),           # bo
            pl.BlockSpec((1, E), lambda b: (0, 0)),           # ln_g
            pl.BlockSpec((1, E), lambda b: (0, 0))]           # ln_b


def _attn_weight_args(p, E):
    return [p["wq"], p["wk"], p["wv"], p["bq"], p["bk"], p["bv"], p["wo"],
            p["bo"].reshape(1, E), p["ln_g"].reshape(1, E), p["ln_b"].reshape(1, E)]


def self_attn_sublayer(p, x, pad_bias, num_heads, causal):
    """Fused: QKV projection + self-attention + Wo + residual + LayerNorm."""
    B, L, E = x.shape
    dk = E // num_heads
    use_pad = pad_bias is not None

    in_specs = [pl.BlockSpec((1, L, E), lambda b: (b, 0, 0))] + \
        _attn_weight_specs(num_heads, E, dk)
    args = [x] + _attn_weight_args(p, E)
    if use_pad:
        in_specs.append(pl.BlockSpec((1, 1, L), lambda b: (b, 0, 0)))
        args.append(pad_bias)

    return pl.pallas_call(
        functools.partial(_self_attn_sublayer_kernel, H=num_heads, dk=dk,
                          scale=1.0 / math.sqrt(dk), causal=causal,
                          use_pad=use_pad, eps=LN_EPS),
        out_shape=jax.ShapeDtypeStruct((B, L, E), jnp.float32),
        grid=(B,),
        in_specs=in_specs,
        out_specs=pl.BlockSpec((1, L, E), lambda b: (b, 0, 0)),
        compiler_params=pltpu.CompilerParams(dimension_semantics=("parallel",)),
    )(*args)


def cross_attn_sublayer(p, x_q, x_kv, pad_bias, num_heads):
    """Fused: Q/K/V projections + cross-attention + Wo + residual + LayerNorm."""
    B, Lq, E = x_q.shape
    Lk = x_kv.shape[1]
    dk = E // num_heads
    use_pad = pad_bias is not None

    in_specs = [pl.BlockSpec((1, Lq, E), lambda b: (b, 0, 0)),
                pl.BlockSpec((1, Lk, E), lambda b: (b, 0, 0))] + \
        _attn_weight_specs(num_heads, E, dk)
    args = [x_q, x_kv] + _attn_weight_args(p, E)
    if use_pad:
        in_specs.append(pl.BlockSpec((1, 1, Lk), lambda b: (b, 0, 0)))
        args.append(pad_bias)

    return pl.pallas_call(
        functools.partial(_cross_attn_sublayer_kernel, H=num_heads, dk=dk,
                          scale=1.0 / math.sqrt(dk), use_pad=use_pad, eps=LN_EPS),
        out_shape=jax.ShapeDtypeStruct((B, Lq, E), jnp.float32),
        grid=(B,),
        in_specs=in_specs,
        out_specs=pl.BlockSpec((1, Lq, E), lambda b: (b, 0, 0)),
        compiler_params=pltpu.CompilerParams(dimension_semantics=("parallel",)),
    )(*args)


def _ffn_kernel(x_ref, w1_ref, b1_ref, w2_ref, b2_ref, g_ref, beta_ref, o_ref, *, eps):
    x = x_ref[...]                                          # (tm, E) f32
    h = jnp.dot(_bf16(x), _bf16(w1_ref[...]),
                preferred_element_type=jnp.float32) + b1_ref[...]
    h = jnp.maximum(h, 0.0)
    y = jnp.dot(_bf16(h), _bf16(w2_ref[...]),
                preferred_element_type=jnp.float32) + b2_ref[...] + x
    o_ref[...] = _layer_norm(y, g_ref[...], beta_ref[...], eps).astype(o_ref.dtype)


def ffn_sublayer(p, x):
    """Fused: W1 + ReLU + W2 + residual + LayerNorm, row-tiled."""
    B, L, E = x.shape
    HID = p["w1"].shape[1]
    M = B * L
    xf = x.reshape(M, E)
    tm = _row_tile(M, 256)
    out = pl.pallas_call(
        functools.partial(_ffn_kernel, eps=LN_EPS),
        out_shape=jax.ShapeDtypeStruct((M, E), jnp.float32),
        grid=(M // tm,),
        in_specs=[pl.BlockSpec((tm, E), lambda i: (i, 0)),
                  pl.BlockSpec((E, HID), lambda i: (0, 0)),
                  pl.BlockSpec((1, HID), lambda i: (0, 0)),
                  pl.BlockSpec((HID, E), lambda i: (0, 0)),
                  pl.BlockSpec((1, E), lambda i: (0, 0)),
                  pl.BlockSpec((1, E), lambda i: (0, 0)),
                  pl.BlockSpec((1, E), lambda i: (0, 0))],
        out_specs=pl.BlockSpec((tm, E), lambda i: (i, 0)),
        compiler_params=pltpu.CompilerParams(dimension_semantics=("parallel",)),
    )(xf, p["w1"], p["b1"].reshape(1, HID), p["w2"], p["b2"].reshape(1, E),
      p["ln_g"].reshape(1, E), p["ln_b"].reshape(1, E))
    return out.reshape(B, L, E)


# --------------------------- model building blocks --------------------------

def _pad_bias(tokens, pad_idx):
    """(B, L) tokens -> (B, 1, L) additive key-pad bias, or None if no padding."""
    if pad_idx is None:
        return None
    return jnp.where(tokens != pad_idx, 0.0, NEG_INF).astype(jnp.float32)[:, None, :]


def encoder_forward(params, src_tokens, num_heads):
    B, S = src_tokens.shape
    emb = jnp.take(params["emb"], src_tokens, axis=0)       # gather stays in XLA
    x = embed_pos_ln(emb, params["pos_table"][:S], params["ln_g"], params["ln_b"])
    # NOTE: reference forward calls `self.encoder(source)` with NO mask.
    for lp in params["layers"]:
        x = self_attn_sublayer(lp["self_attn"], x, None, num_heads, causal=False)
        x = ffn_sublayer(lp["ffn"], x)
    return x


def decoder_forward(params, tgt_tokens, tgt_pad_bias, enc_out, src_pad_bias, num_heads):
    B, T = tgt_tokens.shape
    emb = jnp.take(params["emb"], tgt_tokens, axis=0)
    x = embed_pos_ln(emb, params["pos_table"][:T], params["ln_g"], params["ln_b"])
    for lp in params["layers"]:
        x = self_attn_sublayer(lp["self_attn"], x, tgt_pad_bias, num_heads, causal=True)
        x = cross_attn_sublayer(lp["cross_attn"], x, enc_out, src_pad_bias, num_heads)
        x = ffn_sublayer(lp["ffn"], x)
    return x


def transformer_forward(params, source, target, *, num_heads, enc_pad_idx,
                        dec_pad_idx, v_out):
    src_bias = _pad_bias(source, enc_pad_idx)               # (B,1,S) or None
    tgt_bias = _pad_bias(target, dec_pad_idx)               # (B,1,T) or None
    enc_out = encoder_forward(params["encoder"], source, num_heads)
    dec_out = decoder_forward(params["decoder"], target, tgt_bias,
                              enc_out, src_bias, num_heads)
    B, T, E = dec_out.shape
    # vocab projection: weight was lane-padded to a 128-multiple at init.
    logits = linear(dec_out.reshape(B * T, E), params["last_w_padded"], None)
    return logits[:, :v_out]                                 # (B*T, V) == view(-1, V)


# ------------------------------ parameter init ------------------------------

def sinusoid_table(n_position, d):
    pos = np.arange(n_position)[:, None].astype(np.float64)
    i = np.arange(d)[None, :].astype(np.float64)
    angle = pos / np.power(10000.0, 2.0 * (i // 2) / d)
    table = np.zeros((n_position, d), np.float32)
    table[:, 0::2] = np.sin(angle[:, 0::2])
    table[:, 1::2] = np.cos(angle[:, 1::2])
    return jnp.asarray(table)


def init_params(key, v_in, v_out, emb_size, hidden_dim, n_layers, num_heads, n_position):
    keys = iter(jax.random.split(key, 4096))
    E = emb_size
    dk = E // num_heads

    def xavier(shape):
        fan_in, fan_out = shape
        bound = math.sqrt(6.0 / (fan_in + fan_out))
        return jax.random.uniform(next(keys), shape, jnp.float32, -bound, bound)

    def split_in(w):        # (E, E) -> (H, E, dk): per-head column blocks of W
        return jnp.transpose(w.reshape(E, num_heads, dk), (1, 0, 2))

    def split_out(w):       # (E, E) -> (H, dk, E): per-head row blocks of Wo
        return w.reshape(num_heads, dk, E)

    def attn_params():
        return dict(
            wq=split_in(xavier((E, E))), wk=split_in(xavier((E, E))),
            wv=split_in(xavier((E, E))),
            bq=jnp.zeros((num_heads, 1, dk), jnp.float32),
            bk=jnp.zeros((num_heads, 1, dk), jnp.float32),
            bv=jnp.zeros((num_heads, 1, dk), jnp.float32),
            wo=split_out(xavier((E, E))), bo=jnp.zeros((E,), jnp.float32),
            ln_g=jnp.ones((E,), jnp.float32), ln_b=jnp.zeros((E,), jnp.float32),
        )

    def ffn_params():
        return dict(
            w1=xavier((E, hidden_dim)), b1=jnp.zeros((hidden_dim,), jnp.float32),
            w2=xavier((hidden_dim, E)), b2=jnp.zeros((E,), jnp.float32),
            ln_g=jnp.ones((E,), jnp.float32), ln_b=jnp.zeros((E,), jnp.float32),
        )

    pos = sinusoid_table(n_position, E)

    encoder = dict(
        emb=xavier((v_in, E)), pos_table=pos,
        ln_g=jnp.ones((E,), jnp.float32), ln_b=jnp.zeros((E,), jnp.float32),
        layers=[dict(self_attn=attn_params(), ffn=ffn_params())
                for _ in range(n_layers)],
    )
    decoder = dict(
        emb=xavier((v_out, E)), pos_table=pos,
        ln_g=jnp.ones((E,), jnp.float32), ln_b=jnp.zeros((E,), jnp.float32),
        layers=[dict(self_attn=attn_params(), cross_attn=attn_params(),
                     ffn=ffn_params()) for _ in range(n_layers)],
    )

    last_w = xavier((E, v_out))
    v_pad = ((v_out + 127) // 128) * 128
    if v_pad != v_out:
        last_w = jnp.pad(last_w, ((0, 0), (0, v_pad - v_out)))  # pad once at init

    return dict(encoder=encoder, decoder=decoder, last_w_padded=last_w)


# ---------------------------------- main ------------------------------------

if __name__ == "__main__":
    # Small shapes consistent with the module's forward pass.
    V_IN, V_OUT = 11, 13
    EMB, HID, LAYERS, HEADS = 32, 64, 2, 4
    N_POS = 16
    B, S, T = 2, 8, 8
    ENC_PAD, DEC_PAD = 0, 0

    key = jax.random.PRNGKey(0)
    pkey, skey, tkey = jax.random.split(key, 3)

    params = init_params(pkey, V_IN, V_OUT, EMB, HID, LAYERS, HEADS, N_POS)
    source = jax.random.randint(skey, (B, S), 0, V_IN, dtype=jnp.int32)
    target = jax.random.randint(tkey, (B, T), 0, V_OUT, dtype=jnp.int32)

    fwd = jax.jit(functools.partial(transformer_forward, num_heads=HEADS,
                                    enc_pad_idx=ENC_PAD, dec_pad_idx=DEC_PAD,
                                    v_out=V_OUT))
    logits = fwd(params, source, target)
    logits = jax.block_until_ready(logits)

    assert logits.shape == (B * T, V_OUT), logits.shape
    assert bool(jnp.all(jnp.isfinite(logits)))
    print("KERNEL_OK")
</pallas_src>

<mosaic_0001>
module attributes {stable_mosaic.version = 11 : i64} {
  func.func @_embed_pos_ln_kernel(%arg0: i32, %arg1: i32, %arg2: memref<1x8x32xf32, #tpu.memory_space<vmem>>, %arg3: memref<8x32xf32, #tpu.memory_space<vmem>>, %arg4: memref<1x32xf32, #tpu.memory_space<vmem>>, %arg5: memref<1x32xf32, #tpu.memory_space<vmem>>, %arg6: memref<1x8x32xf32, #tpu.memory_space<vmem>>) attributes {dimension_semantics = [#tpu.dimension_semantics<parallel>, #tpu.dimension_semantics<parallel>], iteration_bounds = array<i64: 2, 1>, scalar_prefetch = 0 : i64, scratch_operands = 0 : i64, tpu.core_type = #tpu.core_type<tc>, window_params = [{transform_indices = @transform_0, window_bounds = array<i64: 1, 8, 32>}, {transform_indices = @transform_1, window_bounds = array<i64: 8, 32>}, {pipeline_mode = #tpu.pipeline_mode<synchronous>, transform_indices = @transform_2, window_bounds = array<i64: 1, 32>}, {pipeline_mode = #tpu.pipeline_mode<synchronous>, transform_indices = @transform_3, window_bounds = array<i64: 1, 32>}, {transform_indices = @transform_4, window_bounds = array<i64: 1, 8, 32>}]} {
    %c0 = arith.constant 0 : index
    %c0_0 = arith.constant 0 : index
    %c0_1 = arith.constant 0 : index
    %0 = vector.load %arg2[%c0, %c0_0, %c0_1] : memref<1x8x32xf32, #tpu.memory_space<vmem>>, vector<1x8x32xf32>
    %1 = vector.shape_cast %0 : vector<1x8x32xf32> to vector<8x32xf32>
    %c0_2 = arith.constant 0 : index
    %c0_3 = arith.constant 0 : index
    %2 = vector.load %arg3[%c0_2, %c0_3] : memref<8x32xf32, #tpu.memory_space<vmem>>, vector<8x32xf32>
    %3 = arith.addf %1, %2 : vector<8x32xf32>
    %c0_4 = arith.constant 0 : index
    %c0_5 = arith.constant 0 : index
    %4 = vector.load %arg4[%c0_4, %c0_5] : memref<1x32xf32, #tpu.memory_space<vmem>>, vector<1x32xf32>
    %c0_6 = arith.constant 0 : index
    %c0_7 = arith.constant 0 : index
    %5 = vector.load %arg5[%c0_6, %c0_7] : memref<1x32xf32, #tpu.memory_space<vmem>>, vector<1x32xf32>
    %cst = arith.constant dense<0.000000e+00> : vector<8xf32>
    %6 = vector.multi_reduction <add>, %3, %cst [1] : vector<8x32xf32> to vector<8xf32>
    %7 = vector.shape_cast %6 : vector<8xf32> to vector<8x1xf32>
    %cst_8 = arith.constant 3.200000e+01 : f32
    %8 = vector.broadcast %cst_8 : f32 to vector<8x1xf32>
    %9 = arith.divf %7, %8 : vector<8x1xf32>
    %10 = vector.broadcast %9 : vector<8x1xf32> to vector<8x32xf32>
    %11 = arith.subf %3, %10 : vector<8x32xf32>
    %12 = arith.mulf %11, %11 : vector<8x32xf32>
    %cst_9 = arith.constant dense<0.000000e+00> : vector<8xf32>
    %13 = vector.multi_reduction <add>, %12, %cst_9 [1] : vector<8x32xf32> to vector<8xf32>
    %14 = vector.shape_cast %13 : vector<8xf32> to vector<8x1xf32>
    %cst_10 = arith.constant 3.200000e+01 : f32
    %15 = vector.broadcast %cst_10 : f32 to vector<8x1xf32>
    %16 = arith.divf %14, %15 : vector<8x1xf32>
    %17 = vector.broadcast %9 : vector<8x1xf32> to vector<8x32xf32>
    %18 = arith.subf %3, %17 : vector<8x32xf32>
    %cst_11 = arith.constant 9.99999997E-7 : f32
    %19 = vector.broadcast %cst_11 : f32 to vector<8x1xf32>
    %20 = arith.addf %16, %19 : vector<8x1xf32>
    %21 = math.rsqrt %20 : vector<8x1xf32>
    %22 = vector.broadcast %21 : vector<8x1xf32> to vector<8x32xf32>
    %23 = arith.mulf %18, %22 : vector<8x32xf32>
    %24 = vector.broadcast %4 : vector<1x32xf32> to vector<8x32xf32>
    %25 = arith.mulf %23, %24 : vector<8x32xf32>
    %26 = vector.broadcast %5 : vector<1x32xf32> to vector<8x32xf32>
    %27 = arith.addf %25, %26 : vector<8x32xf32>
    %c0_12 = arith.constant 0 : index
    %c0_13 = arith.constant 0 : index
    %c0_14 = arith.constant 0 : index
    %28 = vector.load %arg6[%c0_12, %c0_13, %c0_14] : memref<1x8x32xf32, #tpu.memory_space<vmem>>, vector<1x8x32xf32>
    %29 = vector.shape_cast %28 : vector<1x8x32xf32> to vector<8x32xf32>
    %30 = vector.shape_cast %27 : vector<8x32xf32> to vector<1x8x32xf32>
    tpu.vector_store %arg6[%c0_12, %c0_13, %c0_14], %30 {strides = array<i32>} : memref<1x8x32xf32, #tpu.memory_space<vmem>>, vector<1x8x32xf32>,
    return
  }
  func.func @transform_0(%arg0: i32, %arg1: i32) -> (i32, i32, i32) {
    %c0_i32 = arith.constant 0 : i32
    %c0_i32_0 = arith.constant 0 : i32
    return %arg0, %arg1, %c0_i32 : i32, i32, i32
  }
  func.func @transform_1(%arg0: i32, %arg1: i32) -> (i32, i32) {
    %c0_i32 = arith.constant 0 : i32
    %c0_i32_0 = arith.constant 0 : i32
    return %arg1, %c0_i32 : i32, i32
  }
  func.func @transform_2(%arg0: i32, %arg1: i32) -> (i32, i32) {
    %c0_i32 = arith.constant 0 : i32
    %c0_i32_0 = arith.constant 0 : i32
    %c0_i32_1 = arith.constant 0 : i32
    return %c0_i32, %c0_i32_0 : i32, i32
  }
  func.func @transform_3(%arg0: i32, %arg1: i32) -> (i32, i32) {
    %c0_i32 = arith.constant 0 : i32
    %c0_i32_0 = arith.constant 0 : i32
    %c0_i32_1 = arith.constant 0 : i32
    return %c0_i32, %c0_i32_0 : i32, i32
  }
  func.func @transform_4(%arg0: i32, %arg1: i32) -> (i32, i32, i32) {
    %c0_i32 = arith.constant 0 : i32
    %c0_i32_0 = arith.constant 0 : i32
    return %arg0, %arg1, %c0_i32 : i32, i32, i32
  }
}

module attributes {stable_mosaic.version = 11 : i64} {
  func.func @_self_attn_sublayer_kernel(%arg0: i32, %arg1: memref<1x8x32xf32, #tpu.memory_space<vmem>>, %arg2: memref<4x32x8xf32, #tpu.memory_space<vmem>>, %arg3: memref<4x32x8xf32, #tpu.memory_space<vmem>>, %arg4: memref<4x32x8xf32, #tpu.memory_space<vmem>>, %arg5: memref<4x1x8xf32, #tpu.memory_space<vmem>>, %arg6: memref<4x1x8xf32, #tpu.memory_space<vmem>>, %arg7: memref<4x1x8xf32, #tpu.memory_space<vmem>>, %arg8: memref<4x8x32xf32, #tpu.memory_space<vmem>>, %arg9: memref<1x32xf32, #tpu.memory_space<vmem>>, %arg10: memref<1x32xf32, #tpu.memory_space<vmem>>, %arg11: memref<1x32xf32, #tpu.memory_space<vmem>>, %arg12: memref<1x1x8xf32, #tpu.memory_space<vmem>>, %arg13: memref<1x8x32xf32, #tpu.memory_space<vmem>>) attributes {dimension_semantics = [#tpu.dimension_semantics<parallel>], iteration_bounds = array<i64: 2>, scalar_prefetch = 0 : i64, scratch_operands = 0 : i64, tpu.core_type = #tpu.core_type<tc>, window_params = [{transform_indices = @transform_0, window_bounds = array<i64: 1, 8, 32>}, {pipeline_mode = #tpu.pipeline_mode<synchronous>, transform_indices = @transform_1, window_bounds = array<i64: 4, 32, 8>}, {pipeline_mode = #tpu.pipeline_mode<synchronous>, transform_indices = @transform_2, window_bounds = array<i64: 4, 32, 8>}, {pipeline_mode = #tpu.pipeline_mode<synchronous>, transform_indices = @transform_3, window_bounds = array<i64: 4, 32, 8>}, {pipeline_mode = #tpu.pipeline_mode<synchronous>, transform_indices = @transform_4, window_bounds = array<i64: 4, 1, 8>}, {pipeline_mode = #tpu.pipeline_mode<synchronous>, transform_indices = @transform_5, window_bounds = array<i64: 4, 1, 8>}, {pipeline_mode = #tpu.pipeline_mode<synchronous>, transform_indices = @transform_6, window_bounds = array<i64: 4, 1, 8>}, {pipeline_mode = #tpu.pipeline_mode<synchronous>, transform_indices = @transform_7, window_bounds = array<i64: 4, 8, 32>}, {pipeline_mode = #tpu.pipeline_mode<synchronous>, transform_indices = @transform_8, window_bounds = array<i64: 1, 32>}, {pipeline_mode = #tpu.pipeline_mode<synchronous>, transform_indices = @transform_9, window_bounds = array<i64: 1, 32>}, {pipeline_mode = #tpu.pipeline_mode<synchronous>, transform_indices = @transform_10, window_bounds = array<i64: 1, 32>}, {transform_indices = @transform_11, window_bounds = array<i64: 1, 1, 8>}, {transform_indices = @transform_12, window_bounds = array<i64: 1, 8, 32>}]} {
    %c0 = arith.constant 0 : index
    %c0_0 = arith.constant 0 : index
    %c0_1 = arith.constant 0 : index
    %0 = vector.load %arg12[%c0, %c0_0, %c0_1] : memref<1x1x8xf32, #tpu.memory_space<vmem>>, vector<1x1x8xf32>
    %1 = vector.shape_cast %0 : vector<1x1x8xf32> to vector<1x8xf32>
    %c0_2 = arith.constant 0 : index
    %c0_3 = arith.constant 0 : index
    %c0_4 = arith.constant 0 : index
    %2 = vector.load %arg1[%c0_2, %c0_3, %c0_4] : memref<1x8x32xf32, #tpu.memory_space<vmem>>, vector<1x8x32xf32>
    %3 = vector.shape_cast %2 : vector<1x8x32xf32> to vector<8x32xf32>
    %4 = arith.truncf %3 : vector<8x32xf32> to vector<8x32xbf16>
    %5 = arith.truncf %3 : vector<8x32xf32> to vector<8x32xbf16>
    %6 = tpu.iota {dimensions = array<i32: 0>} : vector<8x8xi32>
    %7 = tpu.iota {dimensions = array<i32: 1>} : vector<8x8xi32>
    %8 = arith.cmpi sge, %6, %7 : vector<8x8xi32>
    %cst = arith.constant 0.000000e+00 : f32
    %9 = vector.broadcast %cst : f32 to vector<8x32xf32>
    %c0_5 = arith.constant 0 : index
    %c0_6 = arith.constant 0 : index
    %c0_7 = arith.constant 0 : index
    %10 = vector.load %arg2[%c0_5, %c0_6, %c0_7] : memref<4x32x8xf32, #tpu.memory_space<vmem>>, vector<1x32x8xf32>
    %11 = vector.shape_cast %10 : vector<1x32x8xf32> to vector<32x8xf32>
    %12 = arith.truncf %11 : vector<32x8xf32> to vector<32x8xbf16>
    %cst_8 = arith.constant dense<0.000000e+00> : vector<8x8xf32>
    %13 = tpu.matmul %4, %12, %cst_8 {dimension_numbers = #tpu.dot_dimension_numbers<[1], [0], [0], [1], [0, 0, 1, 1], [], []>} : vector<8x32xbf16>, vector<32x8xbf16>, vector<8x8xf32> -> vector<8x8xf32>
    %c0_9 = arith.constant 0 : index
    %c0_10 = arith.constant 0 : index
    %c0_11 = arith.constant 0 : index
    %14 = vector.load %arg5[%c0_9, %c0_10, %c0_11] : memref<4x1x8xf32, #tpu.memory_space<vmem>>, vector<1x1x8xf32>
    %15 = vector.shape_cast %14 : vector<1x1x8xf32> to vector<1x8xf32>
    %16 = vector.broadcast %15 : vector<1x8xf32> to vector<8x8xf32>
    %17 = arith.addf %13, %16 : vector<8x8xf32>
    %c0_12 = arith.constant 0 : index
    %c0_13 = arith.constant 0 : index
    %c0_14 = arith.constant 0 : index
    %18 = vector.load %arg3[%c0_12, %c0_13, %c0_14] : memref<4x32x8xf32, #tpu.memory_space<vmem>>, vector<1x32x8xf32>
    %19 = vector.shape_cast %18 : vector<1x32x8xf32> to vector<32x8xf32>
    %20 = arith.truncf %19 : vector<32x8xf32> to vector<32x8xbf16>
    %cst_15 = arith.constant dense<0.000000e+00> : vector<8x8xf32>
    %21 = tpu.matmul %5, %20, %cst_15 {dimension_numbers = #tpu.dot_dimension_numbers<[1], [0], [0], [1], [0, 0, 1, 1], [], []>} : vector<8x32xbf16>, vector<32x8xbf16>, vector<8x8xf32> -> vector<8x8xf32>
    %c0_16 = arith.constant 0 : index
    %c0_17 = arith.constant 0 : index
    %c0_18 = arith.constant 0 : index
    %22 = vector.load %arg6[%c0_16, %c0_17, %c0_18] : memref<4x1x8xf32, #tpu.memory_space<vmem>>, vector<1x1x8xf32>
    %23 = vector.shape_cast %22 : vector<1x1x8xf32> to vector<1x8xf32>
    %24 = vector.broadcast %23 : vector<1x8xf32> to vector<8x8xf32>
    %25 = arith.addf %21, %24 : vector<8x8xf32>
    %c0_19 = arith.constant 0 : index
    %c0_20 = arith.constant 0 : index
    %c0_21 = arith.constant 0 : index
    %26 = vector.load %arg4[%c0_19, %c0_20, %c0_21] : memref<4x32x8xf32, #tpu.memory_space<vmem>>, vector<1x32x8xf32>
    %27 = vector.shape_cast %26 : vector<1x32x8xf32> to vector<32x8xf32>
    %28 = arith.truncf %27 : vector<32x8xf32> to vector<32x8xbf16>
    %cst_22 = arith.constant dense<0.000000e+00> : vector<8x8xf32>
    %29 = tpu.matmul %5, %28, %cst_22 {dimension_numbers = #tpu.dot_dimension_numbers<[1], [0], [0], [1], [0, 0, 1, 1], [], []>} : vector<8x32xbf16>, vector<32x8xbf16>, vector<8x8xf32> -> vector<8x8xf32>
    %c0_23 = arith.constant 0 : index
    %c0_24 = arith.constant 0 : index
    %c0_25 = arith.constant 0 : index
    %30 = vector.load %arg7[%c0_23, %c0_24, %c0_25] : memref<4x1x8xf32, #tpu.memory_space<vmem>>, vector<1x1x8xf32>
    %31 = vector.shape_cast %30 : vector<1x1x8xf32> to vector<1x8xf32>
    %32 = vector.broadcast %31 : vector<1x8xf32> to vector<8x8xf32>
    %33 = arith.addf %29, %32 : vector<8x8xf32>
    %34 = arith.truncf %17 : vector<8x8xf32> to vector<8x8xbf16>
    %35 = arith.truncf %25 : vector<8x8xf32> to vector<8x8xbf16>
    %cst_26 = arith.constant dense<0.000000e+00> : vector<8x8xf32>
    %36 = tpu.matmul %34, %35, %cst_26 {dimension_numbers = #tpu.dot_dimension_numbers<[1], [1], [0], [0], [0, 0, 1, 0], [], []>} : vector<8x8xbf16>, vector<8x8xbf16>, vector<8x8xf32> -> vector<8x8xf32>
    %cst_27 = arith.constant 0.353553385 : f32
    %37 = vector.broadcast %cst_27 : f32 to vector<8x8xf32>
    %38 = arith.mulf %36, %37 : vector<8x8xf32>
    %39 = vector.broadcast %1 : vector<1x8xf32> to vector<8x8xf32>
    %40 = arith.addf %38, %39 : vector<8x8xf32>
    %cst_28 = arith.constant -1.000000e+09 : f32
    %41 = vector.broadcast %cst_28 : f32 to vector<8x8xf32>
    %42 = arith.select %8, %40, %41 : vector<8x8xi1>, vector<8x8xf32>
    %cst_29 = arith.constant dense<0xFF800000> : vector<8xf32>
    %43 = vector.multi_reduction <maximumf>, %42, %cst_29 [1] : vector<8x8xf32> to vector<8xf32>
    %44 = vector.shape_cast %43 : vector<8xf32> to vector<8x1xf32>
    %45 = vector.broadcast %44 : vector<8x1xf32> to vector<8x8xf32>
    %46 = arith.subf %42, %45 : vector<8x8xf32>
    %47 = math.exp %46 : vector<8x8xf32>
    %cst_30 = arith.constant dense<0.000000e+00> : vector<8xf32>
    %48 = vector.multi_reduction <add>, %47, %cst_30 [1] : vector<8x8xf32> to vector<8xf32>
    %49 = vector.shape_cast %48 : vector<8xf32> to vector<8x1xf32>
    %50 = tpu.reciprocal %49 {approx = true} : vector<8x1xf32> -> vector<8x1xf32>
    %51 = vector.broadcast %50 : vector<8x1xf32> to vector<8x8xf32>
    %52 = arith.mulf %47, %51 : vector<8x8xf32>
    %53 = arith.truncf %52 : vector<8x8xf32> to vector<8x8xbf16>
    %54 = arith.truncf %33 : vector<8x8xf32> to vector<8x8xbf16>
    %cst_31 = arith.constant dense<0.000000e+00> : vector<8x8xf32>
    %55 = tpu.matmul %53, %54, %cst_31 {dimension_numbers = #tpu.dot_dimension_numbers<[1], [0], [0], [1], [0, 0, 1, 1], [], []>} : vector<8x8xbf16>, vector<8x8xbf16>, vector<8x8xf32> -> vector<8x8xf32>
    %56 = arith.truncf %55 : vector<8x8xf32> to vector<8x8xbf16>
    %c0_32 = arith.constant 0 : index
    %c0_33 = arith.constant 0 : index
    %c0_34 = arith.constant 0 : index
    %57 = vector.load %arg8[%c0_32, %c0_33, %c0_34] : memref<4x8x32xf32, #tpu.memory_space<vmem>>, vector<1x8x32xf32>
    %58 = vector.shape_cast %57 : vector<1x8x32xf32> to vector<8x32xf32>
    %59 = arith.truncf %58 : vector<8x32xf32> to vector<8x32xbf16>
    %cst_35 = arith.constant dense<0.000000e+00> : vector<8x32xf32>
    %60 = tpu.matmul %56, %59, %cst_35 {dimension_numbers = #tpu.dot_dimension_numbers<[1], [0], [0], [1], [0, 0, 1, 1], [], []>} : vector<8x8xbf16>, vector<8x32xbf16>, vector<8x32xf32> -> vector<8x32xf32>
    %61 = arith.addf %9, %60 : vector<8x32xf32>
    %c1 = arith.constant 1 : index
    %c0_36 = arith.constant 0 : index
    %c0_37 = arith.constant 0 : index
    %62 = vector.load %arg2[%c1, %c0_36, %c0_37] : memref<4x32x8xf32, #tpu.memory_space<vmem>>, vector<1x32x8xf32>
    %63 = vector.shape_cast %62 : vector<1x32x8xf32> to vector<32x8xf32>
    %64 = arith.truncf %63 : vector<32x8xf32> to vector<32x8xbf16>
    %cst_38 = arith.constant dense<0.000000e+00> : vector<8x8xf32>
    %65 = tpu.matmul %4, %64, %cst_38 {dimension_numbers = #tpu.dot_dimension_numbers<[1], [0], [0], [1], [0, 0, 1, 1], [], []>} : vector<8x32xbf16>, vector<32x8xbf16>, vector<8x8xf32> -> vector<8x8xf32>
    %c1_39 = arith.constant 1 : index
    %c0_40 = arith.constant 0 : index
    %c0_41 = arith.constant 0 : index
    %66 = vector.load %arg5[%c1_39, %c0_40, %c0_41] : memref<4x1x8xf32, #tpu.memory_space<vmem>>, vector<1x1x8xf32>
    %67 = vector.shape_cast %66 : vector<1x1x8xf32> to vector<1x8xf32>
    %68 = vector.broadcast %67 : vector<1x8xf32> to vector<8x8xf32>
    %69 = arith.addf %65, %68 : vector<8x8xf32>
    %c1_42 = arith.constant 1 : index
    %c0_43 = arith.constant 0 : index
    %c0_44 = arith.constant 0 : index
    %70 = vector.load %arg3[%c1_42, %c0_43, %c0_44] : memref<4x32x8xf32, #tpu.memory_space<vmem>>, vector<1x32x8xf32>
    %71 = vector.shape_cast %70 : vector<1x32x8xf32> to vector<32x8xf32>
    %72 = arith.truncf %71 : vector<32x8xf32> to vector<32x8xbf16>
    %cst_45 = arith.constant dense<0.000000e+00> : vector<8x8xf32>
    %73 = tpu.matmul %5, %72, %cst_45 {dimension_numbers = #tpu.dot_dimension_numbers<[1], [0], [0], [1], [0, 0, 1, 1], [], []>} : vector<8x32xbf16>, vector<32x8xbf16>, vector<8x8xf32> -> vector<8x8xf32>
    %c1_46 = arith.constant 1 : index
    %c0_47 = arith.constant 0 : index
    %c0_48 = arith.constant 0 : index
    %74 = vector.load %arg6[%c1_46, %c0_47, %c0_48] : memref<4x1x8xf32, #tpu.memory_space<vmem>>, vector<1x1x8xf32>
    %75 = vector.shape_cast %74 : vector<1x1x8xf32> to vector<1x8xf32>
    %76 = vector.broadcast %75 : vector<1x8xf32> to vector<8x8xf32>
    %77 = arith.addf %73, %76 : vector<8x8xf32>
    %c1_49 = arith.constant 1 : index
    %c0_50 = arith.constant 0 : index
    %c0_51 = arith.constant 0 : index
    %78 = vector.load %arg4[%c1_49, %c0_50, %c0_51] : memref<4x32x8xf32, #tpu.memory_space<vmem>>, vector<1x32x8xf32>
    %79 = vector.shape_cast %78 : vector<1x32x8xf32> to vector<32x8xf32>
    %80 = arith.truncf %79 : vector<32x8xf32> to vector<32x8xbf16>
    %cst_52 = arith.constant dense<0.000000e+00> : vector<8x8xf32>
    %81 = tpu.matmul %5, %80, %cst_52 {dimension_numbers = #tpu.dot_dimension_numbers<[1], [0], [0], [1], [0, 0, 1, 1], [], []>} : vector<8x32xbf16>, vector<32x8xbf16>, vector<8x8xf32> -> vector<8x8xf32>
    %c1_53 = arith.constant 1 : index
    %c0_54 = arith.constant 0 : index
    %c0_55 = arith.constant 0 : index
    %82 = vector.load %arg7[%c1_53, %c0_54, %c0_55] : memref<4x1x8xf32, #tpu.memory_space<vmem>>, vector<1x1x8xf32>
    %83 = vector.shape_cast %82 : vector<1x1x8xf32> to vector<1x8xf32>
    %84 = vector.broadcast %83 : vector<1x8xf32> to vector<8x8xf32>
    %85 = arith.addf %81, %84 : vector<8x8xf32>
    %86 = arith.truncf %69 : vector<8x8xf32> to vector<8x8xbf16>
    %87 = arith.truncf %77 : vector<8x8xf32> to vector<8x8xbf16>
    %cst_56 = arith.constant dense<0.000000e+00> : vector<8x8xf32>
    %88 = tpu.matmul %86, %87, %cst_56 {dimension_numbers = #tpu.dot_dimension_numbers<[1], [1], [0], [0], [0, 0, 1, 0], [], []>} : vector<8x8xbf16>, vector<8x8xbf16>, vector<8x8xf32> -> vector<8x8xf32>
    %cst_57 = arith.constant 0.353553385 : f32
    %89 = vector.broadcast %cst_57 : f32 to vector<8x8xf32>
    %90 = arith.mulf %88, %89 : vector<8x8xf32>
    %91 = vector.broadcast %1 : vector<1x8xf32> to vector<8x8xf32>
    %92 = arith.addf %90, %91 : vector<8x8xf32>
    %cst_58 = arith.constant -1.000000e+09 : f32
    %93 = vector.broadcast %cst_58 : f32 to vector<8x8xf32>
    %94 = arith.select %8, %92, %93 : vector<8x8xi1>, vector<8x8xf32>
    %cst_59 = arith.constant dense<0xFF800000> : vector<8xf32>
    %95 = vector.multi_reduction <maximumf>, %94, %cst_59 [1] : vector<8x8xf32> to vector<8xf32>
    %96 = vector.shape_cast %95 : vector<8xf32> to vector<8x1xf32>
    %97 = vector.broadcast %96 : vector<8x1xf32> to vector<8x8xf32>
    %98 = arith.subf %94, %97 : vector<8x8xf32>
    %99 = math.exp %98 : vector<8x8xf32>
    %cst_60 = arith.constant dense<0.000000e+00> : vector<8xf32>
    %100 = vector.multi_reduction <add>, %99, %cst_60 [1] : vector<8x8xf32> to vector<8xf32>
    %101 = vector.shape_cast %100 : vector<8xf32> to vector<8x1xf32>
    %102 = tpu.reciprocal %101 {approx = true} : vector<8x1xf32> -> vector<8x1xf32>
    %103 = vector.broadcast %102 : vector<8x1xf32> to vector<8x8xf32>
    %104 = arith.mulf %99, %103 : vector<8x8xf32>
    %105 = arith.truncf %104 : vector<8x8xf32> to vector<8x8xbf16>
    %106 = arith.truncf %85 : vector<8x8xf32> to vector<8x8xbf16>
    %cst_61 = arith.constant dense<0.000000e+00> : vector<8x8xf32>
    %107 = tpu.matmul %105, %106, %cst_61 {dimension_numbers = #tpu.dot_dimension_numbers<[1], [0], [0], [1], [0, 0, 1, 1], [], []>} : vector<8x8xbf16>, vector<8x8xbf16>, vector<8x8xf32> -> vector<8x8xf32>
    %108 = arith.truncf %107 : vector<8x8xf32> to vector<8x8xbf16>
    %c1_62 = arith.constant 1 : index
    %c0_63 = arith.constant 0 : index
    %c0_64 = arith.constant 0 : index
    %109 = vector.load %arg8[%c1_62, %c0_63, %c0_64] : memref<4x8x32xf32, #tpu.memory_space<vmem>>, vector<1x8x32xf32>
    %110 = vector.shape_cast %109 : vector<1x8x32xf32> to vector<8x32xf32>
    %111 = arith.truncf %110 : vector<8x32xf32> to vector<8x32xbf16>
    %cst_65 = arith.constant dense<0.000000e+00> : vector<8x32xf32>
    %112 = tpu.matmul %108, %111, %cst_65 {dimension_numbers = #tpu.dot_dimension_numbers<[1], [0], [0], [1], [0, 0, 1, 1], [], []>} : vector<8x8xbf16>, vector<8x32xbf16>, vector<8x32xf32> -> vector<8x32xf32>
    %113 = arith.addf %61, %112 : vector<8x32xf32>
    %c2 = arith.constant 2 : index
    %c0_66 = arith.constant 0 : index
    %c0_67 = arith.constant 0 : index
    %114 = vector.load %arg2[%c2, %c0_66, %c0_67] : memref<4x32x8xf32, #tpu.memory_space<vmem>>, vector<1x32x8xf32>
    %115 = vector.shape_cast %114 : vector<1x32x8xf32> to vector<32x8xf32>
    %116 = arith.truncf %115 : vector<32x8xf32> to vector<32x8xbf16>
    %cst_68 = arith.constant dense<0.000000e+00> : vector<8x8xf32>
    %117 = tpu.matmul %4, %116, %cst_68 {dimension_numbers = #tpu.dot_dimension_numbers<[1], [0], [0], [1], [0, 0, 1, 1], [], []>} : vector<8x32xbf16>, vector<32x8xbf16>, vector<8x8xf32> -> vector<8x8xf32>
    %c2_69 = arith.constant 2 : index
    %c0_70 = arith.constant 0 : index
    %c0_71 = arith.constant 0 : index
    %118 = vector.load %arg5[%c2_69, %c0_70, %c0_71] : memref<4x1x8xf32, #tpu.memory_space<vmem>>, vector<1x1x8xf32>
    %119 = vector.shape_cast %118 : vector<1x1x8xf32> to vector<1x8xf32>
    %120 = vector.broadcast %119 : vector<1x8xf32> to vector<8x8xf32>
    %121 = arith.addf %117, %120 : vector<8x8xf32>
    %c2_72 = arith.constant 2 : index
    %c0_73 = arith.constant 0 : index
    %c0_74 = arith.constant 0 : index
    %122 = vector.load %arg3[%c2_72, %c0_73, %c0_74] : memref<4x32x8xf32, #tpu.memory_space<vmem>>, vector<1x32x8xf32>
    %123 = vector.shape_cast %122 : vector<1x32x8xf32> to vector<32x8xf32>
    %124 = arith.truncf %123 : vector<32x8xf32> to vector<32x8xbf16>
    %cst_75 = arith.constant dense<0.000000e+00> : vector<8x8xf32>
    %125 = tpu.matmul %5, %124, %cst_75 {dimension_numbers = #tpu.dot_dimension_numbers<[1], [0], [0], [1], [0, 0, 1, 1], [], []>} : vector<8x32xbf16>, vector<32x8xbf16>, vector<8x8xf32> -> vector<8x8xf32>
    %c2_76 = arith.constant 2 : index
    %c0_77 = arith.constant 0 : index
    %c0_78 = arith.constant 0 : index
    %126 = vector.load %arg6[%c2_76, %c0_77, %c0_78] : memref<4x1x8xf32, #tpu.memory_space<vmem>>, vector<1x1x8xf32>
    %127 = vector.shape_cast %126 : vector<1x1x8xf32> to vector<1x8xf32>
    %128 = vector.broadcast %127 : vector<1x8xf32> to vector<8x8xf32>
    %129 = arith.addf %125, %128 : vector<8x8xf32>
    %c2_79 = arith.constant 2 : index
    %c0_80 = arith.constant 0 : index
    %c0_81 = arith.constant 0 : index
    %130 = vector.load %arg4[%c2_79, %c0_80, %c0_81] : memref<4x32x8xf32, #tpu.memory_space<vmem>>, vector<1x32x8xf32>
    %131 = vector.shape_cast %130 : vector<1x32x8xf32> to vector<32x8xf32>
    %132 = arith.truncf %131 : vector<32x8xf32> to vector<32x8xbf16>
    %cst_82 = arith.constant dense<0.000000e+00> : vector<8x8xf32>
    %133 = tpu.matmul %5, %132, %cst_82 {dimension_numbers = #tpu.dot_dimension_numbers<[1], [0], [0], [1], [0, 0, 1, 1], [], []>} : vector<8x32xbf16>, vector<32x8xbf16>, vector<8x8xf32> -> vector<8x8xf32>
    %c2_83 = arith.constant 2 : index
    %c0_84 = arith.constant 0 : index
    %c0_85 = arith.constant 0 : index
    %134 = vector.load %arg7[%c2_83, %c0_84, %c0_85] : memref<4x1x8xf32, #tpu.memory_space<vmem>>, vector<1x1x8xf32>
    %135 = vector.shape_cast %134 : vector<1x1x8xf32> to vector<1x8xf32>
    %136 = vector.broadcast %135 : vector<1x8xf32> to vector<8x8xf32>
    %137 = arith.addf %133, %136 : vector<8x8xf32>
    %138 = arith.truncf %121 : vector<8x8xf32> to vector<8x8xbf16>
    %139 = arith.truncf %129 : vector<8x8xf32> to vector<8x8xbf16>
    %cst_86 = arith.constant dense<0.000000e+00> : vector<8x8xf32>
    %140 = tpu.matmul %138, %139, %cst_86 {dimension_numbers = #tpu.dot_dimension_numbers<[1], [1], [0], [0], [0, 0, 1, 0], [], []>} : vector<8x8xbf16>, vector<8x8xbf16>, vector<8x8xf32> -> vector<8x8xf32>
    %cst_87 = arith.constant 0.353553385 : f32
    %141 = vector.broadcast %cst_87 : f32 to vector<8x8xf32>
    %142 = arith.mulf %140, %141 : vector<8x8xf32>
    %143 = vector.broadcast %1 : vector<1x8xf32> to vector<8x8xf32>
    %144 = arith.addf %142, %143 : vector<8x8xf32>
    %cst_88 = arith.constant -1.000000e+09 : f32
    %145 = vector.broadcast %cst_88 : f32 to vector<8x8xf32>
    %146 = arith.select %8, %144, %145 : vector<8x8xi1>, vector<8x8xf32>
    %cst_89 = arith.constant dense<0xFF800000> : vector<8xf32>
    %147 = vector.multi_reduction <maximumf>, %146, %cst_89 [1] : vector<8x8xf32> to vector<8xf32>
    %148 = vector.shape_cast %147 : vector<8xf32> to vector<8x1xf32>
    %149 = vector.broadcast %148 : vector<8x1xf32> to vector<8x8xf32>
    %150 = arith.subf %146, %149 : vector<8x8xf32>
    %151 = math.exp %150 : vector<8x8xf32>
    %cst_90 = arith.constant dense<0.000000e+00> : vector<8xf32>
    %152 = vector.multi_reduction <add>, %151, %cst_90 [1] : vector<8x8xf32> to vector<8xf32>
    %153 = vector.shape_cast %152 : vector<8xf32> to vector<8x1xf32>
    %154 = tpu.reciprocal %153 {approx = true} : vector<8x1xf32> -> vector<8x1xf32>
    %155 = vector.broadcast %154 : vector<8x1xf32> to vector<8x8xf32>
    %156 = arith.mulf %151, %155 : vector<8x8xf32>
    %157 = arith.truncf %156 : vector<8x8xf32> to vector<8x8xbf16>
    %158 = arith.truncf %137 : vector<8x8xf32> to vector<8x8xbf16>
    %cst_91 = arith.constant dense<0.000000e+00> : vector<8x8xf32>
    %159 = tpu.matmul %157, %158, %cst_91 {dimension_numbers = #tpu.dot_dimension_numbers<[1], [0], [0], [1], [0, 0, 1, 1], [], []>} : vector<8x8xbf16>, vector<8x8xbf16>, vector<8x8xf32> -> vector<8x8xf32>
    %160 = arith.truncf %159 : vector<8x8xf32> to vector<8x8xbf16>
    %c2_92 = arith.constant 2 : index
    %c0_93 = arith.constant 0 : index
    %c0_94 = arith.constant 0 : index
    %161 = vector.load %arg8[%c2_92, %c0_93, %c0_94] : memref<4x8x32xf32, #tpu.memory_space<vmem>>, vector<1x8x32xf32>
    %162 = vector.shape_cast %161 : vector<1x8x32xf32> to vector<8x32xf32>
    %163 = arith.truncf %162 : vector<8x32xf32> to vector<8x32xbf16>
    %cst_95 = arith.constant dense<0.000000e+00> : vector<8x32xf32>
    %164 = tpu.matmul %160, %163, %cst_95 {dimension_numbers = #tpu.dot_dimension_numbers<[1], [0], [0], [1], [0, 0, 1, 1], [], []>} : vector<8x8xbf16>, vector<8x32xbf16>, vector<8x32xf32> -> vector<8x32xf32>
    %165 = arith.addf %113, %164 : vector<8x32xf32>
    %c3 = arith.constant 3 : index
    %c0_96 = arith.constant 0 : index
    %c0_97 = arith.constant 0 : index
    %166 = vector.load %arg2[%c3, %c0_96, %c0_97] : memref<4x32x8xf32, #tpu.memory_space<vmem>>, vector<1x32x8xf32>
    %167 = vector.shape_cast %166 : vector<1x32x8xf32> to vector<32x8xf32>
    %168 = arith.truncf %167 : vector<32x8xf32> to vector<32x8xbf16>
    %cst_98 = arith.constant dense<0.000000e+00> : vector<8x8xf32>
    %169 = tpu.matmul %4, %168, %cst_98 {dimension_numbers = #tpu.dot_dimension_numbers<[1], [0], [0], [1], [0, 0, 1, 1], [], []>} : vector<8x32xbf16>, vector<32x8xbf16>, vector<8x8xf32> -> vector<8x8xf32>
    %c3_99 = arith.constant 3 : index
    %c0_100 = arith.constant 0 : index
    %c0_101 = arith.constant 0 : index
    %170 = vector.load %arg5[%c3_99, %c0_100, %c0_101] : memref<4x1x8xf32, #tpu.memory_space<vmem>>, vector<1x1x8xf32>
    %171 = vector.shape_cast %170 : vector<1x1x8xf32> to vector<1x8xf32>
    %172 = vector.broadcast %171 : vector<1x8xf32> to vector<8x8xf32>
    %173 = arith.addf %169, %172 : vector<8x8xf32>
    %c3_102 = arith.constant 3 : index
    %c0_103 = arith.constant 0 : index
    %c0_104 = arith.constant 0 : index
    %174 = vector.load %arg3[%c3_102, %c0_103, %c0_104] : memref<4x32x8xf32, #tpu.memory_space<vmem>>, vector<1x32x8xf32>
    %175 = vector.shape_cast %174 : vector<1x32x8xf32> to vector<32x8xf32>
    %176 = arith.truncf %175 : vector<32x8xf32> to vector<32x8xbf16>
    %cst_105 = arith.constant dense<0.000000e+00> : vector<8x8xf32>
    %177 = tpu.matmul %5, %176, %cst_105 {dimension_numbers = #tpu.dot_dimension_numbers<[1], [0], [0], [1], [0, 0, 1, 1], [], []>} : vector<8x32xbf16>, vector<32x8xbf16>, vector<8x8xf32> -> vector<8x8xf32>
    %c3_106 = arith.constant 3 : index
    %c0_107 = arith.constant 0 : index
    %c0_108 = arith.constant 0 : index
    %178 = vector.load %arg6[%c3_106, %c0_107, %c0_108] : memref<4x1x8xf32, #tpu.memory_space<vmem>>, vector<1x1x8xf32>
    %179 = vector.shape_cast %178 : vector<1x1x8xf32> to vector<1x8xf32>
    %180 = vector.broadcast %179 : vector<1x8xf32> to vector<8x8xf32>
    %181 = arith.addf %177, %180 : vector<8x8xf32>
    %c3_109 = arith.constant 3 : index
    %c0_110 = arith.constant 0 : index
    %c0_111 = arith.constant 0 : index
    %182 = vector.load %arg4[%c3_109, %c0_110, %c0_111] : memref<4x32x8xf32, #tpu.memory_space<vmem>>, vector<1x32x8xf32>
    %183 = vector.shape_cast %182 : vector<1x32x8xf32> to vector<32x8xf32>
    %184 = arith.truncf %183 : vector<32x8xf32> to vector<32x8xbf16>
    %cst_112 = arith.constant dense<0.000000e+00> : vector<8x8xf32>
    %185 = tpu.matmul %5, %184, %cst_112 {dimension_numbers = #tpu.dot_dimension_numbers<[1], [0], [0], [1], [0, 0, 1, 1], [], []>} : vector<8x32xbf16>, vector<32x8xbf16>, vector<8x8xf32> -> vector<8x8xf32>
    %c3_113 = arith.constant 3 : index
    %c0_114 = arith.constant 0 : index
    %c0_115 = arith.constant 0 : index
    %186 = vector.load %arg7[%c3_113, %c0_114, %c0_115] : memref<4x1x8xf32, #tpu.memory_space<vmem>>, vector<1x1x8xf32>
    %187 = vector.shape_cast %186 : vector<1x1x8xf32> to vector<1x8xf32>
    %188 = vector.broadcast %187 : vector<1x8xf32> to vector<8x8xf32>
    %189 = arith.addf %185, %188 : vector<8x8xf32>
    %190 = arith.truncf %173 : vector<8x8xf32> to vector<8x8xbf16>
    %191 = arith.truncf %181 : vector<8x8xf32> to vector<8x8xbf16>
    %cst_116 = arith.constant dense<0.000000e+00> : vector<8x8xf32>
    %192 = tpu.matmul %190, %191, %cst_116 {dimension_numbers = #tpu.dot_dimension_numbers<[1], [1], [0], [0], [0, 0, 1, 0], [], []>} : vector<8x8xbf16>, vector<8x8xbf16>, vector<8x8xf32> -> vector<8x8xf32>
    %cst_117 = arith.constant 0.353553385 : f32
    %193 = vector.broadcast %cst_117 : f32 to vector<8x8xf32>
    %194 = arith.mulf %192, %193 : vector<8x8xf32>
    %195 = vector.broadcast %1 : vector<1x8xf32> to vector<8x8xf32>
    %196 = arith.addf %194, %195 : vector<8x8xf32>
    %cst_118 = arith.constant -1.000000e+09 : f32
    %197 = vector.broadcast %cst_118 : f32 to vector<8x8xf32>
    %198 = arith.select %8, %196, %197 : vector<8x8xi1>, vector<8x8xf32>
    %cst_119 = arith.constant dense<0xFF800000> : vector<8xf32>
    %199 = vector.multi_reduction <maximumf>, %198, %cst_119 [1] : vector<8x8xf32> to vector<8xf32>
    %200 = vector.shape_cast %199 : vector<8xf32> to vector<8x1xf32>
    %201 = vector.broadcast %200 : vector<8x1xf32> to vector<8x8xf32>
    %202 = arith.subf %198, %201 : vector<8x8xf32>
    %203 = math.exp %202 : vector<8x8xf32>
    %cst_120 = arith.constant dense<0.000000e+00> : vector<8xf32>
    %204 = vector.multi_reduction <add>, %203, %cst_120 [1] : vector<8x8xf32> to vector<8xf32>
    %205 = vector.shape_cast %204 : vector<8xf32> to vector<8x1xf32>
    %206 = tpu.reciprocal %205 {approx = true} : vector<8x1xf32> -> vector<8x1xf32>
    %207 = vector.broadcast %206 : vector<8x1xf32> to vector<8x8xf32>
    %208 = arith.mulf %203, %207 : vector<8x8xf32>
    %209 = arith.truncf %208 : vector<8x8xf32> to vector<8x8xbf16>
    %210 = arith.truncf %189 : vector<8x8xf32> to vector<8x8xbf16>
    %cst_121 = arith.constant dense<0.000000e+00> : vector<8x8xf32>
    %211 = tpu.matmul %209, %210, %cst_121 {dimension_numbers = #tpu.dot_dimension_numbers<[1], [0], [0], [1], [0, 0, 1, 1], [], []>} : vector<8x8xbf16>, vector<8x8xbf16>, vector<8x8xf32> -> vector<8x8xf32>
    %212 = arith.truncf %211 : vector<8x8xf32> to vector<8x8xbf16>
    %c3_122 = arith.constant 3 : index
    %c0_123 = arith.constant 0 : index
    %c0_124 = arith.constant 0 : index
    %213 = vector.load %arg8[%c3_122, %c0_123, %c0_124] : memref<4x8x32xf32, #tpu.memory_space<vmem>>, vector<1x8x32xf32>
    %214 = vector.shape_cast %213 : vector<1x8x32xf32> to vector<8x32xf32>
    %215 = arith.truncf %214 : vector<8x32xf32> to vector<8x32xbf16>
    %cst_125 = arith.constant dense<0.000000e+00> : vector<8x32xf32>
    %216 = tpu.matmul %212, %215, %cst_125 {dimension_numbers = #tpu.dot_dimension_numbers<[1], [0], [0], [1], [0, 0, 1, 1], [], []>} : vector<8x8xbf16>, vector<8x32xbf16>, vector<8x32xf32> -> vector<8x32xf32>
    %217 = arith.addf %165, %216 : vector<8x32xf32>
    %c0_126 = arith.constant 0 : index
    %c0_127 = arith.constant 0 : index
    %218 = vector.load %arg9[%c0_126, %c0_127] : memref<1x32xf32, #tpu.memory_space<vmem>>, vector<1x32xf32>
    %219 = vector.broadcast %218 : vector<1x32xf32> to vector<8x32xf32>
    %220 = arith.addf %217, %219 : vector<8x32xf32>
    %221 = arith.addf %220, %3 : vector<8x32xf32>
    %c0_128 = arith.constant 0 : index
    %c0_129 = arith.constant 0 : index
    %222 = vector.load %arg10[%c0_128, %c0_129] : memref<1x32xf32, #tpu.memory_space<vmem>>, vector<1x32xf32>
    %c0_130 = arith.constant 0 : index
    %c0_131 = arith.constant 0 : index
    %223 = vector.load %arg11[%c0_130, %c0_131] : memref<1x32xf32, #tpu.memory_space<vmem>>, vector<1x32xf32>
    %cst_132 = arith.constant dense<0.000000e+00> : vector<8xf32>
    %224 = vector.multi_reduction <add>, %221, %cst_132 [1] : vector<8x32xf32> to vector<8xf32>
    %225 = vector.shape_cast %224 : vector<8xf32> to vector<8x1xf32>
    %cst_133 = arith.constant 3.200000e+01 : f32
    %226 = vector.broadcast %cst_133 : f32 to vector<8x1xf32>
    %227 = arith.divf %225, %226 : vector<8x1xf32>
    %228 = vector.broadcast %227 : vector<8x1xf32> to vector<8x32xf32>
    %229 = arith.subf %221, %228 : vector<8x32xf32>
    %230 = arith.mulf %229, %229 : vector<8x32xf32>
    %cst_134 = arith.constant dense<0.000000e+00> : vector<8xf32>
    %231 = vector.multi_reduction <add>, %230, %cst_134 [1] : vector<8x32xf32> to vector<8xf32>
    %232 = vector.shape_cast %231 : vector<8xf32> to vector<8x1xf32>
    %cst_135 = arith.constant 3.200000e+01 : f32
    %233 = vector.broadcast %cst_135 : f32 to vector<8x1xf32>
    %234 = arith.divf %232, %233 : vector<8x1xf32>
    %235 = vector.broadcast %227 : vector<8x1xf32> to vector<8x32xf32>
    %236 = arith.subf %221, %235 : vector<8x32xf32>
    %cst_136 = arith.constant 9.99999997E-7 : f32
    %237 = vector.broadcast %cst_136 : f32 to vector<8x1xf32>
    %238 = arith.addf %234, %237 : vector<8x1xf32>
    %239 = math.rsqrt %238 : vector<8x1xf32>
    %240 = vector.broadcast %239 : vector<8x1xf32> to vector<8x32xf32>
    %241 = arith.mulf %236, %240 : vector<8x32xf32>
    %242 = vector.broadcast %222 : vector<1x32xf32> to vector<8x32xf32>
    %243 = arith.mulf %241, %242 : vector<8x32xf32>
    %244 = vector.broadcast %223 : vector<1x32xf32> to vector<8x32xf32>
    %245 = arith.addf %243, %244 : vector<8x32xf32>
    %c0_137 = arith.constant 0 : index
    %c0_138 = arith.constant 0 : index
    %c0_139 = arith.constant 0 : index
    %246 = vector.load %arg13[%c0_137, %c0_138, %c0_139] : memref<1x8x32xf32, #tpu.memory_space<vmem>>, vector<1x8x32xf32>
    %247 = vector.shape_cast %246 : vector<1x8x32xf32> to vector<8x32xf32>
    %248 = vector.shape_cast %245 : vector<8x32xf32> to vector<1x8x32xf32>
    tpu.vector_store %arg13[%c0_137, %c0_138, %c0_139], %248 {strides = array<i32>} : memref<1x8x32xf32, #tpu.memory_space<vmem>>, vector<1x8x32xf32>,
    return
  }
  func.func @transform_0(%arg0: i32) -> (i32, i32, i32) {
    %c0_i32 = arith.constant 0 : i32
    %c0_i32_0 = arith.constant 0 : i32
    %c0_i32_1 = arith.constant 0 : i32
    return %arg0, %c0_i32, %c0_i32_0 : i32, i32, i32
  }
  func.func @transform_1(%arg0: i32) -> (i32, i32, i32) {
    %c0_i32 = arith.constant 0 : i32
    %c0_i32_0 = arith.constant 0 : i32
    %c0_i32_1 = arith.constant 0 : i32
    %c0_i32_2 = arith.constant 0 : i32
    return %c0_i32, %c0_i32_0, %c0_i32_1 : i32, i32, i32
  }
  func.func @transform_2(%arg0: i32) -> (i32, i32, i32) {
    %c0_i32 = arith.constant 0 : i32
    %c0_i32_0 = arith.constant 0 : i32
    %c0_i32_1 = arith.constant 0 : i32
    %c0_i32_2 = arith.constant 0 : i32
    return %c0_i32, %c0_i32_0, %c0_i32_1 : i32, i32, i32
  }
  func.func @transform_3(%arg0: i32) -> (i32, i32, i32) {
    %c0_i32 = arith.constant 0 : i32
    %c0_i32_0 = arith.constant 0 : i32
    %c0_i32_1 = arith.constant 0 : i32
    %c0_i32_2 = arith.constant 0 : i32
    return %c0_i32, %c0_i32_0, %c0_i32_1 : i32, i32, i32
  }
  func.func @transform_4(%arg0: i32) -> (i32, i32, i32) {
    %c0_i32 = arith.constant 0 : i32
    %c0_i32_0 = arith.constant 0 : i32
    %c0_i32_1 = arith.constant 0 : i32
    %c0_i32_2 = arith.constant 0 : i32
    return %c0_i32, %c0_i32_0, %c0_i32_1 : i32, i32, i32
  }
  func.func @transform_5(%arg0: i32) -> (i32, i32, i32) {
    %c0_i32 = arith.constant 0 : i32
    %c0_i32_0 = arith.constant 0 : i32
    %c0_i32_1 = arith.constant 0 : i32
    %c0_i32_2 = arith.constant 0 : i32
    return %c0_i32, %c0_i32_0, %c0_i32_1 : i32, i32, i32
  }
  func.func @transform_6(%arg0: i32) -> (i32, i32, i32) {
    %c0_i32 = arith.constant 0 : i32
    %c0_i32_0 = arith.constant 0 : i32
    %c0_i32_1 = arith.constant 0 : i32
    %c0_i32_2 = arith.constant 0 : i32
    return %c0_i32, %c0_i32_0, %c0_i32_1 : i32, i32, i32
  }
  func.func @transform_7(%arg0: i32) -> (i32, i32, i32) {
    %c0_i32 = arith.constant 0 : i32
    %c0_i32_0 = arith.constant 0 : i32
    %c0_i32_1 = arith.constant 0 : i32
    %c0_i32_2 = arith.constant 0 : i32
    return %c0_i32, %c0_i32_0, %c0_i32_1 : i32, i32, i32
  }
  func.func @transform_8(%arg0: i32) -> (i32, i32) {
    %c0_i32 = arith.constant 0 : i32
    %c0_i32_0 = arith.constant 0 : i32
    %c0_i32_1 = arith.constant 0 : i32
    return %c0_i32, %c0_i32_0 : i32, i32
  }
  func.func @transform_9(%arg0: i32) -> (i32, i32) {
    %c0_i32 = arith.constant 0 : i32
    %c0_i32_0 = arith.constant 0 : i32
    %c0_i32_1 = arith.constant 0 : i32
    return %c0_i32, %c0_i32_0 : i32, i32
  }
  func.func @transform_10(%arg0: i32) -> (i32, i32) {
    %c0_i32 = arith.constant 0 : i32
    %c0_i32_0 = arith.constant 0 : i32
    %c0_i32_1 = arith.constant 0 : i32
    return %c0_i32, %c0_i32_0 : i32, i32
  }
  func.func @transform_11(%arg0: i32) -> (i32, i32, i32) {
    %c0_i32 = arith.constant 0 : i32
    %c0_i32_0 = arith.constant 0 : i32
    %c0_i32_1 = arith.constant 0 : i32
    return %arg0, %c0_i32, %c0_i32_0 : i32, i32, i32
  }
  func.func @transform_12(%arg0: i32) -> (i32, i32, i32) {
    %c0_i32 = arith.constant 0 : i32
    %c0_i32_0 = arith.constant 0 : i32
    %c0_i32_1 = arith.constant 0 : i32
    return %arg0, %c0_i32, %c0_i32_0 : i32, i32, i32
  }
}

module attributes {stable_mosaic.version = 11 : i64} {
  func.func @_ffn_kernel(%arg0: i32, %arg1: memref<8x32xf32, #tpu.memory_space<vmem>>, %arg2: memref<32x64xf32, #tpu.memory_space<vmem>>, %arg3: memref<1x64xf32, #tpu.memory_space<vmem>>, %arg4: memref<64x32xf32, #tpu.memory_space<vmem>>, %arg5: memref<1x32xf32, #tpu.memory_space<vmem>>, %arg6: memref<1x32xf32, #tpu.memory_space<vmem>>, %arg7: memref<1x32xf32, #tpu.memory_space<vmem>>, %arg8: memref<8x32xf32, #tpu.memory_space<vmem>>) attributes {dimension_semantics = [#tpu.dimension_semantics<parallel>], iteration_bounds = array<i64: 2>, scalar_prefetch = 0 : i64, scratch_operands = 0 : i64, tpu.core_type = #tpu.core_type<tc>, window_params = [{transform_indices = @transform_0, window_bounds = array<i64: 8, 32>}, {pipeline_mode = #tpu.pipeline_mode<synchronous>, transform_indices = @transform_1, window_bounds = array<i64: 32, 64>}, {pipeline_mode = #tpu.pipeline_mode<synchronous>, transform_indices = @transform_2, window_bounds = array<i64: 1, 64>}, {pipeline_mode = #tpu.pipeline_mode<synchronous>, transform_indices = @transform_3, window_bounds = array<i64: 64, 32>}, {pipeline_mode = #tpu.pipeline_mode<synchronous>, transform_indices = @transform_4, window_bounds = array<i64: 1, 32>}, {pipeline_mode = #tpu.pipeline_mode<synchronous>, transform_indices = @transform_5, window_bounds = array<i64: 1, 32>}, {pipeline_mode = #tpu.pipeline_mode<synchronous>, transform_indices = @transform_6, window_bounds = array<i64: 1, 32>}, {transform_indices = @transform_7, window_bounds = array<i64: 8, 32>}]} {
    %c0 = arith.constant 0 : index
    %c0_0 = arith.constant 0 : index
    %0 = vector.load %arg1[%c0, %c0_0] : memref<8x32xf32, #tpu.memory_space<vmem>>, vector<8x32xf32>
    %1 = arith.truncf %0 : vector<8x32xf32> to vector<8x32xbf16>
    %c0_1 = arith.constant 0 : index
    %c0_2 = arith.constant 0 : index
    %2 = vector.load %arg2[%c0_1, %c0_2] : memref<32x64xf32, #tpu.memory_space<vmem>>, vector<32x64xf32>
    %3 = arith.truncf %2 : vector<32x64xf32> to vector<32x64xbf16>
    %cst = arith.constant dense<0.000000e+00> : vector<8x64xf32>
    %4 = tpu.matmul %1, %3, %cst {dimension_numbers = #tpu.dot_dimension_numbers<[1], [0], [0], [1], [0, 0, 1, 1], [], []>} : vector<8x32xbf16>, vector<32x64xbf16>, vector<8x64xf32> -> vector<8x64xf32>
    %c0_3 = arith.constant 0 : index
    %c0_4 = arith.constant 0 : index
    %5 = vector.load %arg3[%c0_3, %c0_4] : memref<1x64xf32, #tpu.memory_space<vmem>>, vector<1x64xf32>
    %6 = vector.broadcast %5 : vector<1x64xf32> to vector<8x64xf32>
    %7 = arith.addf %4, %6 : vector<8x64xf32>
    %cst_5 = arith.constant 0.000000e+00 : f32
    %8 = vector.broadcast %cst_5 : f32 to vector<8x64xf32>
    %9 = arith.maximumf %7, %8 : vector<8x64xf32>
    %10 = arith.truncf %9 : vector<8x64xf32> to vector<8x64xbf16>
    %c0_6 = arith.constant 0 : index
    %c0_7 = arith.constant 0 : index
    %11 = vector.load %arg4[%c0_6, %c0_7] : memref<64x32xf32, #tpu.memory_space<vmem>>, vector<64x32xf32>
    %12 = arith.truncf %11 : vector<64x32xf32> to vector<64x32xbf16>
    %cst_8 = arith.constant dense<0.000000e+00> : vector<8x32xf32>
    %13 = tpu.matmul %10, %12, %cst_8 {dimension_numbers = #tpu.dot_dimension_numbers<[1], [0], [0], [1], [0, 0, 1, 1], [], []>} : vector<8x64xbf16>, vector<64x32xbf16>, vector<8x32xf32> -> vector<8x32xf32>
    %c0_9 = arith.constant 0 : index
    %c0_10 = arith.constant 0 : index
    %14 = vector.load %arg5[%c0_9, %c0_10] : memref<1x32xf32, #tpu.memory_space<vmem>>, vector<1x32xf32>
    %15 = vector.broadcast %14 : vector<1x32xf32> to vector<8x32xf32>
    %16 = arith.addf %13, %15 : vector<8x32xf32>
    %17 = arith.addf %16, %0 : vector<8x32xf32>
    %c0_11 = arith.constant 0 : index
    %c0_12 = arith.constant 0 : index
    %18 = vector.load %arg6[%c0_11, %c0_12] : memref<1x32xf32, #tpu.memory_space<vmem>>, vector<1x32xf32>
    %c0_13 = arith.constant 0 : index
    %c0_14 = arith.constant 0 : index
    %19 = vector.load %arg7[%c0_13, %c0_14] : memref<1x32xf32, #tpu.memory_space<vmem>>, vector<1x32xf32>
    %cst_15 = arith.constant dense<0.000000e+00> : vector<8xf32>
    %20 = vector.multi_reduction <add>, %17, %cst_15 [1] : vector<8x32xf32> to vector<8xf32>
    %21 = vector.shape_cast %20 : vector<8xf32> to vector<8x1xf32>
    %cst_16 = arith.constant 3.200000e+01 : f32
    %22 = vector.broadcast %cst_16 : f32 to vector<8x1xf32>
    %23 = arith.divf %21, %22 : vector<8x1xf32>
    %24 = vector.broadcast %23 : vector<8x1xf32> to vector<8x32xf32>
    %25 = arith.subf %17, %24 : vector<8x32xf32>
    %26 = arith.mulf %25, %25 : vector<8x32xf32>
    %cst_17 = arith.constant dense<0.000000e+00> : vector<8xf32>
    %27 = vector.multi_reduction <add>, %26, %cst_17 [1] : vector<8x32xf32> to vector<8xf32>
    %28 = vector.shape_cast %27 : vector<8xf32> to vector<8x1xf32>
    %cst_18 = arith.constant 3.200000e+01 : f32
    %29 = vector.broadcast %cst_18 : f32 to vector<8x1xf32>
    %30 = arith.divf %28, %29 : vector<8x1xf32>
    %31 = vector.broadcast %23 : vector<8x1xf32> to vector<8x32xf32>
    %32 = arith.subf %17, %31 : vector<8x32xf32>
    %cst_19 = arith.constant 9.99999997E-7 : f32
    %33 = vector.broadcast %cst_19 : f32 to vector<8x1xf32>
    %34 = arith.addf %30, %33 : vector<8x1xf32>
    %35 = math.rsqrt %34 : vector<8x1xf32>
    %36 = vector.broadcast %35 : vector<8x1xf32> to vector<8x32xf32>
    %37 = arith.mulf %32, %36 : vector<8x32xf32>
    %38 = vector.broadcast %18 : vector<1x32xf32> to vector<8x32xf32>
    %39 = arith.mulf %37, %38 : vector<8x32xf32>
    %40 = vector.broadcast %19 : vector<1x32xf32> to vector<8x32xf32>
    %41 = arith.addf %39, %40 : vector<8x32xf32>
    %c0_20 = arith.constant 0 : index
    %c0_21 = arith.constant 0 : index
    %42 = vector.load %arg8[%c0_20, %c0_21] : memref<8x32xf32, #tpu.memory_space<vmem>>, vector<8x32xf32>
    tpu.vector_store %arg8[%c0_20, %c0_21], %41 {strides = array<i32>} : memref<8x32xf32, #tpu.memory_space<vmem>>, vector<8x32xf32>,
    return
  }
  func.func @transform_0(%arg0: i32) -> (i32, i32) {
    %c0_i32 = arith.constant 0 : i32
    %c0_i32_0 = arith.constant 0 : i32
    return %arg0, %c0_i32 : i32, i32
  }
  func.func @transform_1(%arg0: i32) -> (i32, i32) {
    %c0_i32 = arith.constant 0 : i32
    %c0_i32_0 = arith.constant 0 : i32
    %c0_i32_1 = arith.constant 0 : i32
    return %c0_i32, %c0_i32_0 : i32, i32
  }
  func.func @transform_2(%arg0: i32) -> (i32, i32) {
    %c0_i32 = arith.constant 0 : i32
    %c0_i32_0 = arith.constant 0 : i32
    %c0_i32_1 = arith.constant 0 : i32
    return %c0_i32, %c0_i32_0 : i32, i32
  }
  func.func @transform_3(%arg0: i32) -> (i32, i32) {
    %c0_i32 = arith.constant 0 : i32
    %c0_i32_0 = arith.constant 0 : i32
    %c0_i32_1 = arith.constant 0 : i32
    return %c0_i32, %c0_i32_0 : i32, i32
  }
  func.func @transform_4(%arg0: i32) -> (i32, i32) {
    %c0_i32 = arith.constant 0 : i32
    %c0_i32_0 = arith.constant 0 : i32
    %c0_i32_1 = arith.constant 0 : i32
    return %c0_i32, %c0_i32_0 : i32, i32
  }
  func.func @transform_5(%arg0: i32) -> (i32, i32) {
    %c0_i32 = arith.constant 0 : i32
    %c0_i32_0 = arith.constant 0 : i32
    %c0_i32_1 = arith.constant 0 : i32
    return %c0_i32, %c0_i32_0 : i32, i32
  }
  func.func @transform_6(%arg0: i32) -> (i32, i32) {
    %c0_i32 = arith.constant 0 : i32
    %c0_i32_0 = arith.constant 0 : i32
    %c0_i32_1 = arith.constant 0 : i32
    return %c0_i32, %c0_i32_0 : i32, i32
  }
  func.func @transform_7(%arg0: i32) -> (i32, i32) {
    %c0_i32 = arith.constant 0 : i32
    %c0_i32_0 = arith.constant 0 : i32
    return %arg0, %c0_i32 : i32, i32
  }
}

module attributes {stable_mosaic.version = 11 : i64} {
  func.func @_self_attn_sublayer_kernel(%arg0: i32, %arg1: memref<1x8x32xf32, #tpu.memory_space<vmem>>, %arg2: memref<4x32x8xf32, #tpu.memory_space<vmem>>, %arg3: memref<4x32x8xf32, #tpu.memory_space<vmem>>, %arg4: memref<4x32x8xf32, #tpu.memory_space<vmem>>, %arg5: memref<4x1x8xf32, #tpu.memory_space<vmem>>, %arg6: memref<4x1x8xf32, #tpu.memory_space<vmem>>, %arg7: memref<4x1x8xf32, #tpu.memory_space<vmem>>, %arg8: memref<4x8x32xf32, #tpu.memory_space<vmem>>, %arg9: memref<1x32xf32, #tpu.memory_space<vmem>>, %arg10: memref<1x32xf32, #tpu.memory_space<vmem>>, %arg11: memref<1x32xf32, #tpu.memory_space<vmem>>, %arg12: memref<1x8x32xf32, #tpu.memory_space<vmem>>) attributes {dimension_semantics = [#tpu.dimension_semantics<parallel>], iteration_bounds = array<i64: 2>, scalar_prefetch = 0 : i64, scratch_operands = 0 : i64, tpu.core_type = #tpu.core_type<tc>, window_params = [{transform_indices = @transform_0, window_bounds = array<i64: 1, 8, 32>}, {pipeline_mode = #tpu.pipeline_mode<synchronous>, transform_indices = @transform_1, window_bounds = array<i64: 4, 32, 8>}, {pipeline_mode = #tpu.pipeline_mode<synchronous>, transform_indices = @transform_2, window_bounds = array<i64: 4, 32, 8>}, {pipeline_mode = #tpu.pipeline_mode<synchronous>, transform_indices = @transform_3, window_bounds = array<i64: 4, 32, 8>}, {pipeline_mode = #tpu.pipeline_mode<synchronous>, transform_indices = @transform_4, window_bounds = array<i64: 4, 1, 8>}, {pipeline_mode = #tpu.pipeline_mode<synchronous>, transform_indices = @transform_5, window_bounds = array<i64: 4, 1, 8>}, {pipeline_mode = #tpu.pipeline_mode<synchronous>, transform_indices = @transform_6, window_bounds = array<i64: 4, 1, 8>}, {pipeline_mode = #tpu.pipeline_mode<synchronous>, transform_indices = @transform_7, window_bounds = array<i64: 4, 8, 32>}, {pipeline_mode = #tpu.pipeline_mode<synchronous>, transform_indices = @transform_8, window_bounds = array<i64: 1, 32>}, {pipeline_mode = #tpu.pipeline_mode<synchronous>, transform_indices = @transform_9, window_bounds = array<i64: 1, 32>}, {pipeline_mode = #tpu.pipeline_mode<synchronous>, transform_indices = @transform_10, window_bounds = array<i64: 1, 32>}, {transform_indices = @transform_11, window_bounds = array<i64: 1, 8, 32>}]} {
    %c0 = arith.constant 0 : index
    %c0_0 = arith.constant 0 : index
    %c0_1 = arith.constant 0 : index
    %0 = vector.load %arg1[%c0, %c0_0, %c0_1] : memref<1x8x32xf32, #tpu.memory_space<vmem>>, vector<1x8x32xf32>
    %1 = vector.shape_cast %0 : vector<1x8x32xf32> to vector<8x32xf32>
    %2 = arith.truncf %1 : vector<8x32xf32> to vector<8x32xbf16>
    %3 = arith.truncf %1 : vector<8x32xf32> to vector<8x32xbf16>
    %cst = arith.constant 0.000000e+00 : f32
    %4 = vector.broadcast %cst : f32 to vector<8x32xf32>
    %c0_2 = arith.constant 0 : index
    %c0_3 = arith.constant 0 : index
    %c0_4 = arith.constant 0 : index
    %5 = vector.load %arg2[%c0_2, %c0_3, %c0_4] : memref<4x32x8xf32, #tpu.memory_space<vmem>>, vector<1x32x8xf32>
    %6 = vector.shape_cast %5 : vector<1x32x8xf32> to vector<32x8xf32>
    %7 = arith.truncf %6 : vector<32x8xf32> to vector<32x8xbf16>
    %cst_5 = arith.constant dense<0.000000e+00> : vector<8x8xf32>
    %8 = tpu.matmul %2, %7, %cst_5 {dimension_numbers = #tpu.dot_dimension_numbers<[1], [0], [0], [1], [0, 0, 1, 1], [], []>} : vector<8x32xbf16>, vector<32x8xbf16>, vector<8x8xf32> -> vector<8x8xf32>
    %c0_6 = arith.constant 0 : index
    %c0_7 = arith.constant 0 : index
    %c0_8 = arith.constant 0 : index
    %9 = vector.load %arg5[%c0_6, %c0_7, %c0_8] : memref<4x1x8xf32, #tpu.memory_space<vmem>>, vector<1x1x8xf32>
    %10 = vector.shape_cast %9 : vector<1x1x8xf32> to vector<1x8xf32>
    %11 = vector.broadcast %10 : vector<1x8xf32> to vector<8x8xf32>
    %12 = arith.addf %8, %11 : vector<8x8xf32>
    %c0_9 = arith.constant 0 : index
    %c0_10 = arith.constant 0 : index
    %c0_11 = arith.constant 0 : index
    %13 = vector.load %arg3[%c0_9, %c0_10, %c0_11] : memref<4x32x8xf32, #tpu.memory_space<vmem>>, vector<1x32x8xf32>
    %14 = vector.shape_cast %13 : vector<1x32x8xf32> to vector<32x8xf32>
    %15 = arith.truncf %14 : vector<32x8xf32> to vector<32x8xbf16>
    %cst_12 = arith.constant dense<0.000000e+00> : vector<8x8xf32>
    %16 = tpu.matmul %3, %15, %cst_12 {dimension_numbers = #tpu.dot_dimension_numbers<[1], [0], [0], [1], [0, 0, 1, 1], [], []>} : vector<8x32xbf16>, vector<32x8xbf16>, vector<8x8xf32> -> vector<8x8xf32>
    %c0_13 = arith.constant 0 : index
    %c0_14 = arith.constant 0 : index
    %c0_15 = arith.constant 0 : index
    %17 = vector.load %arg6[%c0_13, %c0_14, %c0_15] : memref<4x1x8xf32, #tpu.memory_space<vmem>>, vector<1x1x8xf32>
    %18 = vector.shape_cast %17 : vector<1x1x8xf32> to vector<1x8xf32>
    %19 = vector.broadcast %18 : vector<1x8xf32> to vector<8x8xf32>
    %20 = arith.addf %16, %19 : vector<8x8xf32>
    %c0_16 = arith.constant 0 : index
    %c0_17 = arith.constant 0 : index
    %c0_18 = arith.constant 0 : index
    %21 = vector.load %arg4[%c0_16, %c0_17, %c0_18] : memref<4x32x8xf32, #tpu.memory_space<vmem>>, vector<1x32x8xf32>
    %22 = vector.shape_cast %21 : vector<1x32x8xf32> to vector<32x8xf32>
    %23 = arith.truncf %22 : vector<32x8xf32> to vector<32x8xbf16>
    %cst_19 = arith.constant dense<0.000000e+00> : vector<8x8xf32>
    %24 = tpu.matmul %3, %23, %cst_19 {dimension_numbers = #tpu.dot_dimension_numbers<[1], [0], [0], [1], [0, 0, 1, 1], [], []>} : vector<8x32xbf16>, vector<32x8xbf16>, vector<8x8xf32> -> vector<8x8xf32>
    %c0_20 = arith.constant 0 : index
    %c0_21 = arith.constant 0 : index
    %c0_22 = arith.constant 0 : index
    %25 = vector.load %arg7[%c0_20, %c0_21, %c0_22] : memref<4x1x8xf32, #tpu.memory_space<vmem>>, vector<1x1x8xf32>
    %26 = vector.shape_cast %25 : vector<1x1x8xf32> to vector<1x8xf32>
    %27 = vector.broadcast %26 : vector<1x8xf32> to vector<8x8xf32>
    %28 = arith.addf %24, %27 : vector<8x8xf32>
    %29 = arith.truncf %12 : vector<8x8xf32> to vector<8x8xbf16>
    %30 = arith.truncf %20 : vector<8x8xf32> to vector<8x8xbf16>
    %cst_23 = arith.constant dense<0.000000e+00> : vector<8x8xf32>
    %31 = tpu.matmul %29, %30, %cst_23 {dimension_numbers = #tpu.dot_dimension_numbers<[1], [1], [0], [0], [0, 0, 1, 0], [], []>} : vector<8x8xbf16>, vector<8x8xbf16>, vector<8x8xf32> -> vector<8x8xf32>
    %cst_24 = arith.constant 0.353553385 : f32
    %32 = vector.broadcast %cst_24 : f32 to vector<8x8xf32>
    %33 = arith.mulf %31, %32 : vector<8x8xf32>
    %cst_25 = arith.constant dense<0xFF800000> : vector<8xf32>
    %34 = vector.multi_reduction <maximumf>, %33, %cst_25 [1] : vector<8x8xf32> to vector<8xf32>
    %35 = vector.shape_cast %34 : vector<8xf32> to vector<8x1xf32>
    %36 = vector.broadcast %35 : vector<8x1xf32> to vector<8x8xf32>
    %37 = arith.subf %33, %36 : vector<8x8xf32>
    %38 = math.exp %37 : vector<8x8xf32>
    %cst_26 = arith.constant dense<0.000000e+00> : vector<8xf32>
    %39 = vector.multi_reduction <add>, %38, %cst_26 [1] : vector<8x8xf32> to vector<8xf32>
    %40 = vector.shape_cast %39 : vector<8xf32> to vector<8x1xf32>
    %41 = tpu.reciprocal %40 {approx = true} : vector<8x1xf32> -> vector<8x1xf32>
    %42 = vector.broadcast %41 : vector<8x1xf32> to vector<8x8xf32>
    %43 = arith.mulf %38, %42 : vector<8x8xf32>
    %44 = arith.truncf %43 : vector<8x8xf32> to vector<8x8xbf16>
    %45 = arith.truncf %28 : vector<8x8xf32> to vector<8x8xbf16>
    %cst_27 = arith.constant dense<0.000000e+00> : vector<8x8xf32>
    %46 = tpu.matmul %44, %45, %cst_27 {dimension_numbers = #tpu.dot_dimension_numbers<[1], [0], [0], [1], [0, 0, 1, 1], [], []>} : vector<8x8xbf16>, vector<8x8xbf16>, vector<8x8xf32> -> vector<8x8xf32>
    %47 = arith.truncf %46 : vector<8x8xf32> to vector<8x8xbf16>
    %c0_28 = arith.constant 0 : index
    %c0_29 = arith.constant 0 : index
    %c0_30 = arith.constant 0 : index
    %48 = vector.load %arg8[%c0_28, %c0_29, %c0_30] : memref<4x8x32xf32, #tpu.memory_space<vmem>>, vector<1x8x32xf32>
    %49 = vector.shape_cast %48 : vector<1x8x32xf32> to vector<8x32xf32>
    %50 = arith.truncf %49 : vector<8x32xf32> to vector<8x32xbf16>
    %cst_31 = arith.constant dense<0.000000e+00> : vector<8x32xf32>
    %51 = tpu.matmul %47, %50, %cst_31 {dimension_numbers = #tpu.dot_dimension_numbers<[1], [0], [0], [1], [0, 0, 1, 1], [], []>} : vector<8x8xbf16>, vector<8x32xbf16>, vector<8x32xf32> -> vector<8x32xf32>
    %52 = arith.addf %4, %51 : vector<8x32xf32>
    %c1 = arith.constant 1 : index
    %c0_32 = arith.constant 0 : index
    %c0_33 = arith.constant 0 : index
    %53 = vector.load %arg2[%c1, %c0_32, %c0_33] : memref<4x32x8xf32, #tpu.memory_space<vmem>>, vector<1x32x8xf32>
    %54 = vector.shape_cast %53 : vector<1x32x8xf32> to vector<32x8xf32>
    %55 = arith.truncf %54 : vector<32x8xf32> to vector<32x8xbf16>
    %cst_34 = arith.constant dense<0.000000e+00> : vector<8x8xf32>
    %56 = tpu.matmul %2, %55, %cst_34 {dimension_numbers = #tpu.dot_dimension_numbers<[1], [0], [0], [1], [0, 0, 1, 1], [], []>} : vector<8x32xbf16>, vector<32x8xbf16>, vector<8x8xf32> -> vector<8x8xf32>
    %c1_35 = arith.constant 1 : index
    %c0_36 = arith.constant 0 : index
    %c0_37 = arith.constant 0 : index
    %57 = vector.load %arg5[%c1_35, %c0_36, %c0_37] : memref<4x1x8xf32, #tpu.memory_space<vmem>>, vector<1x1x8xf32>
    %58 = vector.shape_cast %57 : vector<1x1x8xf32> to vector<1x8xf32>
    %59 = vector.broadcast %58 : vector<1x8xf32> to vector<8x8xf32>
    %60 = arith.addf %56, %59 : vector<8x8xf32>
    %c1_38 = arith.constant 1 : index
    %c0_39 = arith.constant 0 : index
    %c0_40 = arith.constant 0 : index
    %61 = vector.load %arg3[%c1_38, %c0_39, %c0_40] : memref<4x32x8xf32, #tpu.memory_space<vmem>>, vector<1x32x8xf32>
    %62 = vector.shape_cast %61 : vector<1x32x8xf32> to vector<32x8xf32>
    %63 = arith.truncf %62 : vector<32x8xf32> to vector<32x8xbf16>
    %cst_41 = arith.constant dense<0.000000e+00> : vector<8x8xf32>
    %64 = tpu.matmul %3, %63, %cst_41 {dimension_numbers = #tpu.dot_dimension_numbers<[1], [0], [0], [1], [0, 0, 1, 1], [], []>} : vector<8x32xbf16>, vector<32x8xbf16>, vector<8x8xf32> -> vector<8x8xf32>
    %c1_42 = arith.constant 1 : index
    %c0_43 = arith.constant 0 : index
    %c0_44 = arith.constant 0 : index
    %65 = vector.load %arg6[%c1_42, %c0_43, %c0_44] : memref<4x1x8xf32, #tpu.memory_space<vmem>>, vector<1x1x8xf32>
    %66 = vector.shape_cast %65 : vector<1x1x8xf32> to vector<1x8xf32>
    %67 = vector.broadcast %66 : vector<1x8xf32> to vector<8x8xf32>
    %68 = arith.addf %64, %67 : vector<8x8xf32>
    %c1_45 = arith.constant 1 : index
    %c0_46 = arith.constant 0 : index
    %c0_47 = arith.constant 0 : index
    %69 = vector.load %arg4[%c1_45, %c0_46, %c0_47] : memref<4x32x8xf32, #tpu.memory_space<vmem>>, vector<1x32x8xf32>
    %70 = vector.shape_cast %69 : vector<1x32x8xf32> to vector<32x8xf32>
    %71 = arith.truncf %70 : vector<32x8xf32> to vector<32x8xbf16>
    %cst_48 = arith.constant dense<0.000000e+00> : vector<8x8xf32>
    %72 = tpu.matmul %3, %71, %cst_48 {dimension_numbers = #tpu.dot_dimension_numbers<[1], [0], [0], [1], [0, 0, 1, 1], [], []>} : vector<8x32xbf16>, vector<32x8xbf16>, vector<8x8xf32> -> vector<8x8xf32>
    %c1_49 = arith.constant 1 : index
    %c0_50 = arith.constant 0 : index
    %c0_51 = arith.constant 0 : index
    %73 = vector.load %arg7[%c1_49, %c0_50, %c0_51] : memref<4x1x8xf32, #tpu.memory_space<vmem>>, vector<1x1x8xf32>
    %74 = vector.shape_cast %73 : vector<1x1x8xf32> to vector<1x8xf32>
    %75 = vector.broadcast %74 : vector<1x8xf32> to vector<8x8xf32>
    %76 = arith.addf %72, %75 : vector<8x8xf32>
    %77 = arith.truncf %60 : vector<8x8xf32> to vector<8x8xbf16>
    %78 = arith.truncf %68 : vector<8x8xf32> to vector<8x8xbf16>
    %cst_52 = arith.constant dense<0.000000e+00> : vector<8x8xf32>
    %79 = tpu.matmul %77, %78, %cst_52 {dimension_numbers = #tpu.dot_dimension_numbers<[1], [1], [0], [0], [0, 0, 1, 0], [], []>} : vector<8x8xbf16>, vector<8x8xbf16>, vector<8x8xf32> -> vector<8x8xf32>
    %cst_53 = arith.constant 0.353553385 : f32
    %80 = vector.broadcast %cst_53 : f32 to vector<8x8xf32>
    %81 = arith.mulf %79, %80 : vector<8x8xf32>
    %cst_54 = arith.constant dense<0xFF800000> : vector<8xf32>
    %82 = vector.multi_reduction <maximumf>, %81, %cst_54 [1] : vector<8x8xf32> to vector<8xf32>
    %83 = vector.shape_cast %82 : vector<8xf32> to vector<8x1xf32>
    %84 = vector.broadcast %83 : vector<8x1xf32> to vector<8x8xf32>
    %85 = arith.subf %81, %84 : vector<8x8xf32>
    %86 = math.exp %85 : vector<8x8xf32>
    %cst_55 = arith.constant dense<0.000000e+00> : vector<8xf32>
    %87 = vector.multi_reduction <add>, %86, %cst_55 [1] : vector<8x8xf32> to vector<8xf32>
    %88 = vector.shape_cast %87 : vector<8xf32> to vector<8x1xf32>
    %89 = tpu.reciprocal %88 {approx = true} : vector<8x1xf32> -> vector<8x1xf32>
    %90 = vector.broadcast %89 : vector<8x1xf32> to vector<8x8xf32>
    %91 = arith.mulf %86, %90 : vector<8x8xf32>
    %92 = arith.truncf %91 : vector<8x8xf32> to vector<8x8xbf16>
    %93 = arith.truncf %76 : vector<8x8xf32> to vector<8x8xbf16>
    %cst_56 = arith.constant dense<0.000000e+00> : vector<8x8xf32>
    %94 = tpu.matmul %92, %93, %cst_56 {dimension_numbers = #tpu.dot_dimension_numbers<[1], [0], [0], [1], [0, 0, 1, 1], [], []>} : vector<8x8xbf16>, vector<8x8xbf16>, vector<8x8xf32> -> vector<8x8xf32>
    %95 = arith.truncf %94 : vector<8x8xf32> to vector<8x8xbf16>
    %c1_57 = arith.constant 1 : index
    %c0_58 = arith.constant 0 : index
    %c0_59 = arith.constant 0 : index
    %96 = vector.load %arg8[%c1_57, %c0_58, %c0_59] : memref<4x8x32xf32, #tpu.memory_space<vmem>>, vector<1x8x32xf32>
    %97 = vector.shape_cast %96 : vector<1x8x32xf32> to vector<8x32xf32>
    %98 = arith.truncf %97 : vector<8x32xf32> to vector<8x32xbf16>
    %cst_60 = arith.constant dense<0.000000e+00> : vector<8x32xf32>
    %99 = tpu.matmul %95, %98, %cst_60 {dimension_numbers = #tpu.dot_dimension_numbers<[1], [0], [0], [1], [0, 0, 1, 1], [], []>} : vector<8x8xbf16>, vector<8x32xbf16>, vector<8x32xf32> -> vector<8x32xf32>
    %100 = arith.addf %52, %99 : vector<8x32xf32>
    %c2 = arith.constant 2 : index
    %c0_61 = arith.constant 0 : index
    %c0_62 = arith.constant 0 : index
    %101 = vector.load %arg2[%c2, %c0_61, %c0_62] : memref<4x32x8xf32, #tpu.memory_space<vmem>>, vector<1x32x8xf32>
    %102 = vector.shape_cast %101 : vector<1x32x8xf32> to vector<32x8xf32>
    %103 = arith.truncf %102 : vector<32x8xf32> to vector<32x8xbf16>
    %cst_63 = arith.constant dense<0.000000e+00> : vector<8x8xf32>
    %104 = tpu.matmul %2, %103, %cst_63 {dimension_numbers = #tpu.dot_dimension_numbers<[1], [0], [0], [1], [0, 0, 1, 1], [], []>} : vector<8x32xbf16>, vector<32x8xbf16>, vector<8x8xf32> -> vector<8x8xf32>
    %c2_64 = arith.constant 2 : index
    %c0_65 = arith.constant 0 : index
    %c0_66 = arith.constant 0 : index
    %105 = vector.load %arg5[%c2_64, %c0_65, %c0_66] : memref<4x1x8xf32, #tpu.memory_space<vmem>>, vector<1x1x8xf32>
    %106 = vector.shape_cast %105 : vector<1x1x8xf32> to vector<1x8xf32>
    %107 = vector.broadcast %106 : vector<1x8xf32> to vector<8x8xf32>
    %108 = arith.addf %104, %107 : vector<8x8xf32>
    %c2_67 = arith.constant 2 : index
    %c0_68 = arith.constant 0 : index
    %c0_69 = arith.constant 0 : index
    %109 = vector.load %arg3[%c2_67, %c0_68, %c0_69] : memref<4x32x8xf32, #tpu.memory_space<vmem>>, vector<1x32x8xf32>
    %110 = vector.shape_cast %109 : vector<1x32x8xf32> to vector<32x8xf32>
    %111 = arith.truncf %110 : vector<32x8xf32> to vector<32x8xbf16>
    %cst_70 = arith.constant dense<0.000000e+00> : vector<8x8xf32>
    %112 = tpu.matmul %3, %111, %cst_70 {dimension_numbers = #tpu.dot_dimension_numbers<[1], [0], [0], [1], [0, 0, 1, 1], [], []>} : vector<8x32xbf16>, vector<32x8xbf16>, vector<8x8xf32> -> vector<8x8xf32>
    %c2_71 = arith.constant 2 : index
    %c0_72 = arith.constant 0 : index
    %c0_73 = arith.constant 0 : index
    %113 = vector.load %arg6[%c2_71, %c0_72, %c0_73] : memref<4x1x8xf32, #tpu.memory_space<vmem>>, vector<1x1x8xf32>
    %114 = vector.shape_cast %113 : vector<1x1x8xf32> to vector<1x8xf32>
    %115 = vector.broadcast %114 : vector<1x8xf32> to vector<8x8xf32>
    %116 = arith.addf %112, %115 : vector<8x8xf32>
    %c2_74 = arith.constant 2 : index
    %c0_75 = arith.constant 0 : index
    %c0_76 = arith.constant 0 : index
    %117 = vector.load %arg4[%c2_74, %c0_75, %c0_76] : memref<4x32x8xf32, #tpu.memory_space<vmem>>, vector<1x32x8xf32>
    %118 = vector.shape_cast %117 : vector<1x32x8xf32> to vector<32x8xf32>
    %119 = arith.truncf %118 : vector<32x8xf32> to vector<32x8xbf16>
    %cst_77 = arith.constant dense<0.000000e+00> : vector<8x8xf32>
    %120 = tpu.matmul %3, %119, %cst_77 {dimension_numbers = #tpu.dot_dimension_numbers<[1], [0], [0], [1], [0, 0, 1, 1], [], []>} : vector<8x32xbf16>, vector<32x8xbf16>, vector<8x8xf32> -> vector<8x8xf32>
    %c2_78 = arith.constant 2 : index
    %c0_79 = arith.constant 0 : index
    %c0_80 = arith.constant 0 : index
    %121 = vector.load %arg7[%c2_78, %c0_79, %c0_80] : memref<4x1x8xf32, #tpu.memory_space<vmem>>, vector<1x1x8xf32>
    %122 = vector.shape_cast %121 : vector<1x1x8xf32> to vector<1x8xf32>
    %123 = vector.broadcast %122 : vector<1x8xf32> to vector<8x8xf32>
    %124 = arith.addf %120, %123 : vector<8x8xf32>
    %125 = arith.truncf %108 : vector<8x8xf32> to vector<8x8xbf16>
    %126 = arith.truncf %116 : vector<8x8xf32> to vector<8x8xbf16>
    %cst_81 = arith.constant dense<0.000000e+00> : vector<8x8xf32>
    %127 = tpu.matmul %125, %126, %cst_81 {dimension_numbers = #tpu.dot_dimension_numbers<[1], [1], [0], [0], [0, 0, 1, 0], [], []>} : vector<8x8xbf16>, vector<8x8xbf16>, vector<8x8xf32> -> vector<8x8xf32>
    %cst_82 = arith.constant 0.353553385 : f32
    %128 = vector.broadcast %cst_82 : f32 to vector<8x8xf32>
    %129 = arith.mulf %127, %128 : vector<8x8xf32>
    %cst_83 = arith.constant dense<0xFF800000> : vector<8xf32>
    %130 = vector.multi_reduction <maximumf>, %129, %cst_83 [1] : vector<8x8xf32> to vector<8xf32>
    %131 = vector.shape_cast %130 : vector<8xf32> to vector<8x1xf32>
    %132 = vector.broadcast %131 : vector<8x1xf32> to vector<8x8xf32>
    %133 = arith.subf %129, %132 : vector<8x8xf32>
    %134 = math.exp %133 : vector<8x8xf32>
    %cst_84 = arith.constant dense<0.000000e+00> : vector<8xf32>
    %135 = vector.multi_reduction <add>, %134, %cst_84 [1] : vector<8x8xf32> to vector<8xf32>
    %136 = vector.shape_cast %135 : vector<8xf32> to vector<8x1xf32>
    %137 = tpu.reciprocal %136 {approx = true} : vector<8x1xf32> -> vector<8x1xf32>
    %138 = vector.broadcast %137 : vector<8x1xf32> to vector<8x8xf32>
    %139 = arith.mulf %134, %138 : vector<8x8xf32>
    %140 = arith.truncf %139 : vector<8x8xf32> to vector<8x8xbf16>
    %141 = arith.truncf %124 : vector<8x8xf32> to vector<8x8xbf16>
    %cst_85 = arith.constant dense<0.000000e+00> : vector<8x8xf32>
    %142 = tpu.matmul %140, %141, %cst_85 {dimension_numbers = #tpu.dot_dimension_numbers<[1], [0], [0], [1], [0, 0, 1, 1], [], []>} : vector<8x8xbf16>, vector<8x8xbf16>, vector<8x8xf32> -> vector<8x8xf32>
    %143 = arith.truncf %142 : vector<8x8xf32> to vector<8x8xbf16>
    %c2_86 = arith.constant 2 : index
    %c0_87 = arith.constant 0 : index
    %c0_88 = arith.constant 0 : index
    %144 = vector.load %arg8[%c2_86, %c0_87, %c0_88] : memref<4x8x32xf32, #tpu.memory_space<vmem>>, vector<1x8x32xf32>
    %145 = vector.shape_cast %144 : vector<1x8x32xf32> to vector<8x32xf32>
    %146 = arith.truncf %145 : vector<8x32xf32> to vector<8x32xbf16>
    %cst_89 = arith.constant dense<0.000000e+00> : vector<8x32xf32>
    %147 = tpu.matmul %143, %146, %cst_89 {dimension_numbers = #tpu.dot_dimension_numbers<[1], [0], [0], [1], [0, 0, 1, 1], [], []>} : vector<8x8xbf16>, vector<8x32xbf16>, vector<8x32xf32> -> vector<8x32xf32>
    %148 = arith.addf %100, %147 : vector<8x32xf32>
    %c3 = arith.constant 3 : index
    %c0_90 = arith.constant 0 : index
    %c0_91 = arith.constant 0 : index
    %149 = vector.load %arg2[%c3, %c0_90, %c0_91] : memref<4x32x8xf32, #tpu.memory_space<vmem>>, vector<1x32x8xf32>
    %150 = vector.shape_cast %149 : vector<1x32x8xf32> to vector<32x8xf32>
    %151 = arith.truncf %150 : vector<32x8xf32> to vector<32x8xbf16>
    %cst_92 = arith.constant dense<0.000000e+00> : vector<8x8xf32>
    %152 = tpu.matmul %2, %151, %cst_92 {dimension_numbers = #tpu.dot_dimension_numbers<[1], [0], [0], [1], [0, 0, 1, 1], [], []>} : vector<8x32xbf16>, vector<32x8xbf16>, vector<8x8xf32> -> vector<8x8xf32>
    %c3_93 = arith.constant 3 : index
    %c0_94 = arith.constant 0 : index
    %c0_95 = arith.constant 0 : index
    %153 = vector.load %arg5[%c3_93, %c0_94, %c0_95] : memref<4x1x8xf32, #tpu.memory_space<vmem>>, vector<1x1x8xf32>
    %154 = vector.shape_cast %153 : vector<1x1x8xf32> to vector<1x8xf32>
    %155 = vector.broadcast %154 : vector<1x8xf32> to vector<8x8xf32>
    %156 = arith.addf %152, %155 : vector<8x8xf32>
    %c3_96 = arith.constant 3 : index
    %c0_97 = arith.constant 0 : index
    %c0_98 = arith.constant 0 : index
    %157 = vector.load %arg3[%c3_96, %c0_97, %c0_98] : memref<4x32x8xf32, #tpu.memory_space<vmem>>, vector<1x32x8xf32>
    %158 = vector.shape_cast %157 : vector<1x32x8xf32> to vector<32x8xf32>
    %159 = arith.truncf %158 : vector<32x8xf32> to vector<32x8xbf16>
    %cst_99 = arith.constant dense<0.000000e+00> : vector<8x8xf32>
    %160 = tpu.matmul %3, %159, %cst_99 {dimension_numbers = #tpu.dot_dimension_numbers<[1], [0], [0], [1], [0, 0, 1, 1], [], []>} : vector<8x32xbf16>, vector<32x8xbf16>, vector<8x8xf32> -> vector<8x8xf32>
    %c3_100 = arith.constant 3 : index
    %c0_101 = arith.constant 0 : index
    %c0_102 = arith.constant 0 : index
    %161 = vector.load %arg6[%c3_100, %c0_101, %c0_102] : memref<4x1x8xf32, #tpu.memory_space<vmem>>, vector<1x1x8xf32>
    %162 = vector.shape_cast %161 : vector<1x1x8xf32> to vector<1x8xf32>
    %163 = vector.broadcast %162 : vector<1x8xf32> to vector<8x8xf32>
    %164 = arith.addf %160, %163 : vector<8x8xf32>
    %c3_103 = arith.constant 3 : index
    %c0_104 = arith.constant 0 : index
    %c0_105 = arith.constant 0 : index
    %165 = vector.load %arg4[%c3_103, %c0_104, %c0_105] : memref<4x32x8xf32, #tpu.memory_space<vmem>>, vector<1x32x8xf32>
    %166 = vector.shape_cast %165 : vector<1x32x8xf32> to vector<32x8xf32>
    %167 = arith.truncf %166 : vector<32x8xf32> to vector<32x8xbf16>
    %cst_106 = arith.constant dense<0.000000e+00> : vector<8x8xf32>
    %168 = tpu.matmul %3, %167, %cst_106 {dimension_numbers = #tpu.dot_dimension_numbers<[1], [0], [0], [1], [0, 0, 1, 1], [], []>} : vector<8x32xbf16>, vector<32x8xbf16>, vector<8x8xf32> -> vector<8x8xf32>
    %c3_107 = arith.constant 3 : index
    %c0_108 = arith.constant 0 : index
    %c0_109 = arith.constant 0 : index
    %169 = vector.load %arg7[%c3_107, %c0_108, %c0_109] : memref<4x1x8xf32, #tpu.memory_space<vmem>>, vector<1x1x8xf32>
    %170 = vector.shape_cast %169 : vector<1x1x8xf32> to vector<1x8xf32>
    %171 = vector.broadcast %170 : vector<1x8xf32> to vector<8x8xf32>
    %172 = arith.addf %168, %171 : vector<8x8xf32>
    %173 = arith.truncf %156 : vector<8x8xf32> to vector<8x8xbf16>
    %174 = arith.truncf %164 : vector<8x8xf32> to vector<8x8xbf16>
    %cst_110 = arith.constant dense<0.000000e+00> : vector<8x8xf32>
    %175 = tpu.matmul %173, %174, %cst_110 {dimension_numbers = #tpu.dot_dimension_numbers<[1], [1], [0], [0], [0, 0, 1, 0], [], []>} : vector<8x8xbf16>, vector<8x8xbf16>, vector<8x8xf32> -> vector<8x8xf32>
    %cst_111 = arith.constant 0.353553385 : f32
    %176 = vector.broadcast %cst_111 : f32 to vector<8x8xf32>
    %177 = arith.mulf %175, %176 : vector<8x8xf32>
    %cst_112 = arith.constant dense<0xFF800000> : vector<8xf32>
    %178 = vector.multi_reduction <maximumf>, %177, %cst_112 [1] : vector<8x8xf32> to vector<8xf32>
    %179 = vector.shape_cast %178 : vector<8xf32> to vector<8x1xf32>
    %180 = vector.broadcast %179 : vector<8x1xf32> to vector<8x8xf32>
    %181 = arith.subf %177, %180 : vector<8x8xf32>
    %182 = math.exp %181 : vector<8x8xf32>
    %cst_113 = arith.constant dense<0.000000e+00> : vector<8xf32>
    %183 = vector.multi_reduction <add>, %182, %cst_113 [1] : vector<8x8xf32> to vector<8xf32>
    %184 = vector.shape_cast %183 : vector<8xf32> to vector<8x1xf32>
    %185 = tpu.reciprocal %184 {approx = true} : vector<8x1xf32> -> vector<8x1xf32>
    %186 = vector.broadcast %185 : vector<8x1xf32> to vector<8x8xf32>
    %187 = arith.mulf %182, %186 : vector<8x8xf32>
    %188 = arith.truncf %187 : vector<8x8xf32> to vector<8x8xbf16>
    %189 = arith.truncf %172 : vector<8x8xf32> to vector<8x8xbf16>
    %cst_114 = arith.constant dense<0.000000e+00> : vector<8x8xf32>
    %190 = tpu.matmul %188, %189, %cst_114 {dimension_numbers = #tpu.dot_dimension_numbers<[1], [0], [0], [1], [0, 0, 1, 1], [], []>} : vector<8x8xbf16>, vector<8x8xbf16>, vector<8x8xf32> -> vector<8x8xf32>
    %191 = arith.truncf %190 : vector<8x8xf32> to vector<8x8xbf16>
    %c3_115 = arith.constant 3 : index
    %c0_116 = arith.constant 0 : index
    %c0_117 = arith.constant 0 : index
    %192 = vector.load %arg8[%c3_115, %c0_116, %c0_117] : memref<4x8x32xf32, #tpu.memory_space<vmem>>, vector<1x8x32xf32>
    %193 = vector.shape_cast %192 : vector<1x8x32xf32> to vector<8x32xf32>
    %194 = arith.truncf %193 : vector<8x32xf32> to vector<8x32xbf16>
    %cst_118 = arith.constant dense<0.000000e+00> : vector<8x32xf32>
    %195 = tpu.matmul %191, %194, %cst_118 {dimension_numbers = #tpu.dot_dimension_numbers<[1], [0], [0], [1], [0, 0, 1, 1], [], []>} : vector<8x8xbf16>, vector<8x32xbf16>, vector<8x32xf32> -> vector<8x32xf32>
    %196 = arith.addf %148, %195 : vector<8x32xf32>
    %c0_119 = arith.constant 0 : index
    %c0_120 = arith.constant 0 : index
    %197 = vector.load %arg9[%c0_119, %c0_120] : memref<1x32xf32, #tpu.memory_space<vmem>>, vector<1x32xf32>
    %198 = vector.broadcast %197 : vector<1x32xf32> to vector<8x32xf32>
    %199 = arith.addf %196, %198 : vector<8x32xf32>
    %200 = arith.addf %199, %1 : vector<8x32xf32>
    %c0_121 = arith.constant 0 : index
    %c0_122 = arith.constant 0 : index
    %201 = vector.load %arg10[%c0_121, %c0_122] : memref<1x32xf32, #tpu.memory_space<vmem>>, vector<1x32xf32>
    %c0_123 = arith.constant 0 : index
    %c0_124 = arith.constant 0 : index
    %202 = vector.load %arg11[%c0_123, %c0_124] : memref<1x32xf32, #tpu.memory_space<vmem>>, vector<1x32xf32>
    %cst_125 = arith.constant dense<0.000000e+00> : vector<8xf32>
    %203 = vector.multi_reduction <add>, %200, %cst_125 [1] : vector<8x32xf32> to vector<8xf32>
    %204 = vector.shape_cast %203 : vector<8xf32> to vector<8x1xf32>
    %cst_126 = arith.constant 3.200000e+01 : f32
    %205 = vector.broadcast %cst_126 : f32 to vector<8x1xf32>
    %206 = arith.divf %204, %205 : vector<8x1xf32>
    %207 = vector.broadcast %206 : vector<8x1xf32> to vector<8x32xf32>
    %208 = arith.subf %200, %207 : vector<8x32xf32>
    %209 = arith.mulf %208, %208 : vector<8x32xf32>
    %cst_127 = arith.constant dense<0.000000e+00> : vector<8xf32>
    %210 = vector.multi_reduction <add>, %209, %cst_127 [1] : vector<8x32xf32> to vector<8xf32>
    %211 = vector.shape_cast %210 : vector<8xf32> to vector<8x1xf32>
    %cst_128 = arith.constant 3.200000e+01 : f32
    %212 = vector.broadcast %cst_128 : f32 to vector<8x1xf32>
    %213 = arith.divf %211, %212 : vector<8x1xf32>
    %214 = vector.broadcast %206 : vector<8x1xf32> to vector<8x32xf32>
    %215 = arith.subf %200, %214 : vector<8x32xf32>
    %cst_129 = arith.constant 9.99999997E-7 : f32
    %216 = vector.broadcast %cst_129 : f32 to vector<8x1xf32>
    %217 = arith.addf %213, %216 : vector<8x1xf32>
    %218 = math.rsqrt %217 : vector<8x1xf32>
    %219 = vector.broadcast %218 : vector<8x1xf32> to vector<8x32xf32>
    %220 = arith.mulf %215, %219 : vector<8x32xf32>
    %221 = vector.broadcast %201 : vector<1x32xf32> to vector<8x32xf32>
    %222 = arith.mulf %220, %221 : vector<8x32xf32>
    %223 = vector.broadcast %202 : vector<1x32xf32> to vector<8x32xf32>
    %224 = arith.addf %222, %223 : vector<8x32xf32>
    %c0_130 = arith.constant 0 : index
    %c0_131 = arith.constant 0 : index
    %c0_132 = arith.constant 0 : index
    %225 = vector.load %arg12[%c0_130, %c0_131, %c0_132] : memref<1x8x32xf32, #tpu.memory_space<vmem>>, vector<1x8x32xf32>
    %226 = vector.shape_cast %225 : vector<1x8x32xf32> to vector<8x32xf32>
    %227 = vector.shape_cast %224 : vector<8x32xf32> to vector<1x8x32xf32>
    tpu.vector_store %arg12[%c0_130, %c0_131, %c0_132], %227 {strides = array<i32>} : memref<1x8x32xf32, #tpu.memory_space<vmem>>, vector<1x8x32xf32>,
    return
  }
  func.func @transform_0(%arg0: i32) -> (i32, i32, i32) {
    %c0_i32 = arith.constant 0 : i32
    %c0_i32_0 = arith.constant 0 : i32
    %c0_i32_1 = arith.constant 0 : i32
    return %arg0, %c0_i32, %c0_i32_0 : i32, i32, i32
  }
  func.func @transform_1(%arg0: i32) -> (i32, i32, i32) {
    %c0_i32 = arith.constant 0 : i32
    %c0_i32_0 = arith.constant 0 : i32
    %c0_i32_1 = arith.constant 0 : i32
    %c0_i32_2 = arith.constant 0 : i32
    return %c0_i32, %c0_i32_0, %c0_i32_1 : i32, i32, i32
  }
  func.func @transform_2(%arg0: i32) -> (i32, i32, i32) {
    %c0_i32 = arith.constant 0 : i32
    %c0_i32_0 = arith.constant 0 : i32
    %c0_i32_1 = arith.constant 0 : i32
    %c0_i32_2 = arith.constant 0 : i32
    return %c0_i32, %c0_i32_0, %c0_i32_1 : i32, i32, i32
  }
  func.func @transform_3(%arg0: i32) -> (i32, i32, i32) {
    %c0_i32 = arith.constant 0 : i32
    %c0_i32_0 = arith.constant 0 : i32
    %c0_i32_1 = arith.constant 0 : i32
    %c0_i32_2 = arith.constant 0 : i32
    return %c0_i32, %c0_i32_0, %c0_i32_1 : i32, i32, i32
  }
  func.func @transform_4(%arg0: i32) -> (i32, i32, i32) {
    %c0_i32 = arith.constant 0 : i32
    %c0_i32_0 = arith.constant 0 : i32
    %c0_i32_1 = arith.constant 0 : i32
    %c0_i32_2 = arith.constant 0 : i32
    return %c0_i32, %c0_i32_0, %c0_i32_1 : i32, i32, i32
  }
  func.func @transform_5(%arg0: i32) -> (i32, i32, i32) {
    %c0_i32 = arith.constant 0 : i32
    %c0_i32_0 = arith.constant 0 : i32
    %c0_i32_1 = arith.constant 0 : i32
    %c0_i32_2 = arith.constant 0 : i32
    return %c0_i32, %c0_i32_0, %c0_i32_1 : i32, i32, i32
  }
  func.func @transform_6(%arg0: i32) -> (i32, i32, i32) {
    %c0_i32 = arith.constant 0 : i32
    %c0_i32_0 = arith.constant 0 : i32
    %c0_i32_1 = arith.constant 0 : i32
    %c0_i32_2 = arith.constant 0 : i32
    return %c0_i32, %c0_i32_0, %c0_i32_1 : i32, i32, i32
  }
  func.func @transform_7(%arg0: i32) -> (i32, i32, i32) {
    %c0_i32 = arith.constant 0 : i32
    %c0_i32_0 = arith.constant 0 : i32
    %c0_i32_1 = arith.constant 0 : i32
    %c0_i32_2 = arith.constant 0 : i32
    return %c0_i32, %c0_i32_0, %c0_i32_1 : i32, i32, i32
  }
  func.func @transform_8(%arg0: i32) -> (i32, i32) {
    %c0_i32 = arith.constant 0 : i32
    %c0_i32_0 = arith.constant 0 : i32
    %c0_i32_1 = arith.constant 0 : i32
    return %c0_i32, %c0_i32_0 : i32, i32
  }
  func.func @transform_9(%arg0: i32) -> (i32, i32) {
    %c0_i32 = arith.constant 0 : i32
    %c0_i32_0 = arith.constant 0 : i32
    %c0_i32_1 = arith.constant 0 : i32
    return %c0_i32, %c0_i32_0 : i32, i32
  }
  func.func @transform_10(%arg0: i32) -> (i32, i32) {
    %c0_i32 = arith.constant 0 : i32
    %c0_i32_0 = arith.constant 0 : i32
    %c0_i32_1 = arith.constant 0 : i32
    return %c0_i32, %c0_i32_0 : i32, i32
  }
  func.func @transform_11(%arg0: i32) -> (i32, i32, i32) {
    %c0_i32 = arith.constant 0 : i32
    %c0_i32_0 = arith.constant 0 : i32
    %c0_i32_1 = arith.constant 0 : i32
    return %arg0, %c0_i32, %c0_i32_0 : i32, i32, i32
  }
}

module attributes {stable_mosaic.version = 11 : i64} {
  func.func @_linear_kernel(%arg0: i32, %arg1: i32, %arg2: i32, %arg3: memref<8x32xf32, #tpu.memory_space<vmem>>, %arg4: memref<32x128xf32, #tpu.memory_space<vmem>>, %arg5: memref<8x128xf32, #tpu.memory_space<vmem>>, %arg6: memref<8x128xf32, #tpu.memory_space<vmem>>) attributes {dimension_semantics = [#tpu.dimension_semantics<parallel>, #tpu.dimension_semantics<parallel>, #tpu.dimension_semantics<arbitrary>], iteration_bounds = array<i64: 2, 1, 1>, scalar_prefetch = 0 : i64, scratch_operands = 1 : i64, tpu.core_type = #tpu.core_type<tc>, window_params = [{transform_indices = @transform_0, window_bounds = array<i64: 8, 32>}, {transform_indices = @transform_1, window_bounds = array<i64: 32, 128>}, {transform_indices = @transform_2, window_bounds = array<i64: 8, 128>}]} {
    %c0_i32 = arith.constant 0 : i32
    %0 = arith.cmpi eq, %arg2, %c0_i32 : i32
    %1 = arith.extui %0 : i1 to i32
    %c0_i32_0 = arith.constant 0 : i32
    %2 = arith.cmpi ne, %1, %c0_i32_0 : i32
    scf.if %2 {
      %cst_10 = arith.constant 0.000000e+00 : f32
      %14 = vector.broadcast %cst_10 : f32 to vector<8x128xf32>
      %c0_11 = arith.constant 0 : index
      %c0_12 = arith.constant 0 : index
      %15 = vector.load %arg6[%c0_11, %c0_12] : memref<8x128xf32, #tpu.memory_space<vmem>>, vector<8x128xf32>
      tpu.vector_store %arg6[%c0_11, %c0_12], %14 {strides = array<i32>} : memref<8x128xf32, #tpu.memory_space<vmem>>, vector<8x128xf32>,
    } else {
    }
    %c0 = arith.constant 0 : index
    %c0_1 = arith.constant 0 : index
    %3 = vector.load %arg6[%c0, %c0_1] : memref<8x128xf32, #tpu.memory_space<vmem>>, vector<8x128xf32>
    %c0_2 = arith.constant 0 : index
    %c0_3 = arith.constant 0 : index
    %4 = vector.load %arg3[%c0_2, %c0_3] : memref<8x32xf32, #tpu.memory_space<vmem>>, vector<8x32xf32>
    %5 = arith.truncf %4 : vector<8x32xf32> to vector<8x32xbf16>
    %c0_4 = arith.constant 0 : index
    %c0_5 = arith.constant 0 : index
    %6 = vector.load %arg4[%c0_4, %c0_5] : memref<32x128xf32, #tpu.memory_space<vmem>>, vector<32x128xf32>
    %7 = arith.truncf %6 : vector<32x128xf32> to vector<32x128xbf16>
    %cst = arith.constant dense<0.000000e+00> : vector<8x128xf32>
    %8 = tpu.matmul %5, %7, %cst {dimension_numbers = #tpu.dot_dimension_numbers<[1], [0], [0], [1], [0, 0, 1, 1], [], []>} : vector<8x32xbf16>, vector<32x128xbf16>, vector<8x128xf32> -> vector<8x128xf32>
    %9 = arith.addf %3, %8 : vector<8x128xf32>
    %c0_6 = arith.constant 0 : index
    %c0_7 = arith.constant 0 : index
    %10 = vector.load %arg6[%c0_6, %c0_7] : memref<8x128xf32, #tpu.memory_space<vmem>>, vector<8x128xf32>
    tpu.vector_store %arg6[%c0_6, %c0_7], %9 {strides = array<i32>} : memref<8x128xf32, #tpu.memory_space<vmem>>, vector<8x128xf32>,
    %c0_i32_8 = arith.constant 0 : i32
    %11 = arith.cmpi eq, %arg2, %c0_i32_8 : i32
    %12 = arith.extui %11 : i1 to i32
    %c0_i32_9 = arith.constant 0 : i32
    %13 = arith.cmpi ne, %12, %c0_i32_9 : i32
    scf.if %13 {
      %c0_10 = arith.constant 0 : index
      %c0_11 = arith.constant 0 : index
      %14 = vector.load %arg6[%c0_10, %c0_11] : memref<8x128xf32, #tpu.memory_space<vmem>>, vector<8x128xf32>
      %c0_12 = arith.constant 0 : index
      %c0_13 = arith.constant 0 : index
      %15 = vector.load %arg5[%c0_12, %c0_13] : memref<8x128xf32, #tpu.memory_space<vmem>>, vector<8x128xf32>
      tpu.vector_store %arg5[%c0_12, %c0_13], %14 {strides = array<i32>} : memref<8x128xf32, #tpu.memory_space<vmem>>, vector<8x128xf32>,
    } else {
    }
    return
  }
  func.func @transform_0(%arg0: i32, %arg1: i32, %arg2: i32) -> (i32, i32) {
    %c0_i32 = arith.constant 0 : i32
    return %arg0, %arg2 : i32, i32
  }
  func.func @transform_1(%arg0: i32, %arg1: i32, %arg2: i32) -> (i32, i32) {
    %c0_i32 = arith.constant 0 : i32
    return %arg2, %arg1 : i32, i32
  }
  func.func @transform_2(%arg0: i32, %arg1: i32, %arg2: i32) -> (i32, i32) {
    %c0_i32 = arith.constant 0 : i32
    return %arg0, %arg1 : i32, i32
  }
}

module attributes {stable_mosaic.version = 11 : i64} {
  func.func @_cross_attn_sublayer_kernel(%arg0: i32, %arg1: memref<1x8x32xf32, #tpu.memory_space<vmem>>, %arg2: memref<1x8x32xf32, #tpu.memory_space<vmem>>, %arg3: memref<4x32x8xf32, #tpu.memory_space<vmem>>, %arg4: memref<4x32x8xf32, #tpu.memory_space<vmem>>, %arg5: memref<4x32x8xf32, #tpu.memory_space<vmem>>, %arg6: memref<4x1x8xf32, #tpu.memory_space<vmem>>, %arg7: memref<4x1x8xf32, #tpu.memory_space<vmem>>, %arg8: memref<4x1x8xf32, #tpu.memory_space<vmem>>, %arg9: memref<4x8x32xf32, #tpu.memory_space<vmem>>, %arg10: memref<1x32xf32, #tpu.memory_space<vmem>>, %arg11: memref<1x32xf32, #tpu.memory_space<vmem>>, %arg12: memref<1x32xf32, #tpu.memory_space<vmem>>, %arg13: memref<1x1x8xf32, #tpu.memory_space<vmem>>, %arg14: memref<1x8x32xf32, #tpu.memory_space<vmem>>) attributes {dimension_semantics = [#tpu.dimension_semantics<parallel>], iteration_bounds = array<i64: 2>, scalar_prefetch = 0 : i64, scratch_operands = 0 : i64, tpu.core_type = #tpu.core_type<tc>, window_params = [{transform_indices = @transform_0, window_bounds = array<i64: 1, 8, 32>}, {transform_indices = @transform_1, window_bounds = array<i64: 1, 8, 32>}, {pipeline_mode = #tpu.pipeline_mode<synchronous>, transform_indices = @transform_2, window_bounds = array<i64: 4, 32, 8>}, {pipeline_mode = #tpu.pipeline_mode<synchronous>, transform_indices = @transform_3, window_bounds = array<i64: 4, 32, 8>}, {pipeline_mode = #tpu.pipeline_mode<synchronous>, transform_indices = @transform_4, window_bounds = array<i64: 4, 32, 8>}, {pipeline_mode = #tpu.pipeline_mode<synchronous>, transform_indices = @transform_5, window_bounds = array<i64: 4, 1, 8>}, {pipeline_mode = #tpu.pipeline_mode<synchronous>, transform_indices = @transform_6, window_bounds = array<i64: 4, 1, 8>}, {pipeline_mode = #tpu.pipeline_mode<synchronous>, transform_indices = @transform_7, window_bounds = array<i64: 4, 1, 8>}, {pipeline_mode = #tpu.pipeline_mode<synchronous>, transform_indices = @transform_8, window_bounds = array<i64: 4, 8, 32>}, {pipeline_mode = #tpu.pipeline_mode<synchronous>, transform_indices = @transform_9, window_bounds = array<i64: 1, 32>}, {pipeline_mode = #tpu.pipeline_mode<synchronous>, transform_indices = @transform_10, window_bounds = array<i64: 1, 32>}, {pipeline_mode = #tpu.pipeline_mode<synchronous>, transform_indices = @transform_11, window_bounds = array<i64: 1, 32>}, {transform_indices = @transform_12, window_bounds = array<i64: 1, 1, 8>}, {transform_indices = @transform_13, window_bounds = array<i64: 1, 8, 32>}]} {
    %c0 = arith.constant 0 : index
    %c0_0 = arith.constant 0 : index
    %c0_1 = arith.constant 0 : index
    %0 = vector.load %arg13[%c0, %c0_0, %c0_1] : memref<1x1x8xf32, #tpu.memory_space<vmem>>, vector<1x1x8xf32>
    %1 = vector.shape_cast %0 : vector<1x1x8xf32> to vector<1x8xf32>
    %c0_2 = arith.constant 0 : index
    %c0_3 = arith.constant 0 : index
    %c0_4 = arith.constant 0 : index
    %2 = vector.load %arg1[%c0_2, %c0_3, %c0_4] : memref<1x8x32xf32, #tpu.memory_space<vmem>>, vector<1x8x32xf32>
    %3 = vector.shape_cast %2 : vector<1x8x32xf32> to vector<8x32xf32>
    %c0_5 = arith.constant 0 : index
    %c0_6 = arith.constant 0 : index
    %c0_7 = arith.constant 0 : index
    %4 = vector.load %arg2[%c0_5, %c0_6, %c0_7] : memref<1x8x32xf32, #tpu.memory_space<vmem>>, vector<1x8x32xf32>
    %5 = vector.shape_cast %4 : vector<1x8x32xf32> to vector<8x32xf32>
    %6 = arith.truncf %3 : vector<8x32xf32> to vector<8x32xbf16>
    %7 = arith.truncf %5 : vector<8x32xf32> to vector<8x32xbf16>
    %cst = arith.constant 0.000000e+00 : f32
    %8 = vector.broadcast %cst : f32 to vector<8x32xf32>
    %c0_8 = arith.constant 0 : index
    %c0_9 = arith.constant 0 : index
    %c0_10 = arith.constant 0 : index
    %9 = vector.load %arg3[%c0_8, %c0_9, %c0_10] : memref<4x32x8xf32, #tpu.memory_space<vmem>>, vector<1x32x8xf32>
    %10 = vector.shape_cast %9 : vector<1x32x8xf32> to vector<32x8xf32>
    %11 = arith.truncf %10 : vector<32x8xf32> to vector<32x8xbf16>
    %cst_11 = arith.constant dense<0.000000e+00> : vector<8x8xf32>
    %12 = tpu.matmul %6, %11, %cst_11 {dimension_numbers = #tpu.dot_dimension_numbers<[1], [0], [0], [1], [0, 0, 1, 1], [], []>} : vector<8x32xbf16>, vector<32x8xbf16>, vector<8x8xf32> -> vector<8x8xf32>
    %c0_12 = arith.constant 0 : index
    %c0_13 = arith.constant 0 : index
    %c0_14 = arith.constant 0 : index
    %13 = vector.load %arg6[%c0_12, %c0_13, %c0_14] : memref<4x1x8xf32, #tpu.memory_space<vmem>>, vector<1x1x8xf32>
    %14 = vector.shape_cast %13 : vector<1x1x8xf32> to vector<1x8xf32>
    %15 = vector.broadcast %14 : vector<1x8xf32> to vector<8x8xf32>
    %16 = arith.addf %12, %15 : vector<8x8xf32>
    %c0_15 = arith.constant 0 : index
    %c0_16 = arith.constant 0 : index
    %c0_17 = arith.constant 0 : index
    %17 = vector.load %arg4[%c0_15, %c0_16, %c0_17] : memref<4x32x8xf32, #tpu.memory_space<vmem>>, vector<1x32x8xf32>
    %18 = vector.shape_cast %17 : vector<1x32x8xf32> to vector<32x8xf32>
    %19 = arith.truncf %18 : vector<32x8xf32> to vector<32x8xbf16>
    %cst_18 = arith.constant dense<0.000000e+00> : vector<8x8xf32>
    %20 = tpu.matmul %7, %19, %cst_18 {dimension_numbers = #tpu.dot_dimension_numbers<[1], [0], [0], [1], [0, 0, 1, 1], [], []>} : vector<8x32xbf16>, vector<32x8xbf16>, vector<8x8xf32> -> vector<8x8xf32>
    %c0_19 = arith.constant 0 : index
    %c0_20 = arith.constant 0 : index
    %c0_21 = arith.constant 0 : index
    %21 = vector.load %arg7[%c0_19, %c0_20, %c0_21] : memref<4x1x8xf32, #tpu.memory_space<vmem>>, vector<1x1x8xf32>
    %22 = vector.shape_cast %21 : vector<1x1x8xf32> to vector<1x8xf32>
    %23 = vector.broadcast %22 : vector<1x8xf32> to vector<8x8xf32>
    %24 = arith.addf %20, %23 : vector<8x8xf32>
    %c0_22 = arith.constant 0 : index
    %c0_23 = arith.constant 0 : index
    %c0_24 = arith.constant 0 : index
    %25 = vector.load %arg5[%c0_22, %c0_23, %c0_24] : memref<4x32x8xf32, #tpu.memory_space<vmem>>, vector<1x32x8xf32>
    %26 = vector.shape_cast %25 : vector<1x32x8xf32> to vector<32x8xf32>
    %27 = arith.truncf %26 : vector<32x8xf32> to vector<32x8xbf16>
    %cst_25 = arith.constant dense<0.000000e+00> : vector<8x8xf32>
    %28 = tpu.matmul %7, %27, %cst_25 {dimension_numbers = #tpu.dot_dimension_numbers<[1], [0], [0], [1], [0, 0, 1, 1], [], []>} : vector<8x32xbf16>, vector<32x8xbf16>, vector<8x8xf32> -> vector<8x8xf32>
    %c0_26 = arith.constant 0 : index
    %c0_27 = arith.constant 0 : index
    %c0_28 = arith.constant 0 : index
    %29 = vector.load %arg8[%c0_26, %c0_27, %c0_28] : memref<4x1x8xf32, #tpu.memory_space<vmem>>, vector<1x1x8xf32>
    %30 = vector.shape_cast %29 : vector<1x1x8xf32> to vector<1x8xf32>
    %31 = vector.broadcast %30 : vector<1x8xf32> to vector<8x8xf32>
    %32 = arith.addf %28, %31 : vector<8x8xf32>
    %33 = arith.truncf %16 : vector<8x8xf32> to vector<8x8xbf16>
    %34 = arith.truncf %24 : vector<8x8xf32> to vector<8x8xbf16>
    %cst_29 = arith.constant dense<0.000000e+00> : vector<8x8xf32>
    %35 = tpu.matmul %33, %34, %cst_29 {dimension_numbers = #tpu.dot_dimension_numbers<[1], [1], [0], [0], [0, 0, 1, 0], [], []>} : vector<8x8xbf16>, vector<8x8xbf16>, vector<8x8xf32> -> vector<8x8xf32>
    %cst_30 = arith.constant 0.353553385 : f32
    %36 = vector.broadcast %cst_30 : f32 to vector<8x8xf32>
    %37 = arith.mulf %35, %36 : vector<8x8xf32>
    %38 = vector.broadcast %1 : vector<1x8xf32> to vector<8x8xf32>
    %39 = arith.addf %37, %38 : vector<8x8xf32>
    %cst_31 = arith.constant dense<0xFF800000> : vector<8xf32>
    %40 = vector.multi_reduction <maximumf>, %39, %cst_31 [1] : vector<8x8xf32> to vector<8xf32>
    %41 = vector.shape_cast %40 : vector<8xf32> to vector<8x1xf32>
    %42 = vector.broadcast %41 : vector<8x1xf32> to vector<8x8xf32>
    %43 = arith.subf %39, %42 : vector<8x8xf32>
    %44 = math.exp %43 : vector<8x8xf32>
    %cst_32 = arith.constant dense<0.000000e+00> : vector<8xf32>
    %45 = vector.multi_reduction <add>, %44, %cst_32 [1] : vector<8x8xf32> to vector<8xf32>
    %46 = vector.shape_cast %45 : vector<8xf32> to vector<8x1xf32>
    %47 = tpu.reciprocal %46 {approx = true} : vector<8x1xf32> -> vector<8x1xf32>
    %48 = vector.broadcast %47 : vector<8x1xf32> to vector<8x8xf32>
    %49 = arith.mulf %44, %48 : vector<8x8xf32>
    %50 = arith.truncf %49 : vector<8x8xf32> to vector<8x8xbf16>
    %51 = arith.truncf %32 : vector<8x8xf32> to vector<8x8xbf16>
    %cst_33 = arith.constant dense<0.000000e+00> : vector<8x8xf32>
    %52 = tpu.matmul %50, %51, %cst_33 {dimension_numbers = #tpu.dot_dimension_numbers<[1], [0], [0], [1], [0, 0, 1, 1], [], []>} : vector<8x8xbf16>, vector<8x8xbf16>, vector<8x8xf32> -> vector<8x8xf32>
    %53 = arith.truncf %52 : vector<8x8xf32> to vector<8x8xbf16>
    %c0_34 = arith.constant 0 : index
    %c0_35 = arith.constant 0 : index
    %c0_36 = arith.constant 0 : index
    %54 = vector.load %arg9[%c0_34, %c0_35, %c0_36] : memref<4x8x32xf32, #tpu.memory_space<vmem>>, vector<1x8x32xf32>
    %55 = vector.shape_cast %54 : vector<1x8x32xf32> to vector<8x32xf32>
    %56 = arith.truncf %55 : vector<8x32xf32> to vector<8x32xbf16>
    %cst_37 = arith.constant dense<0.000000e+00> : vector<8x32xf32>
    %57 = tpu.matmul %53, %56, %cst_37 {dimension_numbers = #tpu.dot_dimension_numbers<[1], [0], [0], [1], [0, 0, 1, 1], [], []>} : vector<8x8xbf16>, vector<8x32xbf16>, vector<8x32xf32> -> vector<8x32xf32>
    %58 = arith.addf %8, %57 : vector<8x32xf32>
    %c1 = arith.constant 1 : index
    %c0_38 = arith.constant 0 : index
    %c0_39 = arith.constant 0 : index
    %59 = vector.load %arg3[%c1, %c0_38, %c0_39] : memref<4x32x8xf32, #tpu.memory_space<vmem>>, vector<1x32x8xf32>
    %60 = vector.shape_cast %59 : vector<1x32x8xf32> to vector<32x8xf32>
    %61 = arith.truncf %60 : vector<32x8xf32> to vector<32x8xbf16>
    %cst_40 = arith.constant dense<0.000000e+00> : vector<8x8xf32>
    %62 = tpu.matmul %6, %61, %cst_40 {dimension_numbers = #tpu.dot_dimension_numbers<[1], [0], [0], [1], [0, 0, 1, 1], [], []>} : vector<8x32xbf16>, vector<32x8xbf16>, vector<8x8xf32> -> vector<8x8xf32>
    %c1_41 = arith.constant 1 : index
    %c0_42 = arith.constant 0 : index
    %c0_43 = arith.constant 0 : index
    %63 = vector.load %arg6[%c1_41, %c0_42, %c0_43] : memref<4x1x8xf32, #tpu.memory_space<vmem>>, vector<1x1x8xf32>
    %64 = vector.shape_cast %63 : vector<1x1x8xf32> to vector<1x8xf32>
    %65 = vector.broadcast %64 : vector<1x8xf32> to vector<8x8xf32>
    %66 = arith.addf %62, %65 : vector<8x8xf32>
    %c1_44 = arith.constant 1 : index
    %c0_45 = arith.constant 0 : index
    %c0_46 = arith.constant 0 : index
    %67 = vector.load %arg4[%c1_44, %c0_45, %c0_46] : memref<4x32x8xf32, #tpu.memory_space<vmem>>, vector<1x32x8xf32>
    %68 = vector.shape_cast %67 : vector<1x32x8xf32> to vector<32x8xf32>
    %69 = arith.truncf %68 : vector<32x8xf32> to vector<32x8xbf16>
    %cst_47 = arith.constant dense<0.000000e+00> : vector<8x8xf32>
    %70 = tpu.matmul %7, %69, %cst_47 {dimension_numbers = #tpu.dot_dimension_numbers<[1], [0], [0], [1], [0, 0, 1, 1], [], []>} : vector<8x32xbf16>, vector<32x8xbf16>, vector<8x8xf32> -> vector<8x8xf32>
    %c1_48 = arith.constant 1 : index
    %c0_49 = arith.constant 0 : index
    %c0_50 = arith.constant 0 : index
    %71 = vector.load %arg7[%c1_48, %c0_49, %c0_50] : memref<4x1x8xf32, #tpu.memory_space<vmem>>, vector<1x1x8xf32>
    %72 = vector.shape_cast %71 : vector<1x1x8xf32> to vector<1x8xf32>
    %73 = vector.broadcast %72 : vector<1x8xf32> to vector<8x8xf32>
    %74 = arith.addf %70, %73 : vector<8x8xf32>
    %c1_51 = arith.constant 1 : index
    %c0_52 = arith.constant 0 : index
    %c0_53 = arith.constant 0 : index
    %75 = vector.load %arg5[%c1_51, %c0_52, %c0_53] : memref<4x32x8xf32, #tpu.memory_space<vmem>>, vector<1x32x8xf32>
    %76 = vector.shape_cast %75 : vector<1x32x8xf32> to vector<32x8xf32>
    %77 = arith.truncf %76 : vector<32x8xf32> to vector<32x8xbf16>
    %cst_54 = arith.constant dense<0.000000e+00> : vector<8x8xf32>
    %78 = tpu.matmul %7, %77, %cst_54 {dimension_numbers = #tpu.dot_dimension_numbers<[1], [0], [0], [1], [0, 0, 1, 1], [], []>} : vector<8x32xbf16>, vector<32x8xbf16>, vector<8x8xf32> -> vector<8x8xf32>
    %c1_55 = arith.constant 1 : index
    %c0_56 = arith.constant 0 : index
    %c0_57 = arith.constant 0 : index
    %79 = vector.load %arg8[%c1_55, %c0_56, %c0_57] : memref<4x1x8xf32, #tpu.memory_space<vmem>>, vector<1x1x8xf32>
    %80 = vector.shape_cast %79 : vector<1x1x8xf32> to vector<1x8xf32>
    %81 = vector.broadcast %80 : vector<1x8xf32> to vector<8x8xf32>
    %82 = arith.addf %78, %81 : vector<8x8xf32>
    %83 = arith.truncf %66 : vector<8x8xf32> to vector<8x8xbf16>
    %84 = arith.truncf %74 : vector<8x8xf32> to vector<8x8xbf16>
    %cst_58 = arith.constant dense<0.000000e+00> : vector<8x8xf32>
    %85 = tpu.matmul %83, %84, %cst_58 {dimension_numbers = #tpu.dot_dimension_numbers<[1], [1], [0], [0], [0, 0, 1, 0], [], []>} : vector<8x8xbf16>, vector<8x8xbf16>, vector<8x8xf32> -> vector<8x8xf32>
    %cst_59 = arith.constant 0.353553385 : f32
    %86 = vector.broadcast %cst_59 : f32 to vector<8x8xf32>
    %87 = arith.mulf %85, %86 : vector<8x8xf32>
    %88 = vector.broadcast %1 : vector<1x8xf32> to vector<8x8xf32>
    %89 = arith.addf %87, %88 : vector<8x8xf32>
    %cst_60 = arith.constant dense<0xFF800000> : vector<8xf32>
    %90 = vector.multi_reduction <maximumf>, %89, %cst_60 [1] : vector<8x8xf32> to vector<8xf32>
    %91 = vector.shape_cast %90 : vector<8xf32> to vector<8x1xf32>
    %92 = vector.broadcast %91 : vector<8x1xf32> to vector<8x8xf32>
    %93 = arith.subf %89, %92 : vector<8x8xf32>
    %94 = math.exp %93 : vector<8x8xf32>
    %cst_61 = arith.constant dense<0.000000e+00> : vector<8xf32>
    %95 = vector.multi_reduction <add>, %94, %cst_61 [1] : vector<8x8xf32> to vector<8xf32>
    %96 = vector.shape_cast %95 : vector<8xf32> to vector<8x1xf32>
    %97 = tpu.reciprocal %96 {approx = true} : vector<8x1xf32> -> vector<8x1xf32>
    %98 = vector.broadcast %97 : vector<8x1xf32> to vector<8x8xf32>
    %99 = arith.mulf %94, %98 : vector<8x8xf32>
    %100 = arith.truncf %99 : vector<8x8xf32> to vector<8x8xbf16>
    %101 = arith.truncf %82 : vector<8x8xf32> to vector<8x8xbf16>
    %cst_62 = arith.constant dense<0.000000e+00> : vector<8x8xf32>
    %102 = tpu.matmul %100, %101, %cst_62 {dimension_numbers = #tpu.dot_dimension_numbers<[1], [0], [0], [1], [0, 0, 1, 1], [], []>} : vector<8x8xbf16>, vector<8x8xbf16>, vector<8x8xf32> -> vector<8x8xf32>
    %103 = arith.truncf %102 : vector<8x8xf32> to vector<8x8xbf16>
    %c1_63 = arith.constant 1 : index
    %c0_64 = arith.constant 0 : index
    %c0_65 = arith.constant 0 : index
    %104 = vector.load %arg9[%c1_63, %c0_64, %c0_65] : memref<4x8x32xf32, #tpu.memory_space<vmem>>, vector<1x8x32xf32>
    %105 = vector.shape_cast %104 : vector<1x8x32xf32> to vector<8x32xf32>
    %106 = arith.truncf %105 : vector<8x32xf32> to vector<8x32xbf16>
    %cst_66 = arith.constant dense<0.000000e+00> : vector<8x32xf32>
    %107 = tpu.matmul %103, %106, %cst_66 {dimension_numbers = #tpu.dot_dimension_numbers<[1], [0], [0], [1], [0, 0, 1, 1], [], []>} : vector<8x8xbf16>, vector<8x32xbf16>, vector<8x32xf32> -> vector<8x32xf32>
    %108 = arith.addf %58, %107 : vector<8x32xf32>
    %c2 = arith.constant 2 : index
    %c0_67 = arith.constant 0 : index
    %c0_68 = arith.constant 0 : index
    %109 = vector.load %arg3[%c2, %c0_67, %c0_68] : memref<4x32x8xf32, #tpu.memory_space<vmem>>, vector<1x32x8xf32>
    %110 = vector.shape_cast %109 : vector<1x32x8xf32> to vector<32x8xf32>
    %111 = arith.truncf %110 : vector<32x8xf32> to vector<32x8xbf16>
    %cst_69 = arith.constant dense<0.000000e+00> : vector<8x8xf32>
    %112 = tpu.matmul %6, %111, %cst_69 {dimension_numbers = #tpu.dot_dimension_numbers<[1], [0], [0], [1], [0, 0, 1, 1], [], []>} : vector<8x32xbf16>, vector<32x8xbf16>, vector<8x8xf32> -> vector<8x8xf32>
    %c2_70 = arith.constant 2 : index
    %c0_71 = arith.constant 0 : index
    %c0_72 = arith.constant 0 : index
    %113 = vector.load %arg6[%c2_70, %c0_71, %c0_72] : memref<4x1x8xf32, #tpu.memory_space<vmem>>, vector<1x1x8xf32>
    %114 = vector.shape_cast %113 : vector<1x1x8xf32> to vector<1x8xf32>
    %115 = vector.broadcast %114 : vector<1x8xf32> to vector<8x8xf32>
    %116 = arith.addf %112, %115 : vector<8x8xf32>
    %c2_73 = arith.constant 2 : index
    %c0_74 = arith.constant 0 : index
    %c0_75 = arith.constant 0 : index
    %117 = vector.load %arg4[%c2_73, %c0_74, %c0_75] : memref<4x32x8xf32, #tpu.memory_space<vmem>>, vector<1x32x8xf32>
    %118 = vector.shape_cast %117 : vector<1x32x8xf32> to vector<32x8xf32>
    %119 = arith.truncf %118 : vector<32x8xf32> to vector<32x8xbf16>
    %cst_76 = arith.constant dense<0.000000e+00> : vector<8x8xf32>
    %120 = tpu.matmul %7, %119, %cst_76 {dimension_numbers = #tpu.dot_dimension_numbers<[1], [0], [0], [1], [0, 0, 1, 1], [], []>} : vector<8x32xbf16>, vector<32x8xbf16>, vector<8x8xf32> -> vector<8x8xf32>
    %c2_77 = arith.constant 2 : index
    %c0_78 = arith.constant 0 : index
    %c0_79 = arith.constant 0 : index
    %121 = vector.load %arg7[%c2_77, %c0_78, %c0_79] : memref<4x1x8xf32, #tpu.memory_space<vmem>>, vector<1x1x8xf32>
    %122 = vector.shape_cast %121 : vector<1x1x8xf32> to vector<1x8xf32>
    %123 = vector.broadcast %122 : vector<1x8xf32> to vector<8x8xf32>
    %124 = arith.addf %120, %123 : vector<8x8xf32>
    %c2_80 = arith.constant 2 : index
    %c0_81 = arith.constant 0 : index
    %c0_82 = arith.constant 0 : index
    %125 = vector.load %arg5[%c2_80, %c0_81, %c0_82] : memref<4x32x8xf32, #tpu.memory_space<vmem>>, vector<1x32x8xf32>
    %126 = vector.shape_cast %125 : vector<1x32x8xf32> to vector<32x8xf32>
    %127 = arith.truncf %126 : vector<32x8xf32> to vector<32x8xbf16>
    %cst_83 = arith.constant dense<0.000000e+00> : vector<8x8xf32>
    %128 = tpu.matmul %7, %127, %cst_83 {dimension_numbers = #tpu.dot_dimension_numbers<[1], [0], [0], [1], [0, 0, 1, 1], [], []>} : vector<8x32xbf16>, vector<32x8xbf16>, vector<8x8xf32> -> vector<8x8xf32>
    %c2_84 = arith.constant 2 : index
    %c0_85 = arith.constant 0 : index
    %c0_86 = arith.constant 0 : index
    %129 = vector.load %arg8[%c2_84, %c0_85, %c0_86] : memref<4x1x8xf32, #tpu.memory_space<vmem>>, vector<1x1x8xf32>
    %130 = vector.shape_cast %129 : vector<1x1x8xf32> to vector<1x8xf32>
    %131 = vector.broadcast %130 : vector<1x8xf32> to vector<8x8xf32>
    %132 = arith.addf %128, %131 : vector<8x8xf32>
    %133 = arith.truncf %116 : vector<8x8xf32> to vector<8x8xbf16>
    %134 = arith.truncf %124 : vector<8x8xf32> to vector<8x8xbf16>
    %cst_87 = arith.constant dense<0.000000e+00> : vector<8x8xf32>
    %135 = tpu.matmul %133, %134, %cst_87 {dimension_numbers = #tpu.dot_dimension_numbers<[1], [1], [0], [0], [0, 0, 1, 0], [], []>} : vector<8x8xbf16>, vector<8x8xbf16>, vector<8x8xf32> -> vector<8x8xf32>
    %cst_88 = arith.constant 0.353553385 : f32
    %136 = vector.broadcast %cst_88 : f32 to vector<8x8xf32>
    %137 = arith.mulf %135, %136 : vector<8x8xf32>
    %138 = vector.broadcast %1 : vector<1x8xf32> to vector<8x8xf32>
    %139 = arith.addf %137, %138 : vector<8x8xf32>
    %cst_89 = arith.constant dense<0xFF800000> : vector<8xf32>
    %140 = vector.multi_reduction <maximumf>, %139, %cst_89 [1] : vector<8x8xf32> to vector<8xf32>
    %141 = vector.shape_cast %140 : vector<8xf32> to vector<8x1xf32>
    %142 = vector.broadcast %141 : vector<8x1xf32> to vector<8x8xf32>
    %143 = arith.subf %139, %142 : vector<8x8xf32>
    %144 = math.exp %143 : vector<8x8xf32>
    %cst_90 = arith.constant dense<0.000000e+00> : vector<8xf32>
    %145 = vector.multi_reduction <add>, %144, %cst_90 [1] : vector<8x8xf32> to vector<8xf32>
    %146 = vector.shape_cast %145 : vector<8xf32> to vector<8x1xf32>
    %147 = tpu.reciprocal %146 {approx = true} : vector<8x1xf32> -> vector<8x1xf32>
    %148 = vector.broadcast %147 : vector<8x1xf32> to vector<8x8xf32>
    %149 = arith.mulf %144, %148 : vector<8x8xf32>
    %150 = arith.truncf %149 : vector<8x8xf32> to vector<8x8xbf16>
    %151 = arith.truncf %132 : vector<8x8xf32> to vector<8x8xbf16>
    %cst_91 = arith.constant dense<0.000000e+00> : vector<8x8xf32>
    %152 = tpu.matmul %150, %151, %cst_91 {dimension_numbers = #tpu.dot_dimension_numbers<[1], [0], [0], [1], [0, 0, 1, 1], [], []>} : vector<8x8xbf16>, vector<8x8xbf16>, vector<8x8xf32> -> vector<8x8xf32>
    %153 = arith.truncf %152 : vector<8x8xf32> to vector<8x8xbf16>
    %c2_92 = arith.constant 2 : index
    %c0_93 = arith.constant 0 : index
    %c0_94 = arith.constant 0 : index
    %154 = vector.load %arg9[%c2_92, %c0_93, %c0_94] : memref<4x8x32xf32, #tpu.memory_space<vmem>>, vector<1x8x32xf32>
    %155 = vector.shape_cast %154 : vector<1x8x32xf32> to vector<8x32xf32>
    %156 = arith.truncf %155 : vector<8x32xf32> to vector<8x32xbf16>
    %cst_95 = arith.constant dense<0.000000e+00> : vector<8x32xf32>
    %157 = tpu.matmul %153, %156, %cst_95 {dimension_numbers = #tpu.dot_dimension_numbers<[1], [0], [0], [1], [0, 0, 1, 1], [], []>} : vector<8x8xbf16>, vector<8x32xbf16>, vector<8x32xf32> -> vector<8x32xf32>
    %158 = arith.addf %108, %157 : vector<8x32xf32>
    %c3 = arith.constant 3 : index
    %c0_96 = arith.constant 0 : index
    %c0_97 = arith.constant 0 : index
    %159 = vector.load %arg3[%c3, %c0_96, %c0_97] : memref<4x32x8xf32, #tpu.memory_space<vmem>>, vector<1x32x8xf32>
    %160 = vector.shape_cast %159 : vector<1x32x8xf32> to vector<32x8xf32>
    %161 = arith.truncf %160 : vector<32x8xf32> to vector<32x8xbf16>
    %cst_98 = arith.constant dense<0.000000e+00> : vector<8x8xf32>
    %162 = tpu.matmul %6, %161, %cst_98 {dimension_numbers = #tpu.dot_dimension_numbers<[1], [0], [0], [1], [0, 0, 1, 1], [], []>} : vector<8x32xbf16>, vector<32x8xbf16>, vector<8x8xf32> -> vector<8x8xf32>
    %c3_99 = arith.constant 3 : index
    %c0_100 = arith.constant 0 : index
    %c0_101 = arith.constant 0 : index
    %163 = vector.load %arg6[%c3_99, %c0_100, %c0_101] : memref<4x1x8xf32, #tpu.memory_space<vmem>>, vector<1x1x8xf32>
    %164 = vector.shape_cast %163 : vector<1x1x8xf32> to vector<1x8xf32>
    %165 = vector.broadcast %164 : vector<1x8xf32> to vector<8x8xf32>
    %166 = arith.addf %162, %165 : vector<8x8xf32>
    %c3_102 = arith.constant 3 : index
    %c0_103 = arith.constant 0 : index
    %c0_104 = arith.constant 0 : index
    %167 = vector.load %arg4[%c3_102, %c0_103, %c0_104] : memref<4x32x8xf32, #tpu.memory_space<vmem>>, vector<1x32x8xf32>
    %168 = vector.shape_cast %167 : vector<1x32x8xf32> to vector<32x8xf32>
    %169 = arith.truncf %168 : vector<32x8xf32> to vector<32x8xbf16>
    %cst_105 = arith.constant dense<0.000000e+00> : vector<8x8xf32>
    %170 = tpu.matmul %7, %169, %cst_105 {dimension_numbers = #tpu.dot_dimension_numbers<[1], [0], [0], [1], [0, 0, 1, 1], [], []>} : vector<8x32xbf16>, vector<32x8xbf16>, vector<8x8xf32> -> vector<8x8xf32>
    %c3_106 = arith.constant 3 : index
    %c0_107 = arith.constant 0 : index
    %c0_108 = arith.constant 0 : index
    %171 = vector.load %arg7[%c3_106, %c0_107, %c0_108] : memref<4x1x8xf32, #tpu.memory_space<vmem>>, vector<1x1x8xf32>
    %172 = vector.shape_cast %171 : vector<1x1x8xf32> to vector<1x8xf32>
    %173 = vector.broadcast %172 : vector<1x8xf32> to vector<8x8xf32>
    %174 = arith.addf %170, %173 : vector<8x8xf32>
    %c3_109 = arith.constant 3 : index
    %c0_110 = arith.constant 0 : index
    %c0_111 = arith.constant 0 : index
    %175 = vector.load %arg5[%c3_109, %c0_110, %c0_111] : memref<4x32x8xf32, #tpu.memory_space<vmem>>, vector<1x32x8xf32>
    %176 = vector.shape_cast %175 : vector<1x32x8xf32> to vector<32x8xf32>
    %177 = arith.truncf %176 : vector<32x8xf32> to vector<32x8xbf16>
    %cst_112 = arith.constant dense<0.000000e+00> : vector<8x8xf32>
    %178 = tpu.matmul %7, %177, %cst_112 {dimension_numbers = #tpu.dot_dimension_numbers<[1], [0], [0], [1], [0, 0, 1, 1], [], []>} : vector<8x32xbf16>, vector<32x8xbf16>, vector<8x8xf32> -> vector<8x8xf32>
    %c3_113 = arith.constant 3 : index
    %c0_114 = arith.constant 0 : index
    %c0_115 = arith.constant 0 : index
    %179 = vector.load %arg8[%c3_113, %c0_114, %c0_115] : memref<4x1x8xf32, #tpu.memory_space<vmem>>, vector<1x1x8xf32>
    %180 = vector.shape_cast %179 : vector<1x1x8xf32> to vector<1x8xf32>
    %181 = vector.broadcast %180 : vector<1x8xf32> to vector<8x8xf32>
    %182 = arith.addf %178, %181 : vector<8x8xf32>
    %183 = arith.truncf %166 : vector<8x8xf32> to vector<8x8xbf16>
    %184 = arith.truncf %174 : vector<8x8xf32> to vector<8x8xbf16>
    %cst_116 = arith.constant dense<0.000000e+00> : vector<8x8xf32>
    %185 = tpu.matmul %183, %184, %cst_116 {dimension_numbers = #tpu.dot_dimension_numbers<[1], [1], [0], [0], [0, 0, 1, 0], [], []>} : vector<8x8xbf16>, vector<8x8xbf16>, vector<8x8xf32> -> vector<8x8xf32>
    %cst_117 = arith.constant 0.353553385 : f32
    %186 = vector.broadcast %cst_117 : f32 to vector<8x8xf32>
    %187 = arith.mulf %185, %186 : vector<8x8xf32>
    %188 = vector.broadcast %1 : vector<1x8xf32> to vector<8x8xf32>
    %189 = arith.addf %187, %188 : vector<8x8xf32>
    %cst_118 = arith.constant dense<0xFF800000> : vector<8xf32>
    %190 = vector.multi_reduction <maximumf>, %189, %cst_118 [1] : vector<8x8xf32> to vector<8xf32>
    %191 = vector.shape_cast %190 : vector<8xf32> to vector<8x1xf32>
    %192 = vector.broadcast %191 : vector<8x1xf32> to vector<8x8xf32>
    %193 = arith.subf %189, %192 : vector<8x8xf32>
    %194 = math.exp %193 : vector<8x8xf32>
    %cst_119 = arith.constant dense<0.000000e+00> : vector<8xf32>
    %195 = vector.multi_reduction <add>, %194, %cst_119 [1] : vector<8x8xf32> to vector<8xf32>
    %196 = vector.shape_cast %195 : vector<8xf32> to vector<8x1xf32>
    %197 = tpu.reciprocal %196 {approx = true} : vector<8x1xf32> -> vector<8x1xf32>
    %198 = vector.broadcast %197 : vector<8x1xf32> to vector<8x8xf32>
    %199 = arith.mulf %194, %198 : vector<8x8xf32>
    %200 = arith.truncf %199 : vector<8x8xf32> to vector<8x8xbf16>
    %201 = arith.truncf %182 : vector<8x8xf32> to vector<8x8xbf16>
    %cst_120 = arith.constant dense<0.000000e+00> : vector<8x8xf32>
    %202 = tpu.matmul %200, %201, %cst_120 {dimension_numbers = #tpu.dot_dimension_numbers<[1], [0], [0], [1], [0, 0, 1, 1], [], []>} : vector<8x8xbf16>, vector<8x8xbf16>, vector<8x8xf32> -> vector<8x8xf32>
    %203 = arith.truncf %202 : vector<8x8xf32> to vector<8x8xbf16>
    %c3_121 = arith.constant 3 : index
    %c0_122 = arith.constant 0 : index
    %c0_123 = arith.constant 0 : index
    %204 = vector.load %arg9[%c3_121, %c0_122, %c0_123] : memref<4x8x32xf32, #tpu.memory_space<vmem>>, vector<1x8x32xf32>
    %205 = vector.shape_cast %204 : vector<1x8x32xf32> to vector<8x32xf32>
    %206 = arith.truncf %205 : vector<8x32xf32> to vector<8x32xbf16>
    %cst_124 = arith.constant dense<0.000000e+00> : vector<8x32xf32>
    %207 = tpu.matmul %203, %206, %cst_124 {dimension_numbers = #tpu.dot_dimension_numbers<[1], [0], [0], [1], [0, 0, 1, 1], [], []>} : vector<8x8xbf16>, vector<8x32xbf16>, vector<8x32xf32> -> vector<8x32xf32>
    %208 = arith.addf %158, %207 : vector<8x32xf32>
    %c0_125 = arith.constant 0 : index
    %c0_126 = arith.constant 0 : index
    %209 = vector.load %arg10[%c0_125, %c0_126] : memref<1x32xf32, #tpu.memory_space<vmem>>, vector<1x32xf32>
    %210 = vector.broadcast %209 : vector<1x32xf32> to vector<8x32xf32>
    %211 = arith.addf %208, %210 : vector<8x32xf32>
    %212 = arith.addf %211, %3 : vector<8x32xf32>
    %c0_127 = arith.constant 0 : index
    %c0_128 = arith.constant 0 : index
    %213 = vector.load %arg11[%c0_127, %c0_128] : memref<1x32xf32, #tpu.memory_space<vmem>>, vector<1x32xf32>
    %c0_129 = arith.constant 0 : index
    %c0_130 = arith.constant 0 : index
    %214 = vector.load %arg12[%c0_129, %c0_130] : memref<1x32xf32, #tpu.memory_space<vmem>>, vector<1x32xf32>
    %cst_131 = arith.constant dense<0.000000e+00> : vector<8xf32>
    %215 = vector.multi_reduction <add>, %212, %cst_131 [1] : vector<8x32xf32> to vector<8xf32>
    %216 = vector.shape_cast %215 : vector<8xf32> to vector<8x1xf32>
    %cst_132 = arith.constant 3.200000e+01 : f32
    %217 = vector.broadcast %cst_132 : f32 to vector<8x1xf32>
    %218 = arith.divf %216, %217 : vector<8x1xf32>
    %219 = vector.broadcast %218 : vector<8x1xf32> to vector<8x32xf32>
    %220 = arith.subf %212, %219 : vector<8x32xf32>
    %221 = arith.mulf %220, %220 : vector<8x32xf32>
    %cst_133 = arith.constant dense<0.000000e+00> : vector<8xf32>
    %222 = vector.multi_reduction <add>, %221, %cst_133 [1] : vector<8x32xf32> to vector<8xf32>
    %223 = vector.shape_cast %222 : vector<8xf32> to vector<8x1xf32>
    %cst_134 = arith.constant 3.200000e+01 : f32
    %224 = vector.broadcast %cst_134 : f32 to vector<8x1xf32>
    %225 = arith.divf %223, %224 : vector<8x1xf32>
    %226 = vector.broadcast %218 : vector<8x1xf32> to vector<8x32xf32>
    %227 = arith.subf %212, %226 : vector<8x32xf32>
    %cst_135 = arith.constant 9.99999997E-7 : f32
    %228 = vector.broadcast %cst_135 : f32 to vector<8x1xf32>
    %229 = arith.addf %225, %228 : vector<8x1xf32>
    %230 = math.rsqrt %229 : vector<8x1xf32>
    %231 = vector.broadcast %230 : vector<8x1xf32> to vector<8x32xf32>
    %232 = arith.mulf %227, %231 : vector<8x32xf32>
    %233 = vector.broadcast %213 : vector<1x32xf32> to vector<8x32xf32>
    %234 = arith.mulf %232, %233 : vector<8x32xf32>
    %235 = vector.broadcast %214 : vector<1x32xf32> to vector<8x32xf32>
    %236 = arith.addf %234, %235 : vector<8x32xf32>
    %c0_136 = arith.constant 0 : index
    %c0_137 = arith.constant 0 : index
    %c0_138 = arith.constant 0 : index
    %237 = vector.load %arg14[%c0_136, %c0_137, %c0_138] : memref<1x8x32xf32, #tpu.memory_space<vmem>>, vector<1x8x32xf32>
    %238 = vector.shape_cast %237 : vector<1x8x32xf32> to vector<8x32xf32>
    %239 = vector.shape_cast %236 : vector<8x32xf32> to vector<1x8x32xf32>
    tpu.vector_store %arg14[%c0_136, %c0_137, %c0_138], %239 {strides = array<i32>} : memref<1x8x32xf32, #tpu.memory_space<vmem>>, vector<1x8x32xf32>,
    return
  }
  func.func @transform_0(%arg0: i32) -> (i32, i32, i32) {
    %c0_i32 = arith.constant 0 : i32
    %c0_i32_0 = arith.constant 0 : i32
    %c0_i32_1 = arith.constant 0 : i32
    return %arg0, %c0_i32, %c0_i32_0 : i32, i32, i32
  }
  func.func @transform_1(%arg0: i32) -> (i32, i32, i32) {
    %c0_i32 = arith.constant 0 : i32
    %c0_i32_0 = arith.constant 0 : i32
    %c0_i32_1 = arith.constant 0 : i32
    return %arg0, %c0_i32, %c0_i32_0 : i32, i32, i32
  }
  func.func @transform_2(%arg0: i32) -> (i32, i32, i32) {
    %c0_i32 = arith.constant 0 : i32
    %c0_i32_0 = arith.constant 0 : i32
    %c0_i32_1 = arith.constant 0 : i32
    %c0_i32_2 = arith.constant 0 : i32
    return %c0_i32, %c0_i32_0, %c0_i32_1 : i32, i32, i32
  }
  func.func @transform_3(%arg0: i32) -> (i32, i32, i32) {
    %c0_i32 = arith.constant 0 : i32
    %c0_i32_0 = arith.constant 0 : i32
    %c0_i32_1 = arith.constant 0 : i32
    %c0_i32_2 = arith.constant 0 : i32
    return %c0_i32, %c0_i32_0, %c0_i32_1 : i32, i32, i32
  }
  func.func @transform_4(%arg0: i32) -> (i32, i32, i32) {
    %c0_i32 = arith.constant 0 : i32
    %c0_i32_0 = arith.constant 0 : i32
    %c0_i32_1 = arith.constant 0 : i32
    %c0_i32_2 = arith.constant 0 : i32
    return %c0_i32, %c0_i32_0, %c0_i32_1 : i32, i32, i32
  }
  func.func @transform_5(%arg0: i32) -> (i32, i32, i32) {
    %c0_i32 = arith.constant 0 : i32
    %c0_i32_0 = arith.constant 0 : i32
    %c0_i32_1 = arith.constant 0 : i32
    %c0_i32_2 = arith.constant 0 : i32
    return %c0_i32, %c0_i32_0, %c0_i32_1 : i32, i32, i32
  }
  func.func @transform_6(%arg0: i32) -> (i32, i32, i32) {
    %c0_i32 = arith.constant 0 : i32
    %c0_i32_0 = arith.constant 0 : i32
    %c0_i32_1 = arith.constant 0 : i32
    %c0_i32_2 = arith.constant 0 : i32
    return %c0_i32, %c0_i32_0, %c0_i32_1 : i32, i32, i32
  }
  func.func @transform_7(%arg0: i32) -> (i32, i32, i32) {
    %c0_i32 = arith.constant 0 : i32
    %c0_i32_0 = arith.constant 0 : i32
    %c0_i32_1 = arith.constant 0 : i32
    %c0_i32_2 = arith.constant 0 : i32
    return %c0_i32, %c0_i32_0, %c0_i32_1 : i32, i32, i32
  }
  func.func @transform_8(%arg0: i32) -> (i32, i32, i32) {
    %c0_i32 = arith.constant 0 : i32
    %c0_i32_0 = arith.constant 0 : i32
    %c0_i32_1 = arith.constant 0 : i32
    %c0_i32_2 = arith.constant 0 : i32
    return %c0_i32, %c0_i32_0, %c0_i32_1 : i32, i32, i32
  }
  func.func @transform_9(%arg0: i32) -> (i32, i32) {
    %c0_i32 = arith.constant 0 : i32
    %c0_i32_0 = arith.constant 0 : i32
    %c0_i32_1 = arith.constant 0 : i32
    return %c0_i32, %c0_i32_0 : i32, i32
  }
  func.func @transform_10(%arg0: i32) -> (i32, i32) {
    %c0_i32 = arith.constant 0 : i32
    %c0_i32_0 = arith.constant 0 : i32
    %c0_i32_1 = arith.constant 0 : i32
    return %c0_i32, %c0_i32_0 : i32, i32
  }
  func.func @transform_11(%arg0: i32) -> (i32, i32) {
    %c0_i32 = arith.constant 0 : i32
    %c0_i32_0 = arith.constant 0 : i32
    %c0_i32_1 = arith.constant 0 : i32
    return %c0_i32, %c0_i32_0 : i32, i32
  }
  func.func @transform_12(%arg0: i32) -> (i32, i32, i32) {
    %c0_i32 = arith.constant 0 : i32
    %c0_i32_0 = arith.constant 0 : i32
    %c0_i32_1 = arith.constant 0 : i32
    return %arg0, %c0_i32, %c0_i32_0 : i32, i32, i32
  }
  func.func @transform_13(%arg0: i32) -> (i32, i32, i32) {
    %c0_i32 = arith.constant 0 : i32
    %c0_i32_0 = arith.constant 0 : i32
    %c0_i32_1 = arith.constant 0 : i32
    return %arg0, %c0_i32, %c0_i32_0 : i32, i32, i32
  }
}

</mosaic_0001>

<bundles_post_ra>
// kernel: transformer_forward.18
= control target key start
LH: loop header
LB: loop body
LE: loop exit
PB: predicated region body
PF: predicated region fallthrough
CT: control target
= control target key end

     0   :  { %s453_s15 = smov 0   ;;  %s455_s16 = smov 0   ;;  %s498_s0 = inlined_call_operand.vmem [shape: f32[2,8,32], index: 0, kind: input, shape index: {}]   ;;  %s499_s1 = inlined_call_operand.vmem [shape: f32[8,32], index: 1, kind: input, shape index: {}]   ;;  %s500_s2 = inlined_call_operand.vmem [shape: f32[1,32], index: 2, kind: input, shape index: {}]   ;;  %s501_s3 = inlined_call_operand.vmem [shape: f32[1,32], index: 3, kind: input, shape index: {}]   ;;  %s502_s4 = inlined_call_operand.vmem [shape: f32[2,8,32], index: 4, kind: output, shape index: {}]  }
   0x1   :  { %s457_s17 = smov 0  }
   0x2 LB: > { %s26_s18 = sadd.s32 1, %s422_s16  ;;  %p371_p0 = scmp.ge.s32.totalorder %s426_s17, 1  ;;  %s426_s17 = sphi %s457_s17, %s14_s17   ;;  %s422_s16 = sphi %s455_s16, %s504_s16   ;;  %s418_s15 = sphi %s453_s15, %s503_s15  }
   0x3   : > { %p28_p1 = scmp.ge.s32.totalorder %s26_s18, 2  ;;  %p189_p2 = scmp.lt.s32.totalorder %s426_s17, 3 }
   0x5   : > { %s506_s18 = smov (%p28_p1, %s26_s18), 0  ;;  %p190_p3 = pnand %p371_p0, %p189_p2 }
   0x6   : > { %p223_p4 = scmp.lt.s32.totalorder (!%p190_p3), %s418_s15, 1  ;;  %v242_v0 = vld [vmem:[%s499_s1] sm:$0xff] (!%p190_p3)  ;;  %vm246_vm0 = vcmask (!%p190_p3), 261120  }
   0x7   : > { %193 = sbr.rel (%p190_p3) target bundleno = 334 (0x14e), region = 36  ;;  %v374_v13 = vld [vmem:[%s500_s2] ss:$0 sm:$0xff] (!%p190_p3) }
   0x8   : > { %v375_v15 = vld [vmem:[%s501_s3] ss:$0 sm:$0xff] (!%p190_p3) }
   0xe   : > { %s508_s15 = smov (!%p223_p4, %s418_s15), 1 }
   0xf   : > { %s372_s19 = sshll.u32 %s508_s15, 3 }
  0x10   : > { %s229_s24 = scalar_lea.vmem %s498_s0, %s372_s19  ;;  %s240_s5 = scalar_lea.vmem %s502_s4, %s372_s19 }
  0x11   : > { %v241_v1 = vld [vmem:[%s229_s24] sm:$0xff] }
  0x12   : > { %v243_v2 = vadd.f32 %v242_v0, %v241_v1 }
  0x14   : > { %v247_v3 = vsel %vm246_vm0, %v243_v2, 0.0 }
  0x15   : > { %248 = vadd.xlane.f32.xlu0 %v247_v3 }
  0xa2   : > { %v249_v4 = vpop.xlane.xlu0 %248 }
  0xa3   : > { %v251_v5 = vmul.f32 0.03125, %v249_v4 }
  0xa5   : > { %v252_v6 = vsub.f32 %v243_v2, %v251_v5 }
  0xa7   : > { %v253_v7 = vmul.f32 %v252_v6, %v252_v6 }
  0xa9   : > { %v254_v8 = vsel %vm246_vm0, %v253_v7, 0.0 }
  0xaa   : > { %255 = vadd.xlane.f32.xlu0 %v254_v8 }
 0x137   : > { %v256_v9 = vpop.xlane.xlu0 %255 }
 0x138   : > { %v257_v10 = vmul.f32 0.03125, %v256_v9 }
 0x13a   : > { %v258_v11 = vadd.f32 1e-06, %v257_v10 }
 0x13c   : > { %402 = vrsqrt.f32 %v258_v11 }
 0x146   : > { %v403_v12 = vpop.eup %402 }
 0x147   : > { %v260_v14 = vmul.f32 %v403_v12, %v252_v6 }
 0x149   : > { %v267_v16 = vmul.f32 %v374_v13, %v260_v14 }
 0x14b   : > { %v274_v17 = vadd.f32 %v375_v15, %v267_v16 }
 0x14d   : > { %275 = vst.msk [vmem:[%s240_s5] sm:$0xff] %vm246_vm0, %v274_v17 }
 0x14e PF: > { %s14_s17 = sadd.s32 1, %s426_s17   ;;  %s503_s15 = smov %s422_s16 }
 0x14f   : > { %p11_p5 = scmp.ge.s32.totalorder %s14_s17, 4   ;;  %s504_s16 = smov %s506_s18 }
 0x151   :  { %13 = sbr.rel (!%p11_p5) target bundleno = 2 (0x2), region = 69 }

// kernel: transformer_forward.15
= control target key start
LH: loop header
LB: loop body
LE: loop exit
PB: predicated region body
PF: predicated region fallthrough
CT: control target
= control target key end

     0   :  { %s589_s24 = smov 0   ;;  %s665_s0 = inlined_call_operand.vmem [shape: f32[16,32], index: 0, kind: input, shape index: {}]   ;;  %s666_s1 = inlined_call_operand.vmem [shape: f32[32,64], index: 1, kind: input, shape index: {}]   ;;  %s667_s2 = inlined_call_operand.vmem [shape: f32[1,64], index: 2, kind: input, shape index: {}]   ;;  %s668_s3 = inlined_call_operand.vmem [shape: f32[64,32], index: 3, kind: input, shape index: {}]   ;;  %s669_s4 = inlined_call_operand.vmem [shape: f32[1,32], index: 4, kind: input, shape index: {}]   ;;  %s670_s5 = inlined_call_operand.vmem [shape: f32[1,32], index: 5, kind: input, shape index: {}]   ;;  %s671_s6 = inlined_call_operand.vmem [shape: f32[1,32], index: 6, kind: input, shape index: {}]   ;;  %s672_s7 = inlined_call_operand.vmem [shape: f32[16,32], index: 7, kind: output, shape index: {}]  }
   0x1 LB: > { %s484_s25 = sadd.s32 4294967295, %s545_s24   ;;  %p488_p0 = scmp.ge.s32.totalorder %s545_s24, 1  ;;  %s545_s24 = sphi %s589_s24, %s17_s24  }
   0x2   : > { %p236_p1 = scmp.lt.s32.totalorder %s545_s24, 3 }
   0x4   : > { %p237_p2 = pnand %p488_p0, %p236_p1 }
   0x5   : > { %v277_v0 = vld [vmem:[%s666_s1] sm:$0xff] (!%p237_p2)  ;;  %v278_v1 = vld [vmem:[%s666_s1 + $0x8] sm:$0xff] (!%p237_p2)  ;;  %v279_v2 = vld [vmem:[%s666_s1 + $0x10] sm:$0xff] (!%p237_p2)  ;;  %p266_p3 = scmp.lt.s32.totalorder (!%p237_p2), %s484_s25, 1  ;;  %v547_v3 = vmov (!%p237_p2), 0.0   ;;  %vm548_vm0 = vmmov (!%p237_p2), 0  }
   0x6   : > { %240 = sbr.rel (%p237_p2) target bundleno = 767 (0x2ff), region = 48  ;;  %507 = vmatprep.subr.bf16.mxu0 (!%p237_p2), %v547_v3  ;;  %v281_v4 = vpack.c.bf16 (!%p237_p2), %v278_v1, %v277_v0  ;;  %v280_v5 = vld [vmem:[%s666_s1 + $0x18] sm:$0xff] (!%p237_p2)  ;;  %511 = vmatprep.mubr.msk.bf16.mxu0 (!%p237_p2), %vm548_vm0, %v547_v3  ;;  %v336_v6 = vld [vmem:[%s668_s3] sm:$0xff] (!%p237_p2)  ;;  %v337_v7 = vld [vmem:[%s668_s3 + $0x8] sm:$0xff] (!%p237_p2)  ;;  %vm290_vm1 = vcmask (!%p237_p2), 261120   ;;  %vm355_vm2 = vcmask (!%p237_p2), 523264  }
   0x7   : > { %515 = vmatprep.subr.bf16.mxu1 (!%p237_p2), %v547_v3  ;;  %v344_v8 = vpack.c.bf16 (!%p237_p2), %v337_v7, %v336_v6  ;;  %v338_v9 = vld [vmem:[%s668_s3 + $0x10] sm:$0xff] (!%p237_p2)  ;;  %v339_v10 = vld [vmem:[%s668_s3 + $0x18] sm:$0xff] (!%p237_p2)  ;;  %523 = vmatprep.mubr.msk.bf16.mxu1 (!%p237_p2), %vm548_vm0, %v547_v3  ;;  %v282_v11 = vpack.c.bf16 (!%p237_p2), %v280_v5, %v279_v2  ;;  %v340_v15 = vld [vmem:[%s668_s3 + $0x20] sm:$0xff] (!%p237_p2) }
   0x8   : > { %508 = vmatpush3.bf16.msra.mxu0 (!%p237_p2), %v281_v4  ;;  %v345_v12 = vpack.c.bf16 (!%p237_p2), %v339_v10, %v338_v9  ;;  %v341_v16 = vld [vmem:[%s668_s3 + $0x28] sm:$0xff] (!%p237_p2)  ;;  %v342_v18 = vld [vmem:[%s668_s3 + $0x30] sm:$0xff] (!%p237_p2)  ;;  %v343_v19 = vld [vmem:[%s668_s3 + $0x38] sm:$0xff] (!%p237_p2) }
   0x9   : > { %509 = vmatprep.subr.bf16.mxu0 (!%p237_p2), %v547_v3  ;;  %516 = vmatpush3.bf16.msra.mxu1 (!%p237_p2), %v344_v8  ;;  %v346_v17 = vpack.c.bf16 (!%p237_p2), %v341_v16, %v340_v15  ;;  %v347_v20 = vpack.c.bf16 (!%p237_p2), %v343_v19, %v342_v18  ;;  %v491_v21 = vld [vmem:[%s667_s2] ss:$0 sm:$0xff] (!%p237_p2) }
   0xa   : > { %517 = vmatprep.subr.bf16.mxu1 (!%p237_p2), %v547_v3  ;;  %v493_v29 = vld [vmem:[%s669_s4] ss:$0 sm:$0xff] (!%p237_p2) }
   0xb   : > { %v495_v46 = vld [vmem:[%s670_s5] ss:$0 sm:$0xff] (!%p237_p2) }
   0xc   : > { %510 = vmatpush3.bf16.msra.mxu0 (!%p237_p2), %v282_v11  ;;  %v496_v48 = vld [vmem:[%s671_s6] ss:$0 sm:$0xff] (!%p237_p2) }
   0xd   : > { %s674_s25 = smov (!%p266_p3, %s484_s25), 1  ;;  %518 = vmatpush3.bf16.msra.mxu1 %v345_v12 }
   0xe   : > { %s489_s19 = sshll.u32 %s674_s25, 3  ;;  %519 = vmatprep.subr.bf16.mxu1 %v547_v3 }
   0xf   : > { %s269_s22 = scalar_lea.vmem %s665_s0, %s489_s19  ;;  %s273_s21 = scalar_lea.vmem %s672_s7, %s489_s19 }
  0x10   : > { %v275_v13 = vld [vmem:[%s269_s22] sm:$0xff] }
  0x11   : > { %v276_v14 = vpack.c.bf16 %v275_v13, %v275_v13  ;;  %520 = vmatpush3.bf16.msra.mxu1 %v346_v17 }
  0x12   : > { %521 = vmatprep.subr.bf16.mxu1 %v547_v3 }
  0x13   : > { %512 = vmatmul.mubr.msk.bf16.vlgmr.msra.gmra.mrb[0].mxu0 %vm290_vm1, %v276_v14 }
  0x15   : > { %522 = vmatpush3.bf16.msra.mxu1 %v347_v20 }
  0xe6   : > { %v328_v22 = vpop.f32.mrb[0].mxu0 }
  0xe7   : > { %v329_v23 = vadd.f32 %v491_v21, %v328_v22  ;;  %v513_v24 = vpop.f32.mrb[1].mxu0 }
  0xe8   : > { %v331_v25 = vpop.f32.mrb[2].mxu0 }
  0xe9   : > { %v334_v26 = vmax.f32 %v329_v23, 0.0  ;;  %v514_v27 = vpop.f32.mrb[3].mxu0 }
  0xeb   : > { %v335_v28 = vpack.c.bf16 %v334_v26, %v334_v26 }
  0xed   : > { %524 = vmatmul.mubr.msk.bf16.vlgmr.msra.gmra.mrb[0].mxu1 %vm355_vm2, %v335_v28 }
 0x1c0   : > { %v393_v30 = vpop.f32.mrb[0].mxu1 }
 0x1c1   : > { %v394_v31 = vadd.f32 %v493_v29, %v393_v30  ;;  %v525_v32 = vpop.f32.mrb[1].mxu1 }
 0x1c2   : > { %v396_v33 = vpop.f32.mrb[2].mxu1 }
 0x1c3   : > { %v526_v34 = vpop.f32.mrb[3].mxu1  ;;  %v399_v35 = vadd.f32 %v394_v31, %v275_v13 }
 0x1c5   : > { %v402_v36 = vsel %vm290_vm1, %v399_v35, 0.0 }
 0x1c6   : > { %403 = vadd.xlane.f32.xlu0 %v402_v36 }
 0x253   : > { %v404_v37 = vpop.xlane.xlu0 %403 }
 0x254   : > { %v406_v38 = vmul.f32 0.03125, %v404_v37 }
 0x256   : > { %v407_v39 = vsub.f32 %v399_v35, %v406_v38 }
 0x258   : > { %v408_v40 = vmul.f32 %v407_v39, %v407_v39 }
 0x25a   : > { %v409_v41 = vsel %vm290_vm1, %v408_v40, 0.0 }
 0x25b   : > { %410 = vadd.xlane.f32.xlu0 %v409_v41 }
 0x2e8   : > { %v411_v42 = vpop.xlane.xlu0 %410 }
 0x2e9   : > { %v412_v43 = vmul.f32 0.03125, %v411_v42 }
 0x2eb   : > { %v413_v44 = vadd.f32 1e-06, %v412_v43 }
 0x2ed   : > { %537 = vrsqrt.f32 %v413_v44 }
 0x2f7   : > { %v538_v45 = vpop.eup %537 }
 0x2f8   : > { %v415_v47 = vmul.f32 %v538_v45, %v407_v39 }
 0x2fa   : > { %v422_v49 = vmul.f32 %v495_v46, %v415_v47 }
 0x2fc   : > { %v429_v50 = vadd.f32 %v496_v48, %v422_v49 }
 0x2fe   : > { %430 = vst.msk [vmem:[%s273_s21] sm:$0xff] %vm290_vm1, %v429_v50 }
 0x2ff PF: > { %s17_s24 = sadd.s32 1, %s545_s24  }
 0x300   : > { %p14_p4 = scmp.ge.s32.totalorder %s17_s24, 4  }
 0x302   :  { %16 = sbr.rel (!%p14_p4) target bundleno = 1 (0x1), region = 78 }

// kernel: transformer_forward.19
= control target key start
LH: loop header
LB: loop body
LE: loop exit
PB: predicated region body
PF: predicated region fallthrough
CT: control target
= control target key end

     0   :  { %s2269_s21 = smov 0   ;;  %s2682_s0 = inlined_call_operand.vmem [shape: f32[2,8,32], index: 0, kind: input, shape index: {}]   ;;  %s2683_s1 = inlined_call_operand.vmem [shape: f32[4,32,8], index: 1, kind: input, shape index: {}]   ;;  %s2684_s2 = inlined_call_operand.vmem [shape: f32[4,32,8], index: 2, kind: input, shape index: {}]   ;;  %s2685_s3 = inlined_call_operand.vmem [shape: f32[4,32,8], index: 3, kind: input, shape index: {}]   ;;  %s2686_s4 = inlined_call_operand.vmem [shape: f32[4,1,8], index: 4, kind: input, shape index: {}]   ;;  %s2687_s5 = inlined_call_operand.vmem [shape: f32[4,1,8], index: 5, kind: input, shape index: {}]   ;;  %s2688_s6 = inlined_call_operand.vmem [shape: f32[4,1,8], index: 6, kind: input, shape index: {}]   ;;  %s2689_s7 = inlined_call_operand.vmem [shape: f32[4,8,32], index: 7, kind: input, shape index: {}]   ;;  %s2690_s8 = inlined_call_operand.vmem [shape: f32[1,32], index: 8, kind: input, shape index: {}]   ;;  %s2691_s9 = inlined_call_operand.vmem [shape: f32[1,32], index: 9, kind: input, shape index: {}]   ;;  %s2692_s10 = inlined_call_operand.vmem [shape: f32[1,32], index: 10, kind: input, shape index: {}]   ;;  %s2693_s11 = inlined_call_operand.vmem [shape: f32[2,1,8], index: 11, kind: input, shape index: {}]   ;;  %s2694_s12 = inlined_call_operand.vmem [shape: f32[2,8,32], index: 12, kind: output, shape index: {}]  }
   0x1 LB: > { %s1841_s22 = sadd.s32 4294967295, %s2200_s21   ;;  %p1845_p0 = scmp.ge.s32.totalorder %s2200_s21, 1  ;;  %s2200_s21 = sphi %s2269_s21, %s22_s21  }
   0x2   : > { %p369_p1 = scmp.lt.s32.totalorder %s2200_s21, 3 }
   0x4   : > { %p370_p2 = pnand %p1845_p0, %p369_p1 }
   0x5   : > { %v489_v0 = vld [vmem:[%s2684_s2] sm:$0xff] (!%p370_p2)  ;;  %v490_v1 = vld [vmem:[%s2684_s2 + $0x8] sm:$0xff] (!%p370_p2)  ;;  %v491_v2 = vld [vmem:[%s2684_s2 + $0x10] sm:$0xff] (!%p370_p2)  ;;  %p412_p3 = scmp.lt.s32.totalorder (!%p370_p2), %s1841_s22, 1  ;;  %v2202_v3 = vmov (!%p370_p2), 0.0   ;;  %vm2203_vm0 = vmmov (!%p370_p2), 0   ;;  %v427_v36 = vlaneseq (!%p370_p2) }
   0x6   : > { %373 = sbr.rel (%p370_p2) target bundleno = 4237 (0x108d), region = 68  ;;  %2006 = vmatprep.subr.bf16.mxu1 (!%p370_p2), %v2202_v3  ;;  %v493_v4 = vpack.c.bf16 (!%p370_p2), %v490_v1, %v489_v0  ;;  %1998 = vmatprep.subr.bf16.mxu0 (!%p370_p2), %v2202_v3  ;;  %v492_v5 = vld [vmem:[%s2684_s2 + $0x18] sm:$0xff] (!%p370_p2)  ;;  %v432_v6 = vld [vmem:[%s2683_s1] sm:$0xff] (!%p370_p2)  ;;  %v433_v7 = vld [vmem:[%s2683_s1 + $0x8] sm:$0xff] (!%p370_p2)  ;;  %vm445_vm1 = vcmask (!%p370_p2), 261120   ;;  %vm597_vm2 = vcmask (!%p370_p2), 64512  }
   0x7   : > { %v436_v8 = vpack.c.bf16 (!%p370_p2), %v433_v7, %v432_v6  ;;  %2010 = vmatprep.mubr.msk.bf16.mxu1 (!%p370_p2), %vm2203_vm0, %v2202_v3  ;;  %v434_v9 = vld [vmem:[%s2683_s1 + $0x10] sm:$0xff] (!%p370_p2)  ;;  %v435_v10 = vld [vmem:[%s2683_s1 + $0x18] sm:$0xff] (!%p370_p2)  ;;  %2002 = vmatprep.mubr.msk.bf16.mxu0 (!%p370_p2), %vm2203_vm0, %v2202_v3  ;;  %v494_v11 = vpack.c.bf16 (!%p370_p2), %v492_v5, %v491_v2  ;;  %v1850_v15 = vld [vmem:[%s2687_s5] ss:$0 sm:$0xff] (!%p370_p2)  ;;  %v2366_v37 = vshrl.u32 (!%p370_p2), %v427_v36, 7  ;;  %v2368_v38 = vand.u32 (!%p370_p2), 127, %v427_v36 }
   0x8   : > { %2007 = vmatpush3.bf16.msra.mxu1 (!%p370_p2), %v493_v4  ;;  %v437_v12 = vpack.c.bf16 (!%p370_p2), %v435_v10, %v434_v9  ;;  %v1848_v21 = vld [vmem:[%s2686_s4] ss:$0 sm:$0xff] (!%p370_p2)  ;;  %v543_v31 = vld [vmem:[%s2685_s3 + $0x8] sm:$0xff] (!%p370_p2)  ;;  %v544_v32 = vld [vmem:[%s2685_s3 + $0x10] sm:$0xff] (!%p370_p2)  ;;  %vm669_vm4 = vcmask (!%p370_p2), 1043456  }
   0x9   : > { %2008 = vmatprep.subr.bf16.mxu1 (!%p370_p2), %v2202_v3  ;;  %1999 = vmatpush3.bf16.msra.mxu0 (!%p370_p2), %v436_v8  ;;  %v542_v30 = vld [vmem:[%s2685_s3] sm:$0xff] (!%p370_p2)  ;;  %v545_v34 = vld [vmem:[%s2685_s3 + $0x18] sm:$0xff] (!%p370_p2)  ;;  %vm431_vm3 = vcmp.ge.s32.totalorder (!%p370_p2), %v2366_v37, %v2368_v38  ;;  %v1858_v62 = vld [vmem:[%s2683_s1 + $0x28] sm:$0xff] (!%p370_p2) }
   0xa   : > { %2000 = vmatprep.subr.bf16.mxu0 (!%p370_p2), %v2202_v3  ;;  %v546_v33 = vpack.c.bf16 (!%p370_p2), %v543_v31, %v542_v30  ;;  %v547_v35 = vpack.c.bf16 (!%p370_p2), %v545_v34, %v544_v32  ;;  %v1852_v56 = vld [vmem:[%s2688_s6] ss:$0 sm:$0xff] (!%p370_p2)  ;;  %v1859_v0 = vld [vmem:[%s2683_s1 + $0x30] sm:$0xff] (!%p370_p2)  ;;  %v1860_v1 = vld [vmem:[%s2683_s1 + $0x38] sm:$0xff] (!%p370_p2) }
   0xb   : > { %v1857_v61 = vld [vmem:[%s2683_s1 + $0x20] sm:$0xff] (!%p370_p2)  ;;  %v722_v2 = vpack.c.bf16 (!%p370_p2), %v1860_v1, %v1859_v0  ;;  %v1865_v6 = vld [vmem:[%s2684_s2 + $0x28] sm:$0xff] (!%p370_p2) }
   0xc   : > { %2009 = vmatpush3.bf16.msra.mxu1 (!%p370_p2), %v494_v11  ;;  %v721_v63 = vpack.c.bf16 (!%p370_p2), %v1858_v62, %v1857_v61  ;;  %v1864_v5 = vld [vmem:[%s2684_s2 + $0x20] sm:$0xff] (!%p370_p2)  ;;  %v1866_v11 = vld [vmem:[%s2684_s2 + $0x30] sm:$0xff] (!%p370_p2)  ;;  %v1872_v36 = vld [vmem:[%s2685_s3 + $0x28] sm:$0xff] (!%p370_p2) }
   0xd   : > { %s2696_s22 = smov (!%p412_p3, %s1841_s22), 1  ;;  %2001 = vmatpush3.bf16.msra.mxu0 %v437_v12  ;;  %2022 = vmatprep.subr.bf16.mxu1 %v2202_v3  ;;  %v776_v9 = vpack.c.bf16 %v1865_v6, %v1864_v5  ;;  %v1867_v12 = vld [vmem:[%s2684_s2 + $0x38] sm:$0xff]  ;;  %v1880_v1 = vld [vmem:[%s2689_s7 + $0x8] sm:$0xff]  ;;  %v714_v6 = vld [vmem:[%s2689_s7] sm:$0xff] }
   0xe   : > { %s1846_s23 = sshll.u32 %s2696_s22, 3  ;;  %2014 = vmatprep.subr.bf16.mxu0 %v2202_v3 }
   0xf   : > { %s415_s26 = scalar_lea.vmem %s2682_s0, %s1846_s23  ;;  %s422_s30 = scalar_lea.vmem %s2694_s12, %s1846_s23 }
  0x10   : > { %v2317_v13 = vld [vmem:[%s415_s26] sm:$0xff]  ;;  %s418_s26 = scalar_lea.vmem %s2693_s11, %s2696_s22 }
  0x11   : > { %v2321_v14 = vpack.c.bf16 %v2317_v13, %v2317_v13  ;;  %v2370_v39 = vld [vmem:[%s418_s26] ss:$0 sm:$0xff] }
  0x13   : > { %2011 = vmatmul.mubr.msk.bf16.vlgmr.msra.gmra.mrb[0].mxu1 %vm445_vm1, %v2321_v14  ;;  %2003 = vmatmul.mubr.msk.bf16.vlgmr.msra.gmra.mrb[0].mxu0 %vm445_vm1, %v2321_v14 }
  0x14   : > { %2024 = vmatprep.mubr.msk.bf16.mxu1 %vm2203_vm0, %v2202_v3  ;;  %2018 = vmatprep.mubr.msk.bf16.mxu0 %vm2203_vm0, %v2202_v3 }
  0x15   : > { %2015 = vmatpush3.bf16.msra.mxu0 %v546_v33 }
  0x16   : > { %2016 = vmatprep.subr.bf16.mxu0 %v2202_v3 }
  0x19   : > { %2017 = vmatpush3.bf16.msra.mxu0 %v547_v35  ;;  %v1871_v35 = vld [vmem:[%s2685_s3 + $0x20] sm:$0xff] }
  0x1a   : > { %2028 = vmatprep.subr.bf16.mxu0 %v2202_v3 }
  0x1c   : > { %2019 = vmatmul.mubr.msk.bf16.vlgmr.msra.gmra.mrb[4].mxu0 %vm445_vm1, %v2321_v14 }
  0x1d   : > { %2030 = vmatprep.mubr.msk.bf16.mxu0 %vm2203_vm0, %v2202_v3 }
  0xe6   : > { %v536_v16 = vpop.f32.mrb[0].mxu1  ;;  %v483_v19 = vpop.f32.mrb[0].mxu0 }
  0xe7   : > { %v537_v17 = vadd.f32 %v1850_v15, %v536_v16  ;;  %v2012_v18 = vpop.f32.mrb[1].mxu1  ;;  %v2004_v22 = vpop.f32.mrb[1].mxu0  ;;  %v484_v28 = vadd.f32 %v1848_v21, %v483_v19  ;;  %v777_v15 = vpack.c.bf16 %v1867_v12, %v1866_v11  ;;  %v1890_v12 = vld [vmem:[%s2684_s2 + $0x40] sm:$0xff] }
  0xe8   : > { %v539_v20 = vpop.f32.mrb[2].mxu1  ;;  %v486_v25 = vpop.f32.mrb[2].mxu0 }
  0xe9   : > { %v596_v23 = vpack.c.bf16 %v537_v17, %v537_v17  ;;  %v2013_v24 = vpop.f32.mrb[3].mxu1  ;;  %v2005_v26 = vpop.f32.mrb[3].mxu0  ;;  %v595_v29 = vpack.c.bf16 %v484_v28, %v484_v28 }
  0xea   : > { %v1869_v24 = vld [vmem:[%s2687_s5 + $0x1] ss:$0 sm:$0xff] }
  0xeb   : > { %v602_v27 = vsel %vm597_vm2, %v596_v23, 0 }
  0xec   : > { %2023 = vmatpush3.bf16.xpose.msra.mxu1 %v602_v27 }
  0xed   : > { %2034 = vmatprep.subr.bf16.mxu1 %v2202_v3 }
  0xef   : > { %v589_v53 = vpop.f32.mrb[4].mxu0 }
  0xf0   : > { %v2020_v54 = vpop.f32.mrb[5].mxu0  ;;  %v590_v58 = vadd.f32 %v1852_v56, %v589_v53 }
  0xf1   : > { %v592_v55 = vpop.f32.mrb[6].mxu0 }
  0xf2   : > { %v2021_v57 = vpop.f32.mrb[7].mxu0  ;;  %v665_v59 = vpack.c.bf16 %v590_v58, %v590_v58 }
  0xf3   : > { %2025 = vmatmul.mubr.msk.bf16.vlgmr.msra.gmra.mrb[4].mxu1 %vm597_vm2, %v595_v29  ;;  %v1862_v29 = vld [vmem:[%s2686_s4 + $0x1] ss:$0 sm:$0xff] }
  0xf4   : > { %2038 = vmatprep.mubr.msk.bf16.mxu1 %vm2203_vm0, %v2202_v3  ;;  %v671_v60 = vsel %vm669_vm4, %v665_v59, 0  ;;  %2035 = vmatpush3.bf16.msra.mxu1 %v721_v63 }
  0xf5   : > { %2029 = vmatpush3.bf16.msra.mxu0 %v671_v60  ;;  %2036 = vmatprep.subr.bf16.mxu1 %v2202_v3 }
  0xf6   : > { %2042 = vmatprep.subr.bf16.mxu0 %v2202_v3 }
  0xf8   : > { %2037 = vmatpush3.bf16.msra.mxu1 %v722_v2  ;;  %v994_v2 = vpack.c.bf16 %v1880_v1, %v1880_v1 }
  0xf9   : > { %2050 = vmatprep.subr.bf16.mxu1 %v2202_v3 }
  0xfb   : > { %2039 = vmatmul.mubr.msk.bf16.vlgmr.msra.gmra.mrb[8].mxu1 %vm445_vm1, %v2321_v14 }
  0xfc   : > { %2054 = vmatprep.mubr.msk.bf16.mxu1 %vm2203_vm0, %v2202_v3 }
 0x1c6   : > { %v638_v40 = vpop.f32.mrb[4].mxu1 }
 0x1c7   : > { %v644_v41 = vmul.f32 0.35355338, %v638_v40  ;;  %v2026_v42 = vpop.f32.mrb[5].mxu1  ;;  %v1873_v40 = vld [vmem:[%s2685_s3 + $0x30] sm:$0xff] }
 0x1c8   : > { %v641_v43 = vpop.f32.mrb[6].mxu1  ;;  %v1874_v42 = vld [vmem:[%s2685_s3 + $0x38] sm:$0xff] }
 0x1c9   : > { %v651_v44 = vadd.f32 %v2370_v39, %v644_v41  ;;  %v2027_v45 = vpop.f32.mrb[7].mxu1  ;;  %v831_v41 = vpack.c.bf16 %v1872_v36, %v1871_v35  ;;  %v832_v43 = vpack.c.bf16 %v1874_v42, %v1873_v40  ;;  %v1895_v36 = vld [vmem:[%s2687_s5 + $0x2] ss:$0 sm:$0xff] }
 0x1cb   : > { %v652_v46 = vsel %vm431_vm3, %v651_v44, -1e+09  ;;  %2051 = vmatpush3.bf16.msra.mxu1 %v831_v41 }
 0x1cc   : > { %v653_v47 = vsel %vm597_vm2, %v652_v46, -inf  ;;  %2052 = vmatprep.subr.bf16.mxu1 %v2202_v3 }
 0x1cd   : > { %654 = vmax.xlane.f32.xlu0 %v653_v47 }
 0x1ce   : > { %v765_v16 = vpop.f32.mrb[8].mxu1 }
 0x1cf   : > { %v2040_v17 = vpop.f32.mrb[9].mxu1  ;;  %v766_v33 = vadd.f32 %v1862_v29, %v765_v16  ;;  %2053 = vmatpush3.bf16.msra.mxu1 %v832_v43 }
 0x1d0   : > { %v768_v18 = vpop.f32.mrb[10].mxu1  ;;  %2064 = vmatprep.subr.bf16.mxu1 %v2202_v3 }
 0x1d1   : > { %v2041_v19 = vpop.f32.mrb[11].mxu1  ;;  %v881_v34 = vpack.c.bf16 %v766_v33, %v766_v33  ;;  %v1892_v18 = vld [vmem:[%s2684_s2 + $0x50] sm:$0xff] }
 0x1d2   : > { %2055 = vmatmul.mubr.msk.bf16.vlgmr.msra.gmra.mrb[12].mxu1 %vm445_vm1, %v2321_v14  ;;  %v1893_v19 = vld [vmem:[%s2684_s2 + $0x58] sm:$0xff] }
 0x1d3   : > { %2066 = vmatprep.mubr.msk.bf16.mxu1 %vm2203_vm0, %v2202_v3 }
 0x25a   : > { %v655_v48 = vpop.xlane.xlu0 %654 }
 0x25b   : > { %v656_v49 = vsub.f32 %v652_v46, %v655_v48 }
 0x25d   : > { %v657_v50 = vmul.f32 1.442695, %v656_v49 }
 0x25f   : > { %2176 = vpow2.f32 %v657_v50 }
 0x269   : > { %v2177_v51 = vpop.eup %2176 }
 0x26a   : > { %v659_v52 = vsel %vm597_vm2, %v2177_v51, 0.0 }
 0x26b   : > { %660 = vadd.xlane.f32.xlu0 %v659_v52  ;;  %v1876_v52 = vld [vmem:[%s2688_s6 + $0x1] ss:$0 sm:$0xff] }
 0x2a5   : > { %v875_v53 = vpop.f32.mrb[12].mxu1 }
 0x2a6   : > { %v876_v54 = vadd.f32 %v1876_v52, %v875_v53  ;;  %v2056_v55 = vpop.f32.mrb[13].mxu1  ;;  %v1888_v52 = vld [vmem:[%s2686_s4 + $0x2] ss:$0 sm:$0xff] }
 0x2a7   : > { %v878_v56 = vpop.f32.mrb[14].mxu1 }
 0x2a8   : > { %v944_v57 = vpack.c.bf16 %v876_v54, %v876_v54  ;;  %v2057_v58 = vpop.f32.mrb[15].mxu1 }
 0x2aa   : > { %v949_v59 = vsel %vm669_vm4, %v944_v57, 0 }
 0x2ab   : > { %2065 = vmatpush3.bf16.msra.mxu1 %v949_v59  ;;  %v1897_v59 = vld [vmem:[%s2685_s3 + $0x40] sm:$0xff] }
 0x2ac   : > { %2076 = vmatprep.subr.bf16.mxu1 %v2202_v3 }
 0x2f8   : > { %v661_v4 = vpop.xlane.xlu0 %660 }
 0x2f9   : > { %2178 = vrcp.f32 %v661_v4  ;;  %v999_v4 = vsel %vm669_vm4, %v994_v2, 0 }
 0x303   : > { %v2179_v7 = vpop.eup %2178 }
 0x304   : > { %v663_v8 = vmul.f32 %v2179_v7, %v2177_v51  ;;  %v715_v7 = vpack.c.bf16 %v714_v6, %v714_v6 }
 0x306   : > { %v664_v10 = vpack.c.bf16 %v663_v8, %v663_v8  ;;  %v1045_v11 = vsel %vm669_vm4, %v715_v7, 0 }
 0x308   : > { %2031 = vmatmul.mubr.msk.bf16.vlgmr.msra.gmra.mrb[8].mxu0 %vm597_vm2, %v664_v10 }
 0x309   : > { %2043 = vmatpush3.bf16.msra.mxu0 %v776_v9  ;;  %2046 = vmatprep.mubr.msk.bf16.mxu0 %vm2203_vm0, %v2202_v3 }
 0x30a   : > { %2044 = vmatprep.subr.bf16.mxu0 %v2202_v3 }
 0x30d   : > { %2045 = vmatpush3.bf16.msra.mxu0 %v777_v15  ;;  %v1891_v15 = vld [vmem:[%s2684_s2 + $0x48] sm:$0xff] }
 0x30e   : > { %2058 = vmatprep.subr.bf16.mxu0 %v2202_v3  ;;  %v1147_v16 = vpack.c.bf16 %v1891_v15, %v1890_v12 }
 0x310   : > { %2047 = vmatmul.mubr.msk.bf16.vlgmr.msra.gmra.mrb[12].mxu0 %vm445_vm1, %v2321_v14 }
 0x311   : > { %2060 = vmatprep.mubr.msk.bf16.mxu0 %vm2203_vm0, %v2202_v3 }
 0x3db   : > { %v2424_v20 = vpop.f32.mrb[8].mxu0 }
 0x3dc   : > { %v2032_v21 = vpop.f32.mrb[9].mxu0  ;;  %v713_v17 = vpack.c.bf16 %v2424_v20, %v2424_v20  ;;  %v1883_v20 = vld [vmem:[%s2683_s1 + $0x40] sm:$0xff] }
 0x3dd   : > { %v710_v22 = vpop.f32.mrb[10].mxu0  ;;  %v1148_v21 = vpack.c.bf16 %v1893_v19, %v1892_v18 }
 0x3de   : > { %v2033_v23 = vpop.f32.mrb[11].mxu0  ;;  %v1884_v22 = vld [vmem:[%s2683_s1 + $0x48] sm:$0xff] }
 0x3e3   : > { %v820_v25 = vpop.f32.mrb[12].mxu0 }
 0x3e4   : > { %v821_v26 = vadd.f32 %v1869_v24, %v820_v25  ;;  %v2048_v27 = vpop.f32.mrb[13].mxu0  ;;  %v1092_v24 = vpack.c.bf16 %v1884_v22, %v1883_v20 }
 0x3e5   : > { %v823_v28 = vpop.f32.mrb[14].mxu0  ;;  %v1885_v27 = vld [vmem:[%s2683_s1 + $0x50] sm:$0xff] }
 0x3e6   : > { %v882_v30 = vpack.c.bf16 %v821_v26, %v821_v26  ;;  %v2049_v31 = vpop.f32.mrb[15].mxu0  ;;  %v1886_v28 = vld [vmem:[%s2683_s1 + $0x58] sm:$0xff] }
 0x3e7   : > { %v1093_v31 = vpack.c.bf16 %v1886_v28, %v1885_v27 }
 0x3e8   : > { %v887_v32 = vsel %vm597_vm2, %v882_v30, 0 }
 0x3e9   : > { %2059 = vmatpush3.bf16.xpose.msra.mxu0 %v887_v32 }
 0x3ea   : > { %2070 = vmatprep.subr.bf16.mxu0 %v2202_v3 }
 0x3f0   : > { %2061 = vmatmul.mubr.msk.bf16.vlgmr.msra.gmra.mrb[16].mxu0 %vm597_vm2, %v881_v34 }
 0x3f1   : > { %2072 = vmatprep.mubr.msk.bf16.mxu0 %vm2203_vm0, %v2202_v3  ;;  %2071 = vmatpush3.bf16.msra.mxu0 %v999_v4 }
 0x3f2   : > { %2082 = vmatprep.subr.bf16.mxu0 %v2202_v3 }
 0x4c3   : > { %v923_v44 = vpop.f32.mrb[16].mxu0 }
 0x4c4   : > { %v929_v45 = vmul.f32 0.35355338, %v923_v44  ;;  %v2062_v46 = vpop.f32.mrb[17].mxu0 }
 0x4c5   : > { %v926_v47 = vpop.f32.mrb[18].mxu0 }
 0x4c6   : > { %v930_v48 = vadd.f32 %v2370_v39, %v929_v45  ;;  %v2063_v49 = vpop.f32.mrb[19].mxu0 }
 0x4c8   : > { %v931_v50 = vsel %vm431_vm3, %v930_v48, -1e+09 }
 0x4c9   : > { %v932_v51 = vsel %vm597_vm2, %v931_v50, -inf }
 0x4ca   : > { %933 = vmax.xlane.f32.xlu1 %v932_v51 }
 0x557   : > { %v934_v60 = vpop.xlane.xlu1 %933 }
 0x558   : > { %v935_v61 = vsub.f32 %v931_v50, %v934_v60  ;;  %v1898_v60 = vld [vmem:[%s2685_s3 + $0x48] sm:$0xff] }
 0x55a   : > { %v936_v62 = vmul.f32 1.442695, %v935_v61  ;;  %v1899_v61 = vld [vmem:[%s2685_s3 + $0x50] sm:$0xff] }
 0x55c   : > { %2180 = vpow2.f32 %v936_v62  ;;  %v1202_v62 = vpack.c.bf16 %v1898_v60, %v1897_v59 }
 0x566   : > { %v2181_v63 = vpop.eup %2180 }
 0x567   : > { %v938_v0 = vsel %vm597_vm2, %v2181_v63, 0.0 }
 0x568   : > { %939 = vadd.xlane.f32.xlu1 %v938_v0 }
 0x5f5   : > { %v940_v5 = vpop.xlane.xlu1 %939 }
 0x5f6   : > { %2182 = vrcp.f32 %v940_v5 }
 0x600   : > { %v2183_v8 = vpop.eup %2182 }
 0x601   : > { %v942_v9 = vmul.f32 %v2183_v8, %v2181_v63  ;;  %v1900_v63 = vld [vmem:[%s2685_s3 + $0x58] sm:$0xff] }
 0x602   : > { %v1203_v0 = vpack.c.bf16 %v1900_v63, %v1899_v61 }
 0x603   : > { %v943_v10 = vpack.c.bf16 %v942_v9, %v942_v9 }
 0x605   : > { %2067 = vmatmul.mubr.msk.bf16.vlgmr.msra.gmra.mrb[16].mxu1 %vm597_vm2, %v943_v10 }
 0x606   : > { %2077 = vmatpush3.bf16.msra.mxu1 %v1045_v11  ;;  %2078 = vmatprep.mubr.msk.bf16.mxu1 %vm2203_vm0, %v2202_v3 }
 0x607   : > { %2090 = vmatprep.subr.bf16.mxu1 %v2202_v3 }
 0x60d   : > { %2079 = vmatmul.mubr.msk.bf16.vlgmr.msra.gmra.mrb[20].mxu1 %vm597_vm2, %v713_v17 }
 0x60e   : > { %2091 = vmatpush3.bf16.msra.mxu1 %v1147_v16  ;;  %2094 = vmatprep.mubr.msk.bf16.mxu1 %vm2203_vm0, %v2202_v3 }
 0x60f   : > { %2092 = vmatprep.subr.bf16.mxu1 %v2202_v3 }
 0x612   : > { %2093 = vmatpush3.bf16.msra.mxu1 %v1148_v21  ;;  %v1902_v21 = vld [vmem:[%s2688_s6 + $0x2] ss:$0 sm:$0xff] }
 0x613   : > { %2106 = vmatprep.subr.bf16.mxu1 %v2202_v3 }
 0x615   : > { %2095 = vmatmul.mubr.msk.bf16.vlgmr.msra.gmra.mrb[24].mxu1 %vm445_vm1, %v2321_v14 }
 0x616   : > { %2108 = vmatprep.mubr.msk.bf16.mxu1 %vm2203_vm0, %v2202_v3 }
 0x6d8   : > { %v985_v23 = vpop.f32.mrb[16].mxu1 }
 0x6d9   : > { %v991_v25 = vpack.c.bf16 %v985_v23, %v985_v23  ;;  %v2068_v26 = vpop.f32.mrb[17].mxu1 }
 0x6da   : > { %v988_v29 = vpop.f32.mrb[18].mxu1 }
 0x6db   : > { %v2069_v30 = vpop.f32.mrb[19].mxu1  ;;  %2073 = vmatmul.mubr.msk.bf16.vlgmr.msra.gmra.mrb[20].mxu0 %vm597_vm2, %v991_v25  ;;  %v1906_v25 = vld [vmem:[%s2689_s7 + $0x10] sm:$0xff] }
 0x6dc   : > { %2083 = vmatpush3.bf16.msra.mxu0 %v1092_v24  ;;  %2086 = vmatprep.mubr.msk.bf16.mxu0 %vm2203_vm0, %v2202_v3  ;;  %v1365_v26 = vpack.c.bf16 %v1906_v25, %v1906_v25 }
 0x6dd   : > { %2084 = vmatprep.subr.bf16.mxu0 %v2202_v3 }
 0x6de   : > { %v1370_v27 = vsel %vm669_vm4, %v1365_v26, 0 }
 0x6e0   : > { %v1081_v32 = vpop.f32.mrb[20].mxu1  ;;  %2085 = vmatpush3.bf16.msra.mxu0 %v1093_v31 }
 0x6e1   : > { %v2080_v33 = vpop.f32.mrb[21].mxu1  ;;  %2098 = vmatprep.subr.bf16.mxu0 %v2202_v3 }
 0x6e2   : > { %v1084_v34 = vpop.f32.mrb[22].mxu1  ;;  %v1909_v33 = vld [vmem:[%s2683_s1 + $0x68] sm:$0xff] }
 0x6e3   : > { %v2081_v35 = vpop.f32.mrb[23].mxu1  ;;  %2087 = vmatmul.mubr.msk.bf16.vlgmr.msra.gmra.mrb[24].mxu0 %vm445_vm1, %v2321_v14 }
 0x6e4   : > { %2102 = vmatprep.mubr.msk.bf16.mxu0 %vm2203_vm0, %v2202_v3  ;;  %2099 = vmatpush3.bf16.msra.mxu0 %v1202_v62  ;;  %v1910_v35 = vld [vmem:[%s2683_s1 + $0x70] sm:$0xff]  ;;  %v1920_v62 = vld [vmem:[%s2687_s5 + $0x3] ss:$0 sm:$0xff] }
 0x6e5   : > { %2100 = vmatprep.subr.bf16.mxu0 %v2202_v3 }
 0x6e8   : > { %v1191_v40 = vpop.f32.mrb[24].mxu1  ;;  %2101 = vmatpush3.bf16.msra.mxu0 %v1203_v0 }
 0x6e9   : > { %v1192_v41 = vadd.f32 %v1895_v36, %v1191_v40  ;;  %v2096_v42 = vpop.f32.mrb[25].mxu1  ;;  %2112 = vmatprep.subr.bf16.mxu0 %v2202_v3  ;;  %v1911_v36 = vld [vmem:[%s2683_s1 + $0x78] sm:$0xff] }
 0x6ea   : > { %v1194_v43 = vpop.f32.mrb[26].mxu1  ;;  %v1419_v40 = vpack.c.bf16 %v1911_v36, %v1910_v35  ;;  %v1916_v42 = vld [vmem:[%s2684_s2 + $0x68] sm:$0xff] }
 0x6eb   : > { %v1253_v44 = vpack.c.bf16 %v1192_v41, %v1192_v41  ;;  %v2097_v45 = vpop.f32.mrb[27].mxu1  ;;  %2103 = vmatmul.mubr.msk.bf16.vlgmr.msra.gmra.mrb[28].mxu0 %vm445_vm1, %v2321_v14  ;;  %v1915_v41 = vld [vmem:[%s2684_s2 + $0x60] sm:$0xff] }
 0x6ec   : > { %2114 = vmatprep.mubr.msk.bf16.mxu0 %vm2203_vm0, %v2202_v3 }
 0x6ed   : > { %v1258_v46 = vsel %vm597_vm2, %v1253_v44, 0  ;;  %v1473_v44 = vpack.c.bf16 %v1916_v42, %v1915_v41 }
 0x6ee   : > { %2107 = vmatpush3.bf16.xpose.msra.mxu1 %v1258_v46 }
 0x6ef   : > { %2118 = vmatprep.subr.bf16.mxu1 %v2202_v3 }
 0x7ae   : > { %v1035_v47 = vpop.f32.mrb[20].mxu0 }
 0x7af   : > { %v2528_v48 = vadd.f32 %v1081_v32, %v1035_v47  ;;  %v2074_v49 = vpop.f32.mrb[21].mxu0  ;;  %v1908_v32 = vld [vmem:[%s2683_s1 + $0x60] sm:$0xff]  ;;  %v1917_v47 = vld [vmem:[%s2684_s2 + $0x70] sm:$0xff] }
 0x7b0   : > { %v1038_v50 = vpop.f32.mrb[22].mxu0  ;;  %v1418_v34 = vpack.c.bf16 %v1909_v33, %v1908_v32  ;;  %v1918_v49 = vld [vmem:[%s2684_s2 + $0x78] sm:$0xff] }
 0x7b1   : > { %v2075_v51 = vpop.f32.mrb[23].mxu0  ;;  %v1931_v33 = vld [vmem:[%s2689_s7 + $0x18] sm:$0xff] }
 0x7b6   : > { %v1136_v53 = vpop.f32.mrb[24].mxu0 }
 0x7b7   : > { %v1137_v54 = vadd.f32 %v1888_v52, %v1136_v53  ;;  %v2088_v55 = vpop.f32.mrb[25].mxu0  ;;  %v1474_v52 = vpack.c.bf16 %v1918_v49, %v1917_v47 }
 0x7b8   : > { %v1139_v56 = vpop.f32.mrb[26].mxu0 }
 0x7b9   : > { %v1252_v57 = vpack.c.bf16 %v1137_v54, %v1137_v54  ;;  %v2089_v58 = vpop.f32.mrb[27].mxu0 }
 0x7bb   : > { %2109 = vmatmul.mubr.msk.bf16.vlgmr.msra.gmra.mrb[28].mxu1 %vm597_vm2, %v1252_v57 }
 0x7bc   : > { %2120 = vmatprep.mubr.msk.bf16.mxu1 %vm2203_vm0, %v2202_v3  ;;  %2119 = vmatpush3.bf16.msra.mxu1 %v1370_v27 }
 0x7bd   : > { %2132 = vmatprep.subr.bf16.mxu1 %v2202_v3 }
 0x7be   : > { %v1246_v17 = vpop.f32.mrb[28].mxu0 }
 0x7bf   : > { %v2104_v18 = vpop.f32.mrb[29].mxu0  ;;  %v1247_v22 = vadd.f32 %v1902_v21, %v1246_v17 }
 0x7c0   : > { %v1249_v19 = vpop.f32.mrb[30].mxu0 }
 0x7c1   : > { %v2105_v20 = vpop.f32.mrb[31].mxu0  ;;  %v1315_v23 = vpack.c.bf16 %v1247_v22, %v1247_v22 }
 0x7c3   : > { %v1320_v24 = vsel %vm669_vm4, %v1315_v23, 0 }
 0x7c4   : > { %2113 = vmatpush3.bf16.msra.mxu0 %v1320_v24 }
 0x7c5   : > { %2124 = vmatprep.subr.bf16.mxu0 %v2202_v3 }
 0x88e   : > { %v1294_v1 = vpop.f32.mrb[28].mxu1 }
 0x88f   : > { %v1300_v2 = vmul.f32 0.35355338, %v1294_v1  ;;  %v2110_v4 = vpop.f32.mrb[29].mxu1 }
 0x890   : > { %v1297_v5 = vpop.f32.mrb[30].mxu1  ;;  %v1913_v4 = vld [vmem:[%s2686_s4 + $0x3] ss:$0 sm:$0xff] }
 0x891   : > { %v1301_v6 = vadd.f32 %v2370_v39, %v1300_v2  ;;  %v2111_v7 = vpop.f32.mrb[31].mxu1 }
 0x893   : > { %v1302_v8 = vsel %vm431_vm3, %v1301_v6, -1e+09 }
 0x894   : > { %v1303_v9 = vsel %vm597_vm2, %v1302_v8, -inf }
 0x895   : > { %1304 = vmax.xlane.f32.xlu0 %v1303_v9  ;;  %v1922_v9 = vld [vmem:[%s2685_s3 + $0x60] sm:$0xff] }
 0x922   : > { %v1305_v10 = vpop.xlane.xlu0 %1304 }
 0x923   : > { %v1306_v11 = vsub.f32 %v1302_v8, %v1305_v10  ;;  %v1923_v10 = vld [vmem:[%s2685_s3 + $0x68] sm:$0xff] }
 0x925   : > { %v1307_v12 = vmul.f32 1.442695, %v1306_v11  ;;  %v1924_v11 = vld [vmem:[%s2685_s3 + $0x70] sm:$0xff] }
 0x927   : > { %2184 = vpow2.f32 %v1307_v12  ;;  %v1528_v12 = vpack.c.bf16 %v1923_v10, %v1922_v9 }
 0x931   : > { %v2185_v15 = vpop.eup %2184 }
 0x932   : > { %v1309_v16 = vsel %vm597_vm2, %v2185_v15, 0.0 }
 0x933   : > { %1310 = vadd.xlane.f32.xlu1 %v1309_v16 }
 0x9c0   : > { %v1311_v28 = vpop.xlane.xlu1 %1310 }
 0x9c1   : > { %2186 = vrcp.f32 %v1311_v28 }
 0x9cb   : > { %v2187_v29 = vpop.eup %2186 }
 0x9cc   : > { %v1313_v30 = vmul.f32 %v2187_v29, %v2185_v15  ;;  %v1925_v15 = vld [vmem:[%s2685_s3 + $0x78] sm:$0xff] }
 0x9cd   : > { %v1529_v16 = vpack.c.bf16 %v1925_v15, %v1924_v11 }
 0x9ce   : > { %v1314_v31 = vpack.c.bf16 %v1313_v30, %v1313_v30 }
 0x9d0   : > { %2115 = vmatmul.mubr.msk.bf16.vlgmr.msra.gmra.mrb[32].mxu0 %vm597_vm2, %v1314_v31 }
 0x9d1   : > { %2128 = vmatprep.mubr.msk.bf16.mxu0 %vm2203_vm0, %v2202_v3  ;;  %2125 = vmatpush3.bf16.msra.mxu0 %v1418_v34  ;;  %v1691_v34 = vpack.c.bf16 %v1931_v33, %v1931_v33 }
 0x9d2   : > { %2126 = vmatprep.subr.bf16.mxu0 %v2202_v3 }
 0x9d3   : > { %v1696_v35 = vsel %vm669_vm4, %v1691_v34, 0 }
 0x9d5   : > { %2127 = vmatpush3.bf16.msra.mxu0 %v1419_v40 }
 0x9d6   : > { %2140 = vmatprep.subr.bf16.mxu0 %v2202_v3 }
 0x9d8   : > { %2129 = vmatmul.mubr.msk.bf16.vlgmr.msra.gmra.mrb[36].mxu0 %vm445_vm1, %v2321_v14 }
 0x9d9   : > { %2144 = vmatprep.mubr.msk.bf16.mxu0 %vm2203_vm0, %v2202_v3  ;;  %2141 = vmatpush3.bf16.msra.mxu0 %v1528_v12 }
 0x9da   : > { %2142 = vmatprep.subr.bf16.mxu0 %v2202_v3 }
 0x9dd   : > { %2143 = vmatpush3.bf16.msra.mxu0 %v1529_v16 }
 0x9de   : > { %2154 = vmatprep.subr.bf16.mxu0 %v2202_v3 }
 0x9e0   : > { %2145 = vmatmul.mubr.msk.bf16.vlgmr.msra.gmra.mrb[40].mxu0 %vm445_vm1, %v2321_v14 }
 0x9e1   : > { %2156 = vmatprep.mubr.msk.bf16.mxu0 %vm2203_vm0, %v2202_v3 }
 0xaa3   : > { %v1356_v43 = vpop.f32.mrb[32].mxu0 }
 0xaa4   : > { %v1362_v45 = vpack.c.bf16 %v1356_v43, %v1356_v43  ;;  %v2116_v46 = vpop.f32.mrb[33].mxu0 }
 0xaa5   : > { %v1359_v50 = vpop.f32.mrb[34].mxu0 }
 0xaa6   : > { %v2117_v51 = vpop.f32.mrb[35].mxu0  ;;  %2121 = vmatmul.mubr.msk.bf16.vlgmr.msra.gmra.mrb[32].mxu1 %vm597_vm2, %v1362_v45  ;;  %v1933_v50 = vld [vmem:[%s2690_s8] ss:$0 sm:$0xff] }
 0xaa7   : > { %2133 = vmatpush3.bf16.msra.mxu1 %v1473_v44  ;;  %2136 = vmatprep.mubr.msk.bf16.mxu1 %vm2203_vm0, %v2202_v3 }
 0xaa8   : > { %2134 = vmatprep.subr.bf16.mxu1 %v2202_v3 }
 0xaab   : > { %2135 = vmatpush3.bf16.msra.mxu1 %v1474_v52  ;;  %v1462_v53 = vpop.f32.mrb[36].mxu0 }
 0xaac   : > { %2148 = vmatprep.subr.bf16.mxu1 %v2202_v3  ;;  %v2130_v54 = vpop.f32.mrb[37].mxu0  ;;  %v1463_v7 = vadd.f32 %v1913_v4, %v1462_v53 }
 0xaad   : > { %v1465_v55 = vpop.f32.mrb[38].mxu0 }
 0xaae   : > { %2137 = vmatmul.mubr.msk.bf16.vlgmr.msra.gmra.mrb[36].mxu1 %vm445_vm1, %v2321_v14  ;;  %v2131_v56 = vpop.f32.mrb[39].mxu0  ;;  %v1578_v8 = vpack.c.bf16 %v1463_v7, %v1463_v7 }
 0xaaf   : > { %2150 = vmatprep.mubr.msk.bf16.mxu1 %vm2203_vm0, %v2202_v3 }
 0xab3   : > { %v1572_v28 = vpop.f32.mrb[40].mxu0 }
 0xab4   : > { %v2146_v29 = vpop.f32.mrb[41].mxu0 }
 0xab5   : > { %v1575_v30 = vpop.f32.mrb[42].mxu0 }
 0xab6   : > { %v2147_v37 = vpop.f32.mrb[43].mxu0 }
 0xb79   : > { %v1406_v57 = vpop.f32.mrb[32].mxu1 }
 0xb7a   : > { %v2613_v58 = vadd.f32 %v1406_v57, %v2528_v48  ;;  %v2122_v59 = vpop.f32.mrb[33].mxu1 }
 0xb7b   : > { %v1409_v60 = vpop.f32.mrb[34].mxu1 }
 0xb7c   : > { %v2123_v61 = vpop.f32.mrb[35].mxu1 }
 0xb81   : > { %v1517_v63 = vpop.f32.mrb[36].mxu1 }
 0xb82   : > { %v1518_v0 = vadd.f32 %v1920_v62, %v1517_v63  ;;  %v2138_v1 = vpop.f32.mrb[37].mxu1 }
 0xb83   : > { %v1520_v2 = vpop.f32.mrb[38].mxu1 }
 0xb84   : > { %v1579_v5 = vpack.c.bf16 %v1518_v0, %v1518_v0  ;;  %v2139_v6 = vpop.f32.mrb[39].mxu1 }
 0xb86   : > { %v1584_v48 = vsel %vm597_vm2, %v1579_v5, 0  ;;  %v1935_v5 = vld [vmem:[%s2692_s10] ss:$0 sm:$0xff] }
 0xb87   : > { %2149 = vmatpush3.bf16.xpose.msra.mxu1 %v1584_v48 }
 0xb88   : > { %2160 = vmatprep.subr.bf16.mxu1 %v2202_v3 }
 0xb8e   : > { %2151 = vmatmul.mubr.msk.bf16.vlgmr.msra.gmra.mrb[40].mxu1 %vm597_vm2, %v1578_v8 }
 0xb8f   : > { %2162 = vmatprep.mubr.msk.bf16.mxu1 %vm2203_vm0, %v2202_v3  ;;  %2161 = vmatpush3.bf16.msra.mxu1 %v1696_v35 }
 0xc61   : > { %v1620_v17 = vpop.f32.mrb[40].mxu1 }
 0xc62   : > { %v1626_v18 = vmul.f32 0.35355338, %v1620_v17  ;;  %v2152_v19 = vpop.f32.mrb[41].mxu1 }
 0xc63   : > { %v1623_v21 = vpop.f32.mrb[42].mxu1 }
 0xc64   : > { %v1627_v20 = vadd.f32 %v2370_v39, %v1626_v18  ;;  %v2153_v22 = vpop.f32.mrb[43].mxu1  ;;  %v1927_v39 = vld [vmem:[%s2688_s6 + $0x3] ss:$0 sm:$0xff] }
 0xc65   : > { %v1573_v38 = vadd.f32 %v1927_v39, %v1572_v28 }
 0xc66   : > { %v1628_v23 = vsel %vm431_vm3, %v1627_v20, -1e+09 }
 0xc67   : > { %v1629_v24 = vsel %vm597_vm2, %v1628_v23, -inf  ;;  %v1641_v31 = vpack.c.bf16 %v1573_v38, %v1573_v38 }
 0xc68   : > { %1630 = vmax.xlane.f32.xlu0 %v1629_v24 }
 0xc69   : > { %v1646_v32 = vsel %vm669_vm4, %v1641_v31, 0 }
 0xc6a   : > { %2155 = vmatpush3.bf16.msra.mxu0 %v1646_v32 }
 0xcf5   : > { %v1631_v25 = vpop.xlane.xlu0 %1630 }
 0xcf6   : > { %v1632_v26 = vsub.f32 %v1628_v23, %v1631_v25 }
 0xcf8   : > { %v1633_v14 = vmul.f32 1.442695, %v1632_v26 }
 0xcfa   : > { %2188 = vpow2.f32 %v1633_v14 }
 0xd04   : > { %v2189_v27 = vpop.eup %2188 }
 0xd05   : > { %v1635_v3 = vsel %vm597_vm2, %v2189_v27, 0.0 }
 0xd06   : > { %1636 = vadd.xlane.f32.xlu1 %v1635_v3 }
 0xd93   : > { %v1637_v36 = vpop.xlane.xlu1 %1636 }
 0xd94   : > { %2190 = vrcp.f32 %v1637_v36 }
 0xd9e   : > { %v2191_v40 = vpop.eup %2190 }
 0xd9f   : > { %v1639_v41 = vmul.f32 %v2191_v40, %v2189_v27 }
 0xda1   : > { %v1640_v42 = vpack.c.bf16 %v1639_v41, %v1639_v41 }
 0xda3   : > { %2157 = vmatmul.mubr.msk.bf16.vlgmr.msra.gmra.mrb[44].mxu0 %vm597_vm2, %v1640_v42 }
 0xe76   : > { %v1682_v43 = vpop.f32.mrb[44].mxu0 }
 0xe77   : > { %v1688_v44 = vpack.c.bf16 %v1682_v43, %v1682_v43  ;;  %v2158_v45 = vpop.f32.mrb[45].mxu0 }
 0xe78   : > { %v1685_v46 = vpop.f32.mrb[46].mxu0 }
 0xe79   : > { %v2159_v47 = vpop.f32.mrb[47].mxu0  ;;  %2163 = vmatmul.mubr.msk.bf16.vlgmr.msra.gmra.mrb[44].mxu1 %vm597_vm2, %v1688_v44 }
 0xf4c   : > { %v1732_v49 = vpop.f32.mrb[44].mxu1 }
 0xf4d   : > { %v1738_v51 = vadd.f32 %v1732_v49, %v2613_v58  ;;  %v2164_v52 = vpop.f32.mrb[45].mxu1 }
 0xf4e   : > { %v1735_v53 = vpop.f32.mrb[46].mxu1 }
 0xf4f   : > { %v1746_v54 = vadd.f32 %v1933_v50, %v1738_v51  ;;  %v2165_v55 = vpop.f32.mrb[47].mxu1 }
 0xf51   : > { %v1747_v56 = vadd.f32 %v1746_v54, %v2317_v13  ;;  %v1934_v13 = vld [vmem:[%s2691_s9] ss:$0 sm:$0xff] }
 0xf53   : > { %v1750_v57 = vsel %vm445_vm1, %v1747_v56, 0.0 }
 0xf54   : > { %1751 = vadd.xlane.f32.xlu0 %v1750_v57 }
 0xfe1   : > { %v1752_v59 = vpop.xlane.xlu0 %1751 }
 0xfe2   : > { %v1754_v60 = vmul.f32 0.03125, %v1752_v59 }
 0xfe4   : > { %v1755_v61 = vsub.f32 %v1747_v56, %v1754_v60 }
 0xfe6   : > { %v1756_v62 = vmul.f32 %v1755_v61, %v1755_v61 }
 0xfe8   : > { %v1757_v63 = vsel %vm445_vm1, %v1756_v62, 0.0 }
 0xfe9   : > { %1758 = vadd.xlane.f32.xlu1 %v1757_v63 }
0x1076   : > { %v1759_v0 = vpop.xlane.xlu1 %1758 }
0x1077   : > { %v1760_v1 = vmul.f32 0.03125, %v1759_v0 }
0x1079   : > { %v1761_v58 = vadd.f32 1e-06, %v1760_v1 }
0x107b   : > { %2192 = vrsqrt.f32 %v1761_v58 }
0x1085   : > { %v2193_v2 = vpop.eup %2192 }
0x1086   : > { %v1763_v4 = vmul.f32 %v2193_v2, %v1755_v61 }
0x1088   : > { %v1770_v6 = vmul.f32 %v1934_v13, %v1763_v4 }
0x108a   : > { %v1777_v48 = vadd.f32 %v1935_v5, %v1770_v6 }
0x108c   : > { %1778 = vst.msk [vmem:[%s422_s30] sm:$0xff] %vm445_vm1, %v1777_v48 }
0x108d PF: > { %s22_s21 = sadd.s32 1, %s2200_s21  }
0x108e   : > { %p19_p4 = scmp.ge.s32.totalorder %s22_s21, 4  }
0x1090   :  { %21 = sbr.rel (!%p19_p4) target bundleno = 1 (0x1), region = 122 }

// kernel: transformer_forward.14
= control target key start
LH: loop header
LB: loop body
LE: loop exit
PB: predicated region body
PF: predicated region fallthrough
CT: control target
= control target key end

     0   :  { %s2193_s17 = smov 0   ;;  %s2578_s0 = inlined_call_operand.vmem [shape: f32[2,8,32], index: 0, kind: input, shape index: {}]   ;;  %s2579_s1 = inlined_call_operand.vmem [shape: f32[4,32,8], index: 1, kind: input, shape index: {}]   ;;  %s2580_s2 = inlined_call_operand.vmem [shape: f32[4,32,8], index: 2, kind: input, shape index: {}]   ;;  %s2581_s3 = inlined_call_operand.vmem [shape: f32[4,32,8], index: 3, kind: input, shape index: {}]   ;;  %s2582_s4 = inlined_call_operand.vmem [shape: f32[4,1,8], index: 4, kind: input, shape index: {}]   ;;  %s2583_s5 = inlined_call_operand.vmem [shape: f32[4,1,8], index: 5, kind: input, shape index: {}]   ;;  %s2584_s6 = inlined_call_operand.vmem [shape: f32[4,1,8], index: 6, kind: input, shape index: {}]   ;;  %s2585_s7 = inlined_call_operand.vmem [shape: f32[4,8,32], index: 7, kind: input, shape index: {}]   ;;  %s2586_s8 = inlined_call_operand.vmem [shape: f32[1,32], index: 8, kind: input, shape index: {}]   ;;  %s2587_s9 = inlined_call_operand.vmem [shape: f32[1,32], index: 9, kind: input, shape index: {}]   ;;  %s2588_s10 = inlined_call_operand.vmem [shape: f32[1,32], index: 10, kind: input, shape index: {}]   ;;  %s2589_s11 = inlined_call_operand.vmem [shape: f32[2,8,32], index: 11, kind: output, shape index: {}]  }
   0x1 LB: > { %s1771_s18 = sadd.s32 4294967295, %s2129_s17   ;;  %p1775_p0 = scmp.ge.s32.totalorder %s2129_s17, 1  ;;  %s2129_s17 = sphi %s2193_s17, %s21_s17  }
   0x2   : > { %p336_p1 = scmp.lt.s32.totalorder %s2129_s17, 3 }
   0x4   : > { %p337_p2 = pnand %p1775_p0, %p336_p1 }
   0x5   : > { %v442_v0 = vld [vmem:[%s2580_s2] sm:$0xff] (!%p337_p2)  ;;  %v443_v1 = vld [vmem:[%s2580_s2 + $0x8] sm:$0xff] (!%p337_p2)  ;;  %v444_v2 = vld [vmem:[%s2580_s2 + $0x10] sm:$0xff] (!%p337_p2)  ;;  %p374_p3 = scmp.lt.s32.totalorder (!%p337_p2), %s1771_s18, 1  ;;  %v2131_v3 = vmov (!%p337_p2), 0.0   ;;  %vm2132_vm0 = vmmov (!%p337_p2), 0  }
   0x6   : > { %340 = sbr.rel (%p337_p2) target bundleno = 4225 (0x1081), region = 64  ;;  %1935 = vmatprep.subr.bf16.mxu1 (!%p337_p2), %v2131_v3  ;;  %v446_v4 = vpack.c.bf16 (!%p337_p2), %v443_v1, %v442_v0  ;;  %1927 = vmatprep.subr.bf16.mxu0 (!%p337_p2), %v2131_v3  ;;  %v445_v5 = vld [vmem:[%s2580_s2 + $0x18] sm:$0xff] (!%p337_p2)  ;;  %v385_v6 = vld [vmem:[%s2579_s1] sm:$0xff] (!%p337_p2)  ;;  %v386_v7 = vld [vmem:[%s2579_s1 + $0x8] sm:$0xff] (!%p337_p2)  ;;  %vm398_vm1 = vcmask (!%p337_p2), 261120   ;;  %vm550_vm2 = vcmask (!%p337_p2), 64512  }
   0x7   : > { %v389_v8 = vpack.c.bf16 (!%p337_p2), %v386_v7, %v385_v6  ;;  %1939 = vmatprep.mubr.msk.bf16.mxu1 (!%p337_p2), %vm2132_vm0, %v2131_v3  ;;  %v387_v9 = vld [vmem:[%s2579_s1 + $0x10] sm:$0xff] (!%p337_p2)  ;;  %v388_v10 = vld [vmem:[%s2579_s1 + $0x18] sm:$0xff] (!%p337_p2)  ;;  %1931 = vmatprep.mubr.msk.bf16.mxu0 (!%p337_p2), %vm2132_vm0, %v2131_v3  ;;  %v447_v11 = vpack.c.bf16 (!%p337_p2), %v445_v5, %v444_v2  ;;  %v1780_v15 = vld [vmem:[%s2583_s5] ss:$0 sm:$0xff] (!%p337_p2)  ;;  %vm614_vm3 = vcmask (!%p337_p2), 1043456  }
   0x8   : > { %1936 = vmatpush3.bf16.msra.mxu1 (!%p337_p2), %v446_v4  ;;  %v390_v12 = vpack.c.bf16 (!%p337_p2), %v388_v10, %v387_v9  ;;  %v1778_v21 = vld [vmem:[%s2582_s4] ss:$0 sm:$0xff] (!%p337_p2)  ;;  %v496_v31 = vld [vmem:[%s2581_s3 + $0x8] sm:$0xff] (!%p337_p2)  ;;  %v497_v32 = vld [vmem:[%s2581_s3 + $0x10] sm:$0xff] (!%p337_p2) }
   0x9   : > { %1937 = vmatprep.subr.bf16.mxu1 (!%p337_p2), %v2131_v3  ;;  %1928 = vmatpush3.bf16.msra.mxu0 (!%p337_p2), %v389_v8  ;;  %v495_v30 = vld [vmem:[%s2581_s3] sm:$0xff] (!%p337_p2)  ;;  %v498_v34 = vld [vmem:[%s2581_s3 + $0x18] sm:$0xff] (!%p337_p2)  ;;  %v1787_v56 = vld [vmem:[%s2579_s1 + $0x28] sm:$0xff] (!%p337_p2) }
   0xa   : > { %1929 = vmatprep.subr.bf16.mxu0 (!%p337_p2), %v2131_v3  ;;  %v499_v33 = vpack.c.bf16 (!%p337_p2), %v496_v31, %v495_v30  ;;  %v500_v35 = vpack.c.bf16 (!%p337_p2), %v498_v34, %v497_v32  ;;  %v1782_v50 = vld [vmem:[%s2584_s6] ss:$0 sm:$0xff] (!%p337_p2)  ;;  %v1788_v58 = vld [vmem:[%s2579_s1 + $0x30] sm:$0xff] (!%p337_p2)  ;;  %v1789_v59 = vld [vmem:[%s2579_s1 + $0x38] sm:$0xff] (!%p337_p2) }
   0xb   : > { %v1786_v55 = vld [vmem:[%s2579_s1 + $0x20] sm:$0xff] (!%p337_p2)  ;;  %v667_v60 = vpack.c.bf16 (!%p337_p2), %v1789_v59, %v1788_v58  ;;  %v1794_v63 = vld [vmem:[%s2580_s2 + $0x28] sm:$0xff] (!%p337_p2)  ;;  %v1795_v5 = vld [vmem:[%s2580_s2 + $0x30] sm:$0xff] (!%p337_p2) }
   0xc   : > { %1938 = vmatpush3.bf16.msra.mxu1 (!%p337_p2), %v447_v11  ;;  %v666_v57 = vpack.c.bf16 (!%p337_p2), %v1787_v56, %v1786_v55  ;;  %v1793_v62 = vld [vmem:[%s2580_s2 + $0x20] sm:$0xff] (!%p337_p2)  ;;  %v1796_v6 = vld [vmem:[%s2580_s2 + $0x38] sm:$0xff] (!%p337_p2)  ;;  %v1801_v30 = vld [vmem:[%s2581_s3 + $0x28] sm:$0xff] (!%p337_p2) }
   0xd   : > { %s2591_s18 = smov (!%p374_p3, %s1771_s18), 1  ;;  %1930 = vmatpush3.bf16.msra.mxu0 %v390_v12  ;;  %1951 = vmatprep.subr.bf16.mxu1 %v2131_v3  ;;  %v721_v2 = vpack.c.bf16 %v1794_v63, %v1793_v62  ;;  %v722_v7 = vpack.c.bf16 %v1796_v6, %v1795_v5  ;;  %v1802_v31 = vld [vmem:[%s2581_s3 + $0x30] sm:$0xff]  ;;  %v659_v58 = vld [vmem:[%s2585_s7] sm:$0xff]  ;;  %v1822_v6 = vld [vmem:[%s2580_s2 + $0x58] sm:$0xff] }
   0xe   : > { %s1776_s16 = sshll.u32 %s2591_s18, 3  ;;  %1943 = vmatprep.subr.bf16.mxu0 %v2131_v3  ;;  %v660_v59 = vpack.c.bf16 %v659_v58, %v659_v58  ;;  %v1821_v5 = vld [vmem:[%s2580_s2 + $0x50] sm:$0xff] }
   0xf   : > { %s377_s21 = scalar_lea.vmem %s2578_s0, %s1776_s16  ;;  %s381_s30 = scalar_lea.vmem %s2589_s11, %s1776_s16 }
  0x10   : > { %v2241_v13 = vld [vmem:[%s377_s21] sm:$0xff]  ;;  %v988_v63 = vsel %vm614_vm3, %v660_v59, 0 }
  0x11   : > { %v2245_v14 = vpack.c.bf16 %v2241_v13, %v2241_v13 }
  0x13   : > { %1940 = vmatmul.mubr.msk.bf16.vlgmr.msra.gmra.mrb[0].mxu1 %vm398_vm1, %v2245_v14  ;;  %1932 = vmatmul.mubr.msk.bf16.vlgmr.msra.gmra.mrb[0].mxu0 %vm398_vm1, %v2245_v14 }
  0x14   : > { %1953 = vmatprep.mubr.msk.bf16.mxu1 %vm2132_vm0, %v2131_v3  ;;  %1947 = vmatprep.mubr.msk.bf16.mxu0 %vm2132_vm0, %v2131_v3 }
  0x15   : > { %1944 = vmatpush3.bf16.msra.mxu0 %v499_v33  ;;  %v1803_v33 = vld [vmem:[%s2581_s3 + $0x38] sm:$0xff] }
  0x16   : > { %1945 = vmatprep.subr.bf16.mxu0 %v2131_v3  ;;  %v777_v34 = vpack.c.bf16 %v1803_v33, %v1802_v31 }
  0x19   : > { %1946 = vmatpush3.bf16.msra.mxu0 %v500_v35 }
  0x1a   : > { %1957 = vmatprep.subr.bf16.mxu0 %v2131_v3 }
  0x1c   : > { %1948 = vmatmul.mubr.msk.bf16.vlgmr.msra.gmra.mrb[4].mxu0 %vm398_vm1, %v2245_v14 }
  0x1d   : > { %1959 = vmatprep.mubr.msk.bf16.mxu0 %vm2132_vm0, %v2131_v3 }
  0xe6   : > { %v489_v16 = vpop.f32.mrb[0].mxu1  ;;  %v436_v19 = vpop.f32.mrb[0].mxu0 }
  0xe7   : > { %v490_v17 = vadd.f32 %v1780_v15, %v489_v16  ;;  %v1941_v18 = vpop.f32.mrb[1].mxu1  ;;  %v1933_v22 = vpop.f32.mrb[1].mxu0  ;;  %v437_v28 = vadd.f32 %v1778_v21, %v436_v19 }
  0xe8   : > { %v492_v20 = vpop.f32.mrb[2].mxu1  ;;  %v439_v25 = vpop.f32.mrb[2].mxu0  ;;  %v1798_v18 = vld [vmem:[%s2583_s5 + $0x1] ss:$0 sm:$0xff] }
  0xe9   : > { %v549_v23 = vpack.c.bf16 %v490_v17, %v490_v17  ;;  %v1942_v24 = vpop.f32.mrb[3].mxu1  ;;  %v1934_v26 = vpop.f32.mrb[3].mxu0  ;;  %v548_v29 = vpack.c.bf16 %v437_v28, %v437_v28 }
  0xeb   : > { %v555_v27 = vsel %vm550_vm2, %v549_v23, 0  ;;  %v1791_v23 = vld [vmem:[%s2582_s4 + $0x1] ss:$0 sm:$0xff] }
  0xec   : > { %1952 = vmatpush3.bf16.xpose.msra.mxu1 %v555_v27 }
  0xed   : > { %1963 = vmatprep.subr.bf16.mxu1 %v2131_v3 }
  0xef   : > { %v542_v47 = vpop.f32.mrb[4].mxu0 }
  0xf0   : > { %v1949_v48 = vpop.f32.mrb[5].mxu0  ;;  %v543_v52 = vadd.f32 %v1782_v50, %v542_v47 }
  0xf1   : > { %v545_v49 = vpop.f32.mrb[6].mxu0 }
  0xf2   : > { %v1950_v51 = vpop.f32.mrb[7].mxu0  ;;  %v610_v53 = vpack.c.bf16 %v543_v52, %v543_v52 }
  0xf3   : > { %1954 = vmatmul.mubr.msk.bf16.vlgmr.msra.gmra.mrb[4].mxu1 %vm550_vm2, %v548_v29  ;;  %v1800_v29 = vld [vmem:[%s2581_s3 + $0x20] sm:$0xff] }
  0xf4   : > { %1967 = vmatprep.mubr.msk.bf16.mxu1 %vm2132_vm0, %v2131_v3  ;;  %v616_v54 = vsel %vm614_vm3, %v610_v53, 0  ;;  %1964 = vmatpush3.bf16.msra.mxu1 %v666_v57  ;;  %v776_v32 = vpack.c.bf16 %v1801_v30, %v1800_v29 }
  0xf5   : > { %1958 = vmatpush3.bf16.msra.mxu0 %v616_v54  ;;  %1965 = vmatprep.subr.bf16.mxu1 %v2131_v3  ;;  %v1809_v54 = vld [vmem:[%s2585_s7 + $0x8] sm:$0xff] }
  0xf6   : > { %1971 = vmatprep.subr.bf16.mxu0 %v2131_v3  ;;  %v937_v55 = vpack.c.bf16 %v1809_v54, %v1809_v54 }
  0xf8   : > { %1966 = vmatpush3.bf16.msra.mxu1 %v667_v60  ;;  %v942_v56 = vsel %vm614_vm3, %v937_v55, 0 }
  0xf9   : > { %1979 = vmatprep.subr.bf16.mxu1 %v2131_v3 }
  0xfb   : > { %1968 = vmatmul.mubr.msk.bf16.vlgmr.msra.gmra.mrb[8].mxu1 %vm398_vm1, %v2245_v14 }
  0xfc   : > { %1983 = vmatprep.mubr.msk.bf16.mxu1 %vm2132_vm0, %v2131_v3  ;;  %1980 = vmatpush3.bf16.msra.mxu1 %v776_v32 }
  0xfd   : > { %1981 = vmatprep.subr.bf16.mxu1 %v2131_v3 }
 0x100   : > { %1982 = vmatpush3.bf16.msra.mxu1 %v777_v34 }
 0x101   : > { %1993 = vmatprep.subr.bf16.mxu1 %v2131_v3 }
 0x103   : > { %1984 = vmatmul.mubr.msk.bf16.vlgmr.msra.gmra.mrb[12].mxu1 %vm398_vm1, %v2245_v14 }
 0x104   : > { %1995 = vmatprep.mubr.msk.bf16.mxu1 %vm2132_vm0, %v2131_v3 }
 0x1c6   : > { %v591_v36 = vpop.f32.mrb[4].mxu1 }
 0x1c7   : > { %v597_v37 = vmul.f32 0.35355338, %v591_v36  ;;  %v1955_v38 = vpop.f32.mrb[5].mxu1 }
 0x1c8   : > { %v594_v39 = vpop.f32.mrb[6].mxu1 }
 0x1c9   : > { %v1956_v40 = vpop.f32.mrb[7].mxu1  ;;  %v598_v41 = vsel %vm550_vm2, %v597_v37, -inf }
 0x1ca   : > { %599 = vmax.xlane.f32.xlu0 %v598_v41  ;;  %v1805_v41 = vld [vmem:[%s2584_s6 + $0x1] ss:$0 sm:$0xff] }
 0x1ce   : > { %v710_v8 = vpop.f32.mrb[8].mxu1 }
 0x1cf   : > { %v1969_v9 = vpop.f32.mrb[9].mxu1  ;;  %v711_v27 = vadd.f32 %v1791_v23, %v710_v8  ;;  %v1812_v8 = vld [vmem:[%s2579_s1 + $0x40] sm:$0xff] }
 0x1d0   : > { %v713_v10 = vpop.f32.mrb[10].mxu1  ;;  %v1813_v9 = vld [vmem:[%s2579_s1 + $0x48] sm:$0xff] }
 0x1d1   : > { %v1970_v11 = vpop.f32.mrb[11].mxu1  ;;  %v826_v28 = vpack.c.bf16 %v711_v27, %v711_v27 }
 0x1d2   : > { %v1035_v11 = vpack.c.bf16 %v1813_v9, %v1812_v8 }
 0x257   : > { %v600_v42 = vpop.xlane.xlu0 %599 }
 0x258   : > { %v601_v43 = vsub.f32 %v597_v37, %v600_v42  ;;  %v820_v42 = vpop.f32.mrb[12].mxu1 }
 0x25a   : > { %v602_v44 = vmul.f32 1.442695, %v601_v43  ;;  %v821_v43 = vadd.f32 %v1805_v41, %v820_v42 }
 0x25c   : > { %2105 = vpow2.f32 %v602_v44  ;;  %v1985_v44 = vpop.f32.mrb[13].mxu1 }
 0x266   : > { %v2106_v45 = vpop.eup %2105 }
 0x267   : > { %v604_v46 = vsel %vm550_vm2, %v2106_v45, 0.0 }
 0x268   : > { %605 = vadd.xlane.f32.xlu0 %v604_v46  ;;  %v887_v46 = vpack.c.bf16 %v821_v43, %v821_v43 }
 0x26a   : > { %v892_v48 = vsel %vm614_vm3, %v887_v46, 0  ;;  %v1827_v46 = vld [vmem:[%s2581_s3 + $0x48] sm:$0xff] }
 0x26b   : > { %1994 = vmatpush3.bf16.msra.mxu1 %v892_v48 }
 0x26c   : > { %2005 = vmatprep.subr.bf16.mxu1 %v2131_v3 }
 0x2f5   : > { %v606_v61 = vpop.xlane.xlu0 %605 }
 0x2f6   : > { %2107 = vrcp.f32 %v606_v61 }
 0x300   : > { %v2108_v0 = vpop.eup %2107 }
 0x301   : > { %v608_v1 = vmul.f32 %v2108_v0, %v2106_v45  ;;  %v823_v45 = vpop.f32.mrb[14].mxu1  ;;  %v1819_v0 = vld [vmem:[%s2580_s2 + $0x40] sm:$0xff] }
 0x302   : > { %v1986_v47 = vpop.f32.mrb[15].mxu1  ;;  %v1826_v45 = vld [vmem:[%s2581_s3 + $0x40] sm:$0xff] }
 0x303   : > { %v609_v4 = vpack.c.bf16 %v608_v1, %v608_v1  ;;  %v1820_v1 = vld [vmem:[%s2580_s2 + $0x48] sm:$0xff]  ;;  %v1828_v47 = vld [vmem:[%s2581_s3 + $0x50] sm:$0xff]  ;;  %v1145_v48 = vpack.c.bf16 %v1827_v46, %v1826_v45 }
 0x305   : > { %1960 = vmatmul.mubr.msk.bf16.vlgmr.msra.gmra.mrb[8].mxu0 %vm550_vm2, %v609_v4 }
 0x306   : > { %1972 = vmatpush3.bf16.msra.mxu0 %v721_v2  ;;  %1975 = vmatprep.mubr.msk.bf16.mxu0 %vm2132_vm0, %v2131_v3  ;;  %v1090_v2 = vpack.c.bf16 %v1820_v1, %v1819_v0  ;;  %v1831_v1 = vld [vmem:[%s2584_s6 + $0x2] ss:$0 sm:$0xff] }
 0x307   : > { %1973 = vmatprep.subr.bf16.mxu0 %v2131_v3 }
 0x30a   : > { %1974 = vmatpush3.bf16.msra.mxu0 %v722_v7  ;;  %v1091_v7 = vpack.c.bf16 %v1822_v6, %v1821_v5 }
 0x30b   : > { %1987 = vmatprep.subr.bf16.mxu0 %v2131_v3 }
 0x30d   : > { %1976 = vmatmul.mubr.msk.bf16.vlgmr.msra.gmra.mrb[12].mxu0 %vm398_vm1, %v2245_v14 }
 0x30e   : > { %1989 = vmatprep.mubr.msk.bf16.mxu0 %vm2132_vm0, %v2131_v3 }
 0x3d8   : > { %v2332_v12 = vpop.f32.mrb[8].mxu0 }
 0x3d9   : > { %v1961_v15 = vpop.f32.mrb[9].mxu0  ;;  %v658_v4 = vpack.c.bf16 %v2332_v12, %v2332_v12 }
 0x3da   : > { %v655_v16 = vpop.f32.mrb[10].mxu0 }
 0x3db   : > { %v1962_v17 = vpop.f32.mrb[11].mxu0  ;;  %v1814_v16 = vld [vmem:[%s2579_s1 + $0x50] sm:$0xff] }
 0x3dc   : > { %v1815_v17 = vld [vmem:[%s2579_s1 + $0x58] sm:$0xff] }
 0x3e0   : > { %v765_v19 = vpop.f32.mrb[12].mxu0 }
 0x3e1   : > { %v766_v20 = vadd.f32 %v1798_v18, %v765_v19  ;;  %v1977_v21 = vpop.f32.mrb[13].mxu0 }
 0x3e2   : > { %v768_v22 = vpop.f32.mrb[14].mxu0 }
 0x3e3   : > { %v827_v24 = vpack.c.bf16 %v766_v20, %v766_v20  ;;  %v1978_v25 = vpop.f32.mrb[15].mxu0  ;;  %v1036_v20 = vpack.c.bf16 %v1815_v17, %v1814_v16  ;;  %v1837_v16 = vld [vmem:[%s2579_s1 + $0x60] sm:$0xff]  ;;  %v1838_v17 = vld [vmem:[%s2579_s1 + $0x68] sm:$0xff] }
 0x3e4   : > { %v1824_v25 = vld [vmem:[%s2583_s5 + $0x2] ss:$0 sm:$0xff] }
 0x3e5   : > { %v832_v26 = vsel %vm550_vm2, %v827_v24, 0 }
 0x3e6   : > { %1988 = vmatpush3.bf16.xpose.msra.mxu0 %v832_v26 }
 0x3e7   : > { %1999 = vmatprep.subr.bf16.mxu0 %v2131_v3 }
 0x3ed   : > { %1990 = vmatmul.mubr.msk.bf16.vlgmr.msra.gmra.mrb[16].mxu0 %vm550_vm2, %v826_v28 }
 0x3ee   : > { %2001 = vmatprep.mubr.msk.bf16.mxu0 %vm2132_vm0, %v2131_v3  ;;  %2000 = vmatpush3.bf16.msra.mxu0 %v942_v56 }
 0x3ef   : > { %2011 = vmatprep.subr.bf16.mxu0 %v2131_v3 }
 0x4c0   : > { %v868_v35 = vpop.f32.mrb[16].mxu0 }
 0x4c1   : > { %v874_v36 = vmul.f32 0.35355338, %v868_v35  ;;  %v1991_v37 = vpop.f32.mrb[17].mxu0 }
 0x4c2   : > { %v871_v38 = vpop.f32.mrb[18].mxu0 }
 0x4c3   : > { %v1992_v39 = vpop.f32.mrb[19].mxu0  ;;  %v875_v40 = vsel %vm550_vm2, %v874_v36, -inf  ;;  %v1817_v38 = vld [vmem:[%s2582_s4 + $0x2] ss:$0 sm:$0xff] }
 0x4c4   : > { %876 = vmax.xlane.f32.xlu1 %v875_v40 }
 0x551   : > { %v877_v49 = vpop.xlane.xlu1 %876 }
 0x552   : > { %v878_v50 = vsub.f32 %v874_v36, %v877_v49  ;;  %v1829_v49 = vld [vmem:[%s2581_s3 + $0x58] sm:$0xff] }
 0x554   : > { %v879_v51 = vmul.f32 1.442695, %v878_v50  ;;  %v1146_v50 = vpack.c.bf16 %v1829_v49, %v1828_v47 }
 0x556   : > { %2109 = vpow2.f32 %v879_v51 }
 0x560   : > { %v2110_v52 = vpop.eup %2109 }
 0x561   : > { %v881_v53 = vsel %vm550_vm2, %v2110_v52, 0.0 }
 0x562   : > { %882 = vadd.xlane.f32.xlu1 %v881_v53 }
 0x5ef   : > { %v883_v57 = vpop.xlane.xlu1 %882 }
 0x5f0   : > { %2111 = vrcp.f32 %v883_v57 }
 0x5fa   : > { %v2112_v60 = vpop.eup %2111 }
 0x5fb   : > { %v885_v61 = vmul.f32 %v2112_v60, %v2110_v52 }
 0x5fd   : > { %v886_v62 = vpack.c.bf16 %v885_v61, %v885_v61 }
 0x5ff   : > { %1996 = vmatmul.mubr.msk.bf16.vlgmr.msra.gmra.mrb[16].mxu1 %vm550_vm2, %v886_v62 }
 0x600   : > { %2006 = vmatpush3.bf16.msra.mxu1 %v988_v63  ;;  %2007 = vmatprep.mubr.msk.bf16.mxu1 %vm2132_vm0, %v2131_v3 }
 0x601   : > { %2019 = vmatprep.subr.bf16.mxu1 %v2131_v3 }
 0x607   : > { %2008 = vmatmul.mubr.msk.bf16.vlgmr.msra.gmra.mrb[20].mxu1 %vm550_vm2, %v658_v4 }
 0x608   : > { %2020 = vmatpush3.bf16.msra.mxu1 %v1090_v2  ;;  %2023 = vmatprep.mubr.msk.bf16.mxu1 %vm2132_vm0, %v2131_v3 }
 0x609   : > { %2021 = vmatprep.subr.bf16.mxu1 %v2131_v3 }
 0x60c   : > { %2022 = vmatpush3.bf16.msra.mxu1 %v1091_v7  ;;  %v1835_v7 = vld [vmem:[%s2585_s7 + $0x10] sm:$0xff] }
 0x60d   : > { %2035 = vmatprep.subr.bf16.mxu1 %v2131_v3  ;;  %v1306_v8 = vpack.c.bf16 %v1835_v7, %v1835_v7 }
 0x60f   : > { %2024 = vmatmul.mubr.msk.bf16.vlgmr.msra.gmra.mrb[24].mxu1 %vm398_vm1, %v2245_v14  ;;  %v1311_v9 = vsel %vm614_vm3, %v1306_v8, 0 }
 0x610   : > { %2037 = vmatprep.mubr.msk.bf16.mxu1 %vm2132_vm0, %v2131_v3 }
 0x6d2   : > { %v928_v10 = vpop.f32.mrb[16].mxu1 }
 0x6d3   : > { %v934_v12 = vpack.c.bf16 %v928_v10, %v928_v10  ;;  %v1997_v15 = vpop.f32.mrb[17].mxu1 }
 0x6d4   : > { %v931_v18 = vpop.f32.mrb[18].mxu1 }
 0x6d5   : > { %v1998_v19 = vpop.f32.mrb[19].mxu1  ;;  %2002 = vmatmul.mubr.msk.bf16.vlgmr.msra.gmra.mrb[20].mxu0 %vm550_vm2, %v934_v12  ;;  %v1359_v18 = vpack.c.bf16 %v1838_v17, %v1837_v16 }
 0x6d6   : > { %2012 = vmatpush3.bf16.msra.mxu0 %v1035_v11  ;;  %2015 = vmatprep.mubr.msk.bf16.mxu0 %vm2132_vm0, %v2131_v3  ;;  %v1839_v19 = vld [vmem:[%s2579_s1 + $0x70] sm:$0xff] }
 0x6d7   : > { %2013 = vmatprep.subr.bf16.mxu0 %v2131_v3 }
 0x6da   : > { %v1024_v21 = vpop.f32.mrb[20].mxu1  ;;  %2014 = vmatpush3.bf16.msra.mxu0 %v1036_v20  ;;  %v1840_v20 = vld [vmem:[%s2579_s1 + $0x78] sm:$0xff] }
 0x6db   : > { %v2009_v22 = vpop.f32.mrb[21].mxu1  ;;  %2027 = vmatprep.subr.bf16.mxu0 %v2131_v3 }
 0x6dc   : > { %v1027_v23 = vpop.f32.mrb[22].mxu1  ;;  %v1844_v22 = vld [vmem:[%s2580_s2 + $0x60] sm:$0xff] }
 0x6dd   : > { %v2010_v24 = vpop.f32.mrb[23].mxu1  ;;  %2016 = vmatmul.mubr.msk.bf16.vlgmr.msra.gmra.mrb[24].mxu0 %vm398_vm1, %v2245_v14  ;;  %v1845_v23 = vld [vmem:[%s2580_s2 + $0x68] sm:$0xff] }
 0x6de   : > { %2031 = vmatprep.mubr.msk.bf16.mxu0 %vm2132_vm0, %v2131_v3  ;;  %2028 = vmatpush3.bf16.msra.mxu0 %v1145_v48  ;;  %v1842_v48 = vld [vmem:[%s2582_s4 + $0x3] ss:$0 sm:$0xff] }
 0x6df   : > { %2029 = vmatprep.subr.bf16.mxu0 %v2131_v3 }
 0x6e2   : > { %v1134_v26 = vpop.f32.mrb[24].mxu1  ;;  %2030 = vmatpush3.bf16.msra.mxu0 %v1146_v50 }
 0x6e3   : > { %v1135_v27 = vadd.f32 %v1824_v25, %v1134_v26  ;;  %v2025_v28 = vpop.f32.mrb[25].mxu1  ;;  %2041 = vmatprep.subr.bf16.mxu0 %v2131_v3  ;;  %v1414_v25 = vpack.c.bf16 %v1845_v23, %v1844_v22 }
 0x6e4   : > { %v1137_v29 = vpop.f32.mrb[26].mxu1  ;;  %v1846_v28 = vld [vmem:[%s2580_s2 + $0x70] sm:$0xff] }
 0x6e5   : > { %v1196_v30 = vpack.c.bf16 %v1135_v27, %v1135_v27  ;;  %v2026_v31 = vpop.f32.mrb[27].mxu1  ;;  %2032 = vmatmul.mubr.msk.bf16.vlgmr.msra.gmra.mrb[28].mxu0 %vm398_vm1, %v2245_v14  ;;  %v1847_v29 = vld [vmem:[%s2580_s2 + $0x78] sm:$0xff] }
 0x6e6   : > { %2043 = vmatprep.mubr.msk.bf16.mxu0 %vm2132_vm0, %v2131_v3 }
 0x6e7   : > { %v1201_v32 = vsel %vm550_vm2, %v1196_v30, 0 }
 0x6e8   : > { %2036 = vmatpush3.bf16.xpose.msra.mxu1 %v1201_v32  ;;  %v1415_v32 = vpack.c.bf16 %v1847_v29, %v1846_v28  ;;  %v1862_v28 = vld [vmem:[%s2586_s8] ss:$0 sm:$0xff] }
 0x6e9   : > { %2047 = vmatprep.subr.bf16.mxu1 %v2131_v3 }
 0x7a8   : > { %v978_v33 = vpop.f32.mrb[20].mxu0 }
 0x7a9   : > { %v2432_v34 = vadd.f32 %v1024_v21, %v978_v33  ;;  %v2003_v35 = vpop.f32.mrb[21].mxu0  ;;  %v1360_v21 = vpack.c.bf16 %v1840_v20, %v1839_v19 }
 0x7aa   : > { %v981_v36 = vpop.f32.mrb[22].mxu0 }
 0x7ab   : > { %v2004_v37 = vpop.f32.mrb[23].mxu0 }
 0x7b0   : > { %v1079_v39 = vpop.f32.mrb[24].mxu0 }
 0x7b1   : > { %v1080_v40 = vadd.f32 %v1817_v38, %v1079_v39  ;;  %v2017_v41 = vpop.f32.mrb[25].mxu0 }
 0x7b2   : > { %v1082_v42 = vpop.f32.mrb[26].mxu0 }
 0x7b3   : > { %v1195_v43 = vpack.c.bf16 %v1080_v40, %v1080_v40  ;;  %v2018_v44 = vpop.f32.mrb[27].mxu0 }
 0x7b5   : > { %2038 = vmatmul.mubr.msk.bf16.vlgmr.msra.gmra.mrb[28].mxu1 %vm550_vm2, %v1195_v43  ;;  %v1849_v43 = vld [vmem:[%s2583_s5 + $0x3] ss:$0 sm:$0xff] }
 0x7b6   : > { %2049 = vmatprep.mubr.msk.bf16.mxu1 %vm2132_vm0, %v2131_v3  ;;  %2048 = vmatpush3.bf16.msra.mxu1 %v1311_v9 }
 0x7b7   : > { %2061 = vmatprep.subr.bf16.mxu1 %v2131_v3 }
 0x7b8   : > { %v1189_v62 = vpop.f32.mrb[28].mxu0 }
 0x7b9   : > { %v2033_v63 = vpop.f32.mrb[29].mxu0  ;;  %v1190_v4 = vadd.f32 %v1831_v1, %v1189_v62 }
 0x7ba   : > { %v1192_v0 = vpop.f32.mrb[30].mxu0 }
 0x7bb   : > { %v2034_v2 = vpop.f32.mrb[31].mxu0  ;;  %v1256_v5 = vpack.c.bf16 %v1190_v4, %v1190_v4 }
 0x7bd   : > { %v1261_v6 = vsel %vm614_vm3, %v1256_v5, 0 }
 0x7be   : > { %2042 = vmatpush3.bf16.msra.mxu0 %v1261_v6 }
 0x7bf   : > { %2053 = vmatprep.subr.bf16.mxu0 %v2131_v3 }
 0x888   : > { %v1237_v51 = vpop.f32.mrb[28].mxu1 }
 0x889   : > { %v1243_v52 = vmul.f32 0.35355338, %v1237_v51  ;;  %v2039_v53 = vpop.f32.mrb[29].mxu1 }
 0x88a   : > { %v1240_v54 = vpop.f32.mrb[30].mxu1  ;;  %v1851_v53 = vld [vmem:[%s2581_s3 + $0x60] sm:$0xff] }
 0x88b   : > { %v2040_v55 = vpop.f32.mrb[31].mxu1  ;;  %v1244_v56 = vsel %vm550_vm2, %v1243_v52, -inf  ;;  %v1852_v54 = vld [vmem:[%s2581_s3 + $0x68] sm:$0xff] }
 0x88c   : > { %1245 = vmax.xlane.f32.xlu0 %v1244_v56  ;;  %v1853_v55 = vld [vmem:[%s2581_s3 + $0x70] sm:$0xff]  ;;  %v1469_v56 = vpack.c.bf16 %v1852_v54, %v1851_v53 }
 0x919   : > { %v1246_v57 = vpop.xlane.xlu0 %1245 }
 0x91a   : > { %v1247_v58 = vsub.f32 %v1243_v52, %v1246_v57  ;;  %v1854_v57 = vld [vmem:[%s2581_s3 + $0x78] sm:$0xff] }
 0x91c   : > { %v1248_v59 = vmul.f32 1.442695, %v1247_v58  ;;  %v1470_v58 = vpack.c.bf16 %v1854_v57, %v1853_v55 }
 0x91e   : > { %2113 = vpow2.f32 %v1248_v59 }
 0x928   : > { %v2114_v60 = vpop.eup %2113 }
 0x929   : > { %v1250_v61 = vsel %vm550_vm2, %v2114_v60, 0.0 }
 0x92a   : > { %1251 = vadd.xlane.f32.xlu1 %v1250_v61 }
 0x9b7   : > { %v1252_v10 = vpop.xlane.xlu1 %1251 }
 0x9b8   : > { %2115 = vrcp.f32 %v1252_v10 }
 0x9c2   : > { %v2116_v11 = vpop.eup %2115 }
 0x9c3   : > { %v1254_v12 = vmul.f32 %v2116_v11, %v2114_v60 }
 0x9c5   : > { %v1255_v15 = vpack.c.bf16 %v1254_v12, %v1254_v12 }
 0x9c7   : > { %2044 = vmatmul.mubr.msk.bf16.vlgmr.msra.gmra.mrb[32].mxu0 %vm550_vm2, %v1255_v15  ;;  %v1860_v15 = vld [vmem:[%s2585_s7 + $0x18] sm:$0xff] }
 0x9c8   : > { %2057 = vmatprep.mubr.msk.bf16.mxu0 %vm2132_vm0, %v2131_v3  ;;  %2054 = vmatpush3.bf16.msra.mxu0 %v1359_v18  ;;  %v1630_v16 = vpack.c.bf16 %v1860_v15, %v1860_v15 }
 0x9c9   : > { %2055 = vmatprep.subr.bf16.mxu0 %v2131_v3 }
 0x9ca   : > { %v1635_v17 = vsel %vm614_vm3, %v1630_v16, 0 }
 0x9cc   : > { %2056 = vmatpush3.bf16.msra.mxu0 %v1360_v21 }
 0x9cd   : > { %2069 = vmatprep.subr.bf16.mxu0 %v2131_v3 }
 0x9cf   : > { %2058 = vmatmul.mubr.msk.bf16.vlgmr.msra.gmra.mrb[36].mxu0 %vm398_vm1, %v2245_v14 }
 0x9d0   : > { %2073 = vmatprep.mubr.msk.bf16.mxu0 %vm2132_vm0, %v2131_v3  ;;  %2070 = vmatpush3.bf16.msra.mxu0 %v1469_v56 }
 0x9d1   : > { %2071 = vmatprep.subr.bf16.mxu0 %v2131_v3 }
 0x9d4   : > { %2072 = vmatpush3.bf16.msra.mxu0 %v1470_v58 }
 0x9d5   : > { %2083 = vmatprep.subr.bf16.mxu0 %v2131_v3 }
 0x9d7   : > { %2074 = vmatmul.mubr.msk.bf16.vlgmr.msra.gmra.mrb[40].mxu0 %vm398_vm1, %v2245_v14 }
 0x9d8   : > { %2085 = vmatprep.mubr.msk.bf16.mxu0 %vm2132_vm0, %v2131_v3 }
 0xa9a   : > { %v1297_v24 = vpop.f32.mrb[32].mxu0 }
 0xa9b   : > { %v1303_v26 = vpack.c.bf16 %v1297_v24, %v1297_v24  ;;  %v2045_v27 = vpop.f32.mrb[33].mxu0 }
 0xa9c   : > { %v1300_v30 = vpop.f32.mrb[34].mxu0 }
 0xa9d   : > { %v2046_v31 = vpop.f32.mrb[35].mxu0  ;;  %2050 = vmatmul.mubr.msk.bf16.vlgmr.msra.gmra.mrb[32].mxu1 %vm550_vm2, %v1303_v26 }
 0xa9e   : > { %2062 = vmatpush3.bf16.msra.mxu1 %v1414_v25  ;;  %2065 = vmatprep.mubr.msk.bf16.mxu1 %vm2132_vm0, %v2131_v3 }
 0xa9f   : > { %2063 = vmatprep.subr.bf16.mxu1 %v2131_v3 }
 0xaa2   : > { %2064 = vmatpush3.bf16.msra.mxu1 %v1415_v32  ;;  %v1403_v33 = vpop.f32.mrb[36].mxu0 }
 0xaa3   : > { %2077 = vmatprep.subr.bf16.mxu1 %v2131_v3  ;;  %v2059_v35 = vpop.f32.mrb[37].mxu0  ;;  %v1404_v51 = vadd.f32 %v1842_v48, %v1403_v33 }
 0xaa4   : > { %v1406_v36 = vpop.f32.mrb[38].mxu0 }
 0xaa5   : > { %2066 = vmatmul.mubr.msk.bf16.vlgmr.msra.gmra.mrb[36].mxu1 %vm398_vm1, %v2245_v14  ;;  %v2060_v37 = vpop.f32.mrb[39].mxu0  ;;  %v1519_v52 = vpack.c.bf16 %v1404_v51, %v1404_v51 }
 0xaa6   : > { %2079 = vmatprep.mubr.msk.bf16.mxu1 %vm2132_vm0, %v2131_v3 }
 0xaaa   : > { %v1513_v14 = vpop.f32.mrb[40].mxu0 }
 0xaab   : > { %v2075_v7 = vpop.f32.mrb[41].mxu0 }
 0xaac   : > { %v1516_v8 = vpop.f32.mrb[42].mxu0 }
 0xaad   : > { %v2076_v9 = vpop.f32.mrb[43].mxu0 }
 0xb70   : > { %v1347_v38 = vpop.f32.mrb[32].mxu1 }
 0xb71   : > { %v2513_v39 = vadd.f32 %v1347_v38, %v2432_v34  ;;  %v2051_v40 = vpop.f32.mrb[33].mxu1 }
 0xb72   : > { %v1350_v41 = vpop.f32.mrb[34].mxu1 }
 0xb73   : > { %v2052_v42 = vpop.f32.mrb[35].mxu1 }
 0xb78   : > { %v1458_v44 = vpop.f32.mrb[36].mxu1 }
 0xb79   : > { %v1459_v45 = vadd.f32 %v1849_v43, %v1458_v44  ;;  %v2067_v46 = vpop.f32.mrb[37].mxu1 }
 0xb7a   : > { %v1461_v47 = vpop.f32.mrb[38].mxu1 }
 0xb7b   : > { %v1520_v49 = vpack.c.bf16 %v1459_v45, %v1459_v45  ;;  %v2068_v50 = vpop.f32.mrb[39].mxu1  ;;  %v1864_v47 = vld [vmem:[%s2588_s10] ss:$0 sm:$0xff] }
 0xb7d   : > { %v1525_v34 = vsel %vm550_vm2, %v1520_v49, 0 }
 0xb7e   : > { %2078 = vmatpush3.bf16.xpose.msra.mxu1 %v1525_v34 }
 0xb7f   : > { %2089 = vmatprep.subr.bf16.mxu1 %v2131_v3 }
 0xb85   : > { %2080 = vmatmul.mubr.msk.bf16.vlgmr.msra.gmra.mrb[40].mxu1 %vm550_vm2, %v1519_v52 }
 0xb86   : > { %2091 = vmatprep.mubr.msk.bf16.mxu1 %vm2132_vm0, %v2131_v3  ;;  %v1856_v3 = vld [vmem:[%s2584_s6 + $0x3] ss:$0 sm:$0xff]  ;;  %2090 = vmatpush3.bf16.msra.mxu1 %v1635_v17 }
 0xb87   : > { %v1514_v10 = vadd.f32 %v1856_v3, %v1513_v14 }
 0xb89   : > { %v1580_v11 = vpack.c.bf16 %v1514_v10, %v1514_v10 }
 0xb8b   : > { %v1585_v12 = vsel %vm614_vm3, %v1580_v11, 0 }
 0xb8c   : > { %2084 = vmatpush3.bf16.msra.mxu0 %v1585_v12 }
 0xc58   : > { %v1561_v59 = vpop.f32.mrb[40].mxu1 }
 0xc59   : > { %v1567_v60 = vmul.f32 0.35355338, %v1561_v59  ;;  %v2081_v61 = vpop.f32.mrb[41].mxu1 }
 0xc5a   : > { %v1564_v62 = vpop.f32.mrb[42].mxu1 }
 0xc5b   : > { %v2082_v63 = vpop.f32.mrb[43].mxu1  ;;  %v1568_v0 = vsel %vm550_vm2, %v1567_v60, -inf }
 0xc5c   : > { %1569 = vmax.xlane.f32.xlu0 %v1568_v0 }
 0xce9   : > { %v1570_v1 = vpop.xlane.xlu0 %1569 }
 0xcea   : > { %v1571_v2 = vsub.f32 %v1567_v60, %v1570_v1 }
 0xcec   : > { %v1572_v4 = vmul.f32 1.442695, %v1571_v2 }
 0xcee   : > { %2117 = vpow2.f32 %v1572_v4 }
 0xcf8   : > { %v2118_v5 = vpop.eup %2117 }
 0xcf9   : > { %v1574_v6 = vsel %vm550_vm2, %v2118_v5, 0.0 }
 0xcfa   : > { %1575 = vadd.xlane.f32.xlu1 %v1574_v6 }
 0xd87   : > { %v1576_v18 = vpop.xlane.xlu1 %1575 }
 0xd88   : > { %2119 = vrcp.f32 %v1576_v18 }
 0xd92   : > { %v2120_v19 = vpop.eup %2119 }
 0xd93   : > { %v1578_v20 = vmul.f32 %v2120_v19, %v2118_v5 }
 0xd95   : > { %v1579_v21 = vpack.c.bf16 %v1578_v20, %v1578_v20 }
 0xd97   : > { %2086 = vmatmul.mubr.msk.bf16.vlgmr.msra.gmra.mrb[44].mxu0 %vm550_vm2, %v1579_v21 }
 0xe6a   : > { %v1621_v22 = vpop.f32.mrb[44].mxu0 }
 0xe6b   : > { %v1627_v23 = vpack.c.bf16 %v1621_v22, %v1621_v22  ;;  %v2087_v24 = vpop.f32.mrb[45].mxu0 }
 0xe6c   : > { %v1624_v25 = vpop.f32.mrb[46].mxu0 }
 0xe6d   : > { %v2088_v26 = vpop.f32.mrb[47].mxu0  ;;  %2092 = vmatmul.mubr.msk.bf16.vlgmr.msra.gmra.mrb[44].mxu1 %vm550_vm2, %v1627_v23 }
 0xf40   : > { %v1671_v27 = vpop.f32.mrb[44].mxu1 }
 0xf41   : > { %v1677_v29 = vadd.f32 %v1671_v27, %v2513_v39  ;;  %v2093_v30 = vpop.f32.mrb[45].mxu1 }
 0xf42   : > { %v1674_v31 = vpop.f32.mrb[46].mxu1 }
 0xf43   : > { %v1685_v32 = vadd.f32 %v1862_v28, %v1677_v29  ;;  %v2094_v33 = vpop.f32.mrb[47].mxu1 }
 0xf45   : > { %v1686_v35 = vadd.f32 %v1685_v32, %v2241_v13  ;;  %v1863_v13 = vld [vmem:[%s2587_s9] ss:$0 sm:$0xff] }
 0xf47   : > { %v1689_v36 = vsel %vm398_vm1, %v1686_v35, 0.0 }
 0xf48   : > { %1690 = vadd.xlane.f32.xlu0 %v1689_v36 }
 0xfd5   : > { %v1691_v37 = vpop.xlane.xlu0 %1690 }
 0xfd6   : > { %v1693_v38 = vmul.f32 0.03125, %v1691_v37 }
 0xfd8   : > { %v1694_v40 = vsub.f32 %v1686_v35, %v1693_v38 }
 0xfda   : > { %v1695_v41 = vmul.f32 %v1694_v40, %v1694_v40 }
 0xfdc   : > { %v1696_v42 = vsel %vm398_vm1, %v1695_v41, 0.0 }
 0xfdd   : > { %1697 = vadd.xlane.f32.xlu1 %v1696_v42 }
0x106a   : > { %v1698_v43 = vpop.xlane.xlu1 %1697 }
0x106b   : > { %v1699_v44 = vmul.f32 0.03125, %v1698_v43 }
0x106d   : > { %v1700_v39 = vadd.f32 1e-06, %v1699_v44 }
0x106f   : > { %2121 = vrsqrt.f32 %v1700_v39 }
0x1079   : > { %v2122_v45 = vpop.eup %2121 }
0x107a   : > { %v1702_v46 = vmul.f32 %v2122_v45, %v1694_v40 }
0x107c   : > { %v1709_v48 = vmul.f32 %v1863_v13, %v1702_v46 }
0x107e   : > { %v1716_v49 = vadd.f32 %v1864_v47, %v1709_v48 }
0x1080   : > { %1717 = vst.msk [vmem:[%s381_s30] sm:$0xff] %vm398_vm1, %v1716_v49 }
0x1081 PF: > { %s21_s17 = sadd.s32 1, %s2129_s17  }
0x1082   : > { %p18_p4 = scmp.ge.s32.totalorder %s21_s17, 4  }
0x1084   :  { %20 = sbr.rel (!%p18_p4) target bundleno = 1 (0x1), region = 115 }

// kernel: transformer_forward.25
= control target key start
LH: loop header
LB: loop body
LE: loop exit
PB: predicated region body
PF: predicated region fallthrough
CT: control target
= control target key end

     0   :  { %7 = vsyncpa [#allocation4], 0  ;;  %s680_s0 = inlined_call_operand.vmem [shape: f32[16,32], index: 0, kind: input, shape index: {}]   ;;  %s681_s1 = inlined_call_operand.vmem [shape: f32[32,128], index: 1, kind: input, shape index: {}]   ;;  %s682_s2 = inlined_call_operand.hbm [shape: f32[16,128], index: 2, kind: output, shape index: {}]  }
   0x1   :  { %9 = vsyncpa [#allocation4 + $0x1], 0  ;;  %s556_s9 = smov 0   ;;  %s558_s10 = smov 0  }
   0x2   :  { %s560_s11 = smov 0   ;;  %s562_s12 = smov 0  }
   0x3   :  { %s564_s13 = smov 0   ;;  %s566_s14 = smov 0  }
   0x4 LB: > { %s377_s15 = sadd.s32 4294967295, %s536_s14   ;;  %s378_s16 = sadd.s32 4294967294, %s536_s14   ;;  %s536_s14 = sphi %s566_s14, %s15_s14   ;;  %s532_s13 = sphi %s564_s13, %s689_s13   ;;  %s528_s12 = sphi %s562_s12, %s688_s12   ;;  %s524_s11 = sphi %s560_s11, %s687_s11   ;;  %s520_s10 = sphi %s558_s10, %s686_s10   ;;  %s516_s9 = sphi %s556_s9, %s685_s9  }
   0x5   : > { %s34_s17 = sadd.s32 1, %s532_s13  ;;  %s99_s18 = sadd.s32 1, %s524_s11 }
   0x6   : > { %p36_p0 = scmp.ge.s32.totalorder %s34_s17, 2  ;;  %p109_p1 = scmp.ne.s32.totalorder %s524_s11, %s520_s10 }
   0x7   : > { %p110_p2 = scmp.eq.s32.totalorder %s377_s15, 1  ;;  %p115_p3 = scmp.ne.s32.totalorder %s520_s10, %s516_s9 }
   0x8   : > { %s691_s17 = smov (%p36_p0, %s34_s17), 0  ;;  %p116_p5 = scmp.eq.s32.totalorder %s378_s16, 1 }
   0x9   : > { %p596_p4 = por %p110_p2, %p109_p1  ;;  %s94_s20 = ssub.s32 %s532_s13, %s691_s17 }
   0xa   : > { %p382_p6 = scmp.ge.s32.totalorder %s536_s14, 1  ;;  %p97_p7 = scmp.eq.s32.totalorder %s94_s20, 0 }
   0xb   : > { %p603_p8 = por %p116_p5, %p115_p3  ;;  %p156_p9 = scmp.lt.s32.totalorder %s536_s14, 3 }
   0xc   : > { %s609_s22 = scalar_select %p97_p7, %s524_s11, %s99_s18  }
   0xd   : > { %p157_p10 = pnand %p382_p6, %p156_p9 }
   0xe   : > { %v213_v0 = vld [vmem:[%s681_s1] sm:$0xff] (!%p157_p10)  ;;  %v214_v1 = vld [vmem:[%s681_s1 + $0x8] sm:$0xff] (!%p157_p10)  ;;  %v215_v2 = vld [vmem:[%s681_s1 + $0x10] sm:$0xff] (!%p157_p10)  ;;  %p188_p11 = scmp.lt.s32.totalorder (!%p157_p10), %s528_s12, 1  ;;  %v538_v3 = vmov (!%p157_p10), 0.0   ;;  %vm539_vm0 = vmmov (!%p157_p10), 0  }
   0xf   : > { %160 = sbr.rel (%p157_p10) target bundleno = 256 (0x100), region = 28  ;;  %393 = vmatprep.subr.bf16.mxu0 (!%p157_p10), %v538_v3  ;;  %v217_v4 = vpack.c.bf16 (!%p157_p10), %v214_v1, %v213_v0  ;;  %v216_v5 = vld [vmem:[%s681_s1 + $0x18] sm:$0xff] (!%p157_p10)  ;;  %397 = vmatprep.mubr.msk.bf16.mxu0 (!%p157_p10), %vm539_vm0, %v538_v3  ;;  %vm219_vm1 = vcmask (!%p157_p10), 261120   ;;  %s185_s8 = sand.u32 (!%p157_p10), 1, %s520_s10  }
  0x10   : > { %v218_v6 = vpack.c.bf16 (!%p157_p10), %v216_v5, %v215_v2  ;;  %s383_s15 = sshll.u32 (!%p157_p10), %s185_s8, 3  ;;  %s387_s20 = sshll.u32 (!%p157_p10), %s528_s12, 7 }
  0x11   : > { %394 = vmatpush3.bf16.msra.mxu0 (!%p157_p10), %v217_v4  ;;  %s187_s16 = scalar_lea.vmem (!%p157_p10), [#allocation3], %s383_s15  ;;  %s635_s25 = scalar_lea.hbm (!%p157_p10), %s682_s2, %s387_s20 }
  0x12   : > { %395 = vmatprep.subr.bf16.mxu0 (!%p157_p10), %v538_v3  ;;  %s285_s18 = sshll.u32 (!%p157_p10), %s187_s16, 4  ;;  %s271_s26 = scalar_lea.sflag (!%p157_p10), [#allocation4], %s185_s8  ;;  %s630_s18 = int_to_ptr.vmem [resolvable:$true] %s285_s18 }
  0x13   : > { %s458_s27 = scalar_lea.vmem (!%p157_p10), %s630_s18, 128 }
  0x14   : > { %p459_p12 = scmp.ne.s32.totalorder (!%p157_p10), %s630_s18, %s458_s27 }
  0x15   : > { %396 = vmatpush3.bf16.msra.mxu0 (!%p157_p10), %v218_v6 }
  0x16   : > { %s189_s3 = scalar_select %p188_p11, %s528_s12, 1 }
  0x17   : > { %p460_p13 = pnand %p459_p12, %p596_p4  ;;  %s540_s12 = smov [#allocation3]  }
  0x18   : > { %s384_s4 = sshll.u32 %s189_s3, 3  ;;  %s462_s28 = sshll.u32 %s540_s12, 4  ;;  %s463_s28 = int_to_ptr.vmem [resolvable:$false] %s462_s28 }
  0x19   : > { %s194_s7 = scalar_lea.vmem %s680_s0, %s384_s4  ;;  %p461_p0 = pneg %p460_p13 }
  0x1a   : > { %v211_v7 = vld [vmem:[%s194_s7] sm:$0xff]  ;;  %s464_s29 = scalar_lea.vmem %s463_s28, 256  ;;  %p465_p1 = scmp.lt.s32.totalorder %s630_s18, %s463_s28 }
  0x1b   : > { %v212_v8 = vpack.c.bf16 %v211_v7, %v211_v7  ;;  %p466_p2 = scmp.lt.s32.totalorder %s464_s29, %s458_s27 }
  0x1d   : > { %398 = vmatmul.mubr.msk.bf16.vlgmr.msra.gmra.mrb[0].mxu0 %vm219_vm1, %v212_v8  ;;  %p467_p3 = por %p466_p2, %p465_p1 }
  0x1f   : > { %p468_p5 = pnand %p467_p3, %p461_p0 }
  0xf0   : > { %v257_v9 = vpop.f32.mrb[0].mxu0 }
  0xf1   : > { %269 = vst [vmem:[%s187_s16] sm:$0xff] %v257_v9  ;;  %v399_v10 = vpop.f32.mrb[1].mxu0 }
  0xf2   : > { %v260_v11 = vpop.f32.mrb[2].mxu0 }
  0xf3   : > { %471 = shalt.err (!%p468_p5)
}
  0xf4   : > { %s472_s30 = scalar_lea.hbm %s635_s25, 128  ;;  %s476_s5 = scalar_lea.hbm %s682_s2, 256 }
  0xf5   : > { %p473_p6 = scmp.ne.s32.totalorder %s635_s25, %s472_s30  ;;  %p477_p10 = scmp.lt.u32.totalorder %s635_s25, %s682_s2 }
  0xf6   : > { %p478_p11 = scmp.lt.u32.totalorder %s476_s5, %s472_s30  ;;  %p480_p13 = scmp.lt.u32.totalorder %s472_s30, %s635_s25 }
  0xf7   : > { %p474_p7 = pnand %p473_p6, %p596_p4 }
  0xf8   : > { %p479_p12 = por %p478_p11, %p477_p10 }
  0xf9   : > { %p475_p9 = pneg %p474_p7 }
  0xfa   : > { %p481_p0 = por %p480_p13, %p479_p12 }
  0xfc   : > { %p482_p1 = pnand %p481_p0, %p475_p9 }
  0xfe   : > { %485 = shalt.err (!%p482_p1)
}
  0xff   : > { %401 = dma.vmem_to_hbm [thread:$0]  (%p596_p4), %s630_s18, 128, %s635_s25, %s271_s26   ;;  %v400_v12 = vpop.f32.mrb[3].mxu0 }
 0x100 PF: > { %p407_p2 = scmp.ge.s32.totalorder %s536_s14, 2  ;;  %s297_s8 = sand.u32 1, %s516_s9  }
 0x101   : > { %s298_s15 = scalar_lea.sflag [#allocation4], %s297_s8 }
 0x102   : > { %p404_p3 = pnand %p407_p2, %p603_p8 }
 0x104   : > { %511 = dma.done.wait (!%p404_p3), %s298_s15, 128  }
 0x105   : > { %513 = vsyncadd (!%p404_p3), %s298_s15, 4294967168  ;;  %s15_s14 = sadd.s32 1, %s536_s14   ;;  %s685_s9 = smov %s520_s10 }
 0x106   : > { %p12_p5 = scmp.ge.s32.totalorder %s15_s14, 4   ;;  %s686_s10 = smov %s524_s11 }
 0x107   : > { %s687_s11 = smov %s609_s22  ;;  %s688_s12 = smov %s532_s13 }
 0x108   : > { %s689_s13 = smov %s691_s17  ;;  %14 = sbr.rel (!%p12_p5) target bundleno = 4 (0x4), region = 74 }
 0x10f   :  { %303 = vsyncpa [#allocation4], 1 }
 0x110   :  { %305 = vsyncpa [#allocation4 + $0x1], 1 }

// kernel: transformer_forward.20
= control target key start
LH: loop header
LB: loop body
LE: loop exit
PB: predicated region body
PF: predicated region fallthrough
CT: control target
= control target key end

     0   :  { %s2327_s25 = smov 0   ;;  %s2728_s0 = inlined_call_operand.vmem [shape: f32[2,8,32], index: 0, kind: input, shape index: {}]   ;;  %s2729_s1 = inlined_call_operand.vmem [shape: f32[2,8,32], index: 1, kind: input, shape index: {}]   ;;  %s2730_s2 = inlined_call_operand.vmem [shape: f32[4,32,8], index: 2, kind: input, shape index: {}]   ;;  %s2731_s3 = inlined_call_operand.vmem [shape: f32[4,32,8], index: 3, kind: input, shape index: {}]   ;;  %s2732_s4 = inlined_call_operand.vmem [shape: f32[4,32,8], index: 4, kind: input, shape index: {}]   ;;  %s2733_s5 = inlined_call_operand.vmem [shape: f32[4,1,8], index: 5, kind: input, shape index: {}]   ;;  %s2734_s6 = inlined_call_operand.vmem [shape: f32[4,1,8], index: 6, kind: input, shape index: {}]   ;;  %s2735_s7 = inlined_call_operand.vmem [shape: f32[4,1,8], index: 7, kind: input, shape index: {}]   ;;  %s2736_s8 = inlined_call_operand.vmem [shape: f32[4,8,32], index: 8, kind: input, shape index: {}]   ;;  %s2737_s9 = inlined_call_operand.vmem [shape: f32[1,32], index: 9, kind: input, shape index: {}]   ;;  %s2738_s10 = inlined_call_operand.vmem [shape: f32[1,32], index: 10, kind: input, shape index: {}]   ;;  %s2739_s11 = inlined_call_operand.vmem [shape: f32[1,32], index: 11, kind: input, shape index: {}]   ;;  %s2740_s12 = inlined_call_operand.vmem [shape: f32[2,1,8], index: 12, kind: input, shape index: {}]   ;;  %s2741_s13 = inlined_call_operand.vmem [shape: f32[2,8,32], index: 13, kind: output, shape index: {}]  }
   0x1 LB: > { %s1893_s26 = sadd.s32 4294967295, %s2253_s25   ;;  %p1897_p0 = scmp.ge.s32.totalorder %s2253_s25, 1  ;;  %s2253_s25 = sphi %s2327_s25, %s23_s25  }
   0x2   : > { %p403_p1 = scmp.lt.s32.totalorder %s2253_s25, 3 }
   0x4   : > { %p404_p2 = pnand %p1897_p0, %p403_p1 }
   0x5   : > { %v530_v0 = vld [vmem:[%s2731_s3] sm:$0xff] (!%p404_p2)  ;;  %v531_v1 = vld [vmem:[%s2731_s3 + $0x8] sm:$0xff] (!%p404_p2)  ;;  %v532_v2 = vld [vmem:[%s2731_s3 + $0x10] sm:$0xff] (!%p404_p2)  ;;  %p452_p3 = scmp.lt.s32.totalorder (!%p404_p2), %s1893_s26, 1  ;;  %v2255_v3 = vmov (!%p404_p2), 0.0   ;;  %vm2256_vm0 = vmmov (!%p404_p2), 0  }
   0x6   : > { %407 = sbr.rel (%p404_p2) target bundleno = 4233 (0x1089), region = 72  ;;  %2059 = vmatprep.subr.bf16.mxu1 (!%p404_p2), %v2255_v3  ;;  %v534_v4 = vpack.c.bf16 (!%p404_p2), %v531_v1, %v530_v0  ;;  %2051 = vmatprep.subr.bf16.mxu0 (!%p404_p2), %v2255_v3  ;;  %v533_v5 = vld [vmem:[%s2731_s3 + $0x18] sm:$0xff] (!%p404_p2)  ;;  %v473_v6 = vld [vmem:[%s2730_s2] sm:$0xff] (!%p404_p2)  ;;  %v474_v7 = vld [vmem:[%s2730_s2 + $0x8] sm:$0xff] (!%p404_p2)  ;;  %vm486_vm1 = vcmask (!%p404_p2), 261120   ;;  %vm641_vm2 = vcmask (!%p404_p2), 64512  }
   0x7   : > { %v477_v8 = vpack.c.bf16 (!%p404_p2), %v474_v7, %v473_v6  ;;  %2063 = vmatprep.mubr.msk.bf16.mxu1 (!%p404_p2), %vm2256_vm0, %v2255_v3  ;;  %v475_v9 = vld [vmem:[%s2730_s2 + $0x10] sm:$0xff] (!%p404_p2)  ;;  %v476_v10 = vld [vmem:[%s2730_s2 + $0x18] sm:$0xff] (!%p404_p2)  ;;  %2055 = vmatprep.mubr.msk.bf16.mxu0 (!%p404_p2), %vm2256_vm0, %v2255_v3  ;;  %v535_v11 = vpack.c.bf16 (!%p404_p2), %v533_v5, %v532_v2  ;;  %v1903_v17 = vld [vmem:[%s2734_s6] ss:$0 sm:$0xff] (!%p404_p2)  ;;  %vm712_vm3 = vcmask (!%p404_p2), 1043456  }
   0x8   : > { %2060 = vmatpush3.bf16.msra.mxu1 (!%p404_p2), %v534_v4  ;;  %v478_v12 = vpack.c.bf16 (!%p404_p2), %v476_v10, %v475_v9  ;;  %v1901_v23 = vld [vmem:[%s2733_s5] ss:$0 sm:$0xff] (!%p404_p2)  ;;  %v587_v33 = vld [vmem:[%s2732_s4 + $0x8] sm:$0xff] (!%p404_p2)  ;;  %v588_v34 = vld [vmem:[%s2732_s4 + $0x10] sm:$0xff] (!%p404_p2) }
   0x9   : > { %2061 = vmatprep.subr.bf16.mxu1 (!%p404_p2), %v2255_v3  ;;  %2052 = vmatpush3.bf16.msra.mxu0 (!%p404_p2), %v477_v8  ;;  %v586_v32 = vld [vmem:[%s2732_s4] sm:$0xff] (!%p404_p2)  ;;  %v589_v36 = vld [vmem:[%s2732_s4 + $0x18] sm:$0xff] (!%p404_p2)  ;;  %v1911_v60 = vld [vmem:[%s2730_s2 + $0x28] sm:$0xff] (!%p404_p2) }
   0xa   : > { %2053 = vmatprep.subr.bf16.mxu0 (!%p404_p2), %v2255_v3  ;;  %v590_v35 = vpack.c.bf16 (!%p404_p2), %v587_v33, %v586_v32  ;;  %v591_v37 = vpack.c.bf16 (!%p404_p2), %v589_v36, %v588_v34  ;;  %v1905_v54 = vld [vmem:[%s2735_s7] ss:$0 sm:$0xff] (!%p404_p2)  ;;  %v1912_v62 = vld [vmem:[%s2730_s2 + $0x30] sm:$0xff] (!%p404_p2)  ;;  %v1913_v63 = vld [vmem:[%s2730_s2 + $0x38] sm:$0xff] (!%p404_p2) }
   0xb   : > { %v1910_v59 = vld [vmem:[%s2730_s2 + $0x20] sm:$0xff] (!%p404_p2)  ;;  %v765_v0 = vpack.c.bf16 (!%p404_p2), %v1913_v63, %v1912_v62  ;;  %v1918_v4 = vld [vmem:[%s2731_s3 + $0x28] sm:$0xff] (!%p404_p2)  ;;  %v1919_v9 = vld [vmem:[%s2731_s3 + $0x30] sm:$0xff] (!%p404_p2) }
   0xc   : > { %2062 = vmatpush3.bf16.msra.mxu1 (!%p404_p2), %v535_v11  ;;  %v764_v61 = vpack.c.bf16 (!%p404_p2), %v1911_v60, %v1910_v59  ;;  %v1917_v2 = vld [vmem:[%s2731_s3 + $0x20] sm:$0xff] (!%p404_p2)  ;;  %v1920_v10 = vld [vmem:[%s2731_s3 + $0x38] sm:$0xff] (!%p404_p2)  ;;  %v1926_v36 = vld [vmem:[%s2732_s4 + $0x30] sm:$0xff] (!%p404_p2) }
   0xd   : > { %s2743_s26 = smov (!%p452_p3, %s1893_s26), 1  ;;  %2054 = vmatpush3.bf16.msra.mxu0 %v478_v12  ;;  %2075 = vmatprep.subr.bf16.mxu1 %v2255_v3  ;;  %v819_v7 = vpack.c.bf16 %v1918_v4, %v1917_v2  ;;  %v820_v11 = vpack.c.bf16 %v1920_v10, %v1919_v9  ;;  %v1924_v34 = vld [vmem:[%s2732_s4 + $0x20] sm:$0xff]  ;;  %v1944_v9 = vld [vmem:[%s2731_s3 + $0x48] sm:$0xff] }
   0xe   : > { %s2369_s28 = sshll.u32 %s2743_s26, 3  ;;  %2067 = vmatprep.subr.bf16.mxu0 %v2255_v3  ;;  %s462_s18 = scalar_lea.vmem %s2740_s12, %s2743_s26 }
   0xf   : > { %s459_s14 = scalar_lea.vmem %s2729_s1, %s2369_s28  ;;  %s455_s17 = scalar_lea.vmem %s2728_s0, %s2369_s28  ;;  %v2431_v39 = vld [vmem:[%s462_s18] ss:$0 sm:$0xff] }
  0x10   : > { %v470_v13 = vld [vmem:[%s459_s14] sm:$0xff]  ;;  %s466_s21 = scalar_lea.vmem %s2741_s13, %s2369_s28 }
  0x11   : > { %v2380_v14 = vld [vmem:[%s455_s17] sm:$0xff]  ;;  %v2382_v15 = vpack.c.bf16 %v470_v13, %v470_v13 }
  0x12   : > { %v2386_v16 = vpack.c.bf16 %v2380_v14, %v2380_v14 }
  0x13   : > { %2064 = vmatmul.mubr.msk.bf16.vlgmr.msra.gmra.mrb[0].mxu1 %vm486_vm1, %v2382_v15 }
  0x14   : > { %2056 = vmatmul.mubr.msk.bf16.vlgmr.msra.gmra.mrb[0].mxu0 %vm486_vm1, %v2386_v16  ;;  %2077 = vmatprep.mubr.msk.bf16.mxu1 %vm2256_vm0, %v2255_v3 }
  0x15   : > { %2071 = vmatprep.mubr.msk.bf16.mxu0 %vm2256_vm0, %v2255_v3  ;;  %2068 = vmatpush3.bf16.msra.mxu0 %v590_v35  ;;  %v1925_v35 = vld [vmem:[%s2732_s4 + $0x28] sm:$0xff] }
  0x16   : > { %2069 = vmatprep.subr.bf16.mxu0 %v2255_v3 }
  0x19   : > { %2070 = vmatpush3.bf16.msra.mxu0 %v591_v37  ;;  %v874_v37 = vpack.c.bf16 %v1925_v35, %v1924_v34 }
  0x1a   : > { %2081 = vmatprep.subr.bf16.mxu0 %v2255_v3 }
  0x1c   : > { %2072 = vmatmul.mubr.msk.bf16.vlgmr.msra.gmra.mrb[4].mxu0 %vm486_vm1, %v2382_v15 }
  0x1d   : > { %2083 = vmatprep.mubr.msk.bf16.mxu0 %vm2256_vm0, %v2255_v3 }
  0xe6   : > { %v580_v18 = vpop.f32.mrb[0].mxu1 }
  0xe7   : > { %v581_v19 = vadd.f32 %v1903_v17, %v580_v18  ;;  %v2065_v20 = vpop.f32.mrb[1].mxu1  ;;  %v524_v21 = vpop.f32.mrb[0].mxu0 }
  0xe8   : > { %v583_v22 = vpop.f32.mrb[2].mxu1  ;;  %v2057_v24 = vpop.f32.mrb[1].mxu0  ;;  %v525_v30 = vadd.f32 %v1901_v23, %v524_v21  ;;  %v1922_v23 = vld [vmem:[%s2734_s6 + $0x1] ss:$0 sm:$0xff] }
  0xe9   : > { %v640_v25 = vpack.c.bf16 %v581_v19, %v581_v19  ;;  %v2066_v26 = vpop.f32.mrb[3].mxu1  ;;  %v527_v27 = vpop.f32.mrb[2].mxu0 }
  0xea   : > { %v2058_v28 = vpop.f32.mrb[3].mxu0  ;;  %v639_v31 = vpack.c.bf16 %v525_v30, %v525_v30 }
  0xeb   : > { %v646_v29 = vsel %vm641_vm2, %v640_v25, 0  ;;  %v1915_v28 = vld [vmem:[%s2733_s5 + $0x1] ss:$0 sm:$0xff] }
  0xec   : > { %2076 = vmatpush3.bf16.xpose.msra.mxu1 %v646_v29 }
  0xed   : > { %2087 = vmatprep.subr.bf16.mxu1 %v2255_v3 }
  0xef   : > { %v633_v51 = vpop.f32.mrb[4].mxu0 }
  0xf0   : > { %v2073_v52 = vpop.f32.mrb[5].mxu0  ;;  %v634_v56 = vadd.f32 %v1905_v54, %v633_v51 }
  0xf1   : > { %v636_v53 = vpop.f32.mrb[6].mxu0 }
  0xf2   : > { %v2074_v55 = vpop.f32.mrb[7].mxu0  ;;  %v708_v57 = vpack.c.bf16 %v634_v56, %v634_v56 }
  0xf3   : > { %2078 = vmatmul.mubr.msk.bf16.vlgmr.msra.gmra.mrb[4].mxu1 %vm641_vm2, %v639_v31 }
  0xf4   : > { %2091 = vmatprep.mubr.msk.bf16.mxu1 %vm2256_vm0, %v2255_v3  ;;  %v714_v58 = vsel %vm712_vm3, %v708_v57, 0  ;;  %2088 = vmatpush3.bf16.msra.mxu1 %v764_v61  ;;  %v1933_v61 = vld [vmem:[%s2736_s8 + $0x8] sm:$0xff] }
  0xf5   : > { %2082 = vmatpush3.bf16.msra.mxu0 %v714_v58  ;;  %2089 = vmatprep.subr.bf16.mxu1 %v2255_v3  ;;  %v1036_v62 = vpack.c.bf16 %v1933_v61, %v1933_v61 }
  0xf6   : > { %2095 = vmatprep.subr.bf16.mxu0 %v2255_v3 }
  0xf7   : > { %v1041_v63 = vsel %vm712_vm3, %v1036_v62, 0 }
  0xf8   : > { %2090 = vmatpush3.bf16.msra.mxu1 %v765_v0 }
  0xf9   : > { %2103 = vmatprep.subr.bf16.mxu1 %v2255_v3 }
  0xfb   : > { %2092 = vmatmul.mubr.msk.bf16.vlgmr.msra.gmra.mrb[8].mxu1 %vm486_vm1, %v2386_v16 }
  0xfc   : > { %2107 = vmatprep.mubr.msk.bf16.mxu1 %vm2256_vm0, %v2255_v3  ;;  %2104 = vmatpush3.bf16.msra.mxu1 %v874_v37 }
  0xfd   : > { %2105 = vmatprep.subr.bf16.mxu1 %v2255_v3 }
 0x1c6   : > { %v682_v38 = vpop.f32.mrb[4].mxu1 }
 0x1c7   : > { %v688_v40 = vmul.f32 0.35355338, %v682_v38  ;;  %v2079_v41 = vpop.f32.mrb[5].mxu1  ;;  %v1927_v38 = vld [vmem:[%s2732_s4 + $0x38] sm:$0xff] }
 0x1c8   : > { %v685_v42 = vpop.f32.mrb[6].mxu1 }
 0x1c9   : > { %v2080_v43 = vpop.f32.mrb[7].mxu1  ;;  %v695_v44 = vadd.f32 %v2431_v39, %v688_v40  ;;  %v875_v40 = vpack.c.bf16 %v1927_v38, %v1926_v36 }
 0x1cb   : > { %v696_v45 = vsel %vm641_vm2, %v695_v44, -inf  ;;  %2106 = vmatpush3.bf16.msra.mxu1 %v875_v40 }
 0x1cc   : > { %697 = vmax.xlane.f32.xlu0 %v696_v45  ;;  %2117 = vmatprep.subr.bf16.mxu1 %v2255_v3 }
 0x1ce   : > { %v808_v12 = vpop.f32.mrb[8].mxu1  ;;  %2108 = vmatmul.mubr.msk.bf16.vlgmr.msra.gmra.mrb[12].mxu1 %vm486_vm1, %v2382_v15 }
 0x1cf   : > { %v2093_v13 = vpop.f32.mrb[9].mxu1  ;;  %v809_v32 = vadd.f32 %v1915_v28, %v808_v12  ;;  %2119 = vmatprep.mubr.msk.bf16.mxu1 %vm2256_vm0, %v2255_v3  ;;  %v1945_v12 = vld [vmem:[%s2731_s3 + $0x50] sm:$0xff] }
 0x1d0   : > { %v811_v17 = vpop.f32.mrb[10].mxu1  ;;  %v1946_v13 = vld [vmem:[%s2731_s3 + $0x58] sm:$0xff] }
 0x1d1   : > { %v2094_v18 = vpop.f32.mrb[11].mxu1  ;;  %v924_v33 = vpack.c.bf16 %v809_v32, %v809_v32  ;;  %v1190_v17 = vpack.c.bf16 %v1946_v13, %v1945_v12  ;;  %v1955_v12 = vld [vmem:[%s2735_s7 + $0x2] ss:$0 sm:$0xff] }
 0x1d2   : > { %v1936_v18 = vld [vmem:[%s2730_s2 + $0x40] sm:$0xff] }
 0x259   : > { %v698_v46 = vpop.xlane.xlu0 %697 }
 0x25a   : > { %v699_v47 = vsub.f32 %v695_v44, %v698_v46 }
 0x25c   : > { %v700_v48 = vmul.f32 1.442695, %v699_v47 }
 0x25e   : > { %2229 = vpow2.f32 %v700_v48  ;;  %v1929_v48 = vld [vmem:[%s2735_s7 + $0x1] ss:$0 sm:$0xff] }
 0x268   : > { %v2230_v49 = vpop.eup %2229 }
 0x269   : > { %v702_v50 = vsel %vm641_vm2, %v2230_v49, 0.0 }
 0x26a   : > { %703 = vadd.xlane.f32.xlu0 %v702_v50 }
 0x2f7   : > { %v704_v1 = vpop.xlane.xlu0 %703 }
 0x2f8   : > { %2231 = vrcp.f32 %v704_v1  ;;  %v757_v1 = vld [vmem:[%s2736_s8] sm:$0xff] }
 0x2f9   : > { %v758_v2 = vpack.c.bf16 %v757_v1, %v757_v1 }
 0x302   : > { %v2232_v5 = vpop.eup %2231 }
 0x303   : > { %v706_v6 = vmul.f32 %v2232_v5, %v2230_v49  ;;  %v918_v49 = vpop.f32.mrb[12].mxu1 }
 0x304   : > { %v919_v50 = vadd.f32 %v1929_v48, %v918_v49  ;;  %v2109_v51 = vpop.f32.mrb[13].mxu1 }
 0x305   : > { %v707_v8 = vpack.c.bf16 %v706_v6, %v706_v6  ;;  %v921_v52 = vpop.f32.mrb[14].mxu1 }
 0x306   : > { %v986_v53 = vpack.c.bf16 %v919_v50, %v919_v50  ;;  %v2110_v54 = vpop.f32.mrb[15].mxu1 }
 0x307   : > { %2084 = vmatmul.mubr.msk.bf16.vlgmr.msra.gmra.mrb[8].mxu0 %vm641_vm2, %v707_v8  ;;  %v1943_v8 = vld [vmem:[%s2731_s3 + $0x40] sm:$0xff] }
 0x308   : > { %2096 = vmatpush3.bf16.msra.mxu0 %v819_v7  ;;  %2099 = vmatprep.mubr.msk.bf16.mxu0 %vm2256_vm0, %v2255_v3  ;;  %v991_v55 = vsel %vm712_vm3, %v986_v53, 0  ;;  %v1087_v7 = vsel %vm712_vm3, %v758_v2, 0  ;;  %v1189_v10 = vpack.c.bf16 %v1944_v9, %v1943_v8  ;;  %v1950_v54 = vld [vmem:[%s2732_s4 + $0x40] sm:$0xff] }
 0x309   : > { %2097 = vmatprep.subr.bf16.mxu0 %v2255_v3  ;;  %2118 = vmatpush3.bf16.msra.mxu1 %v991_v55  ;;  %v1951_v55 = vld [vmem:[%s2732_s4 + $0x48] sm:$0xff] }
 0x30a   : > { %2129 = vmatprep.subr.bf16.mxu1 %v2255_v3 }
 0x30c   : > { %2098 = vmatpush3.bf16.msra.mxu0 %v820_v11 }
 0x30d   : > { %2111 = vmatprep.subr.bf16.mxu0 %v2255_v3 }
 0x30f   : > { %2100 = vmatmul.mubr.msk.bf16.vlgmr.msra.gmra.mrb[12].mxu0 %vm486_vm1, %v2382_v15 }
 0x310   : > { %2113 = vmatprep.mubr.msk.bf16.mxu0 %vm2256_vm0, %v2255_v3 }
 0x3da   : > { %v2480_v19 = vpop.f32.mrb[8].mxu0 }
 0x3db   : > { %v2085_v20 = vpop.f32.mrb[9].mxu0  ;;  %v756_v11 = vpack.c.bf16 %v2480_v19, %v2480_v19  ;;  %v1937_v19 = vld [vmem:[%s2730_s2 + $0x48] sm:$0xff] }
 0x3dc   : > { %v753_v21 = vpop.f32.mrb[10].mxu0 }
 0x3dd   : > { %v2086_v22 = vpop.f32.mrb[11].mxu0  ;;  %v1134_v21 = vpack.c.bf16 %v1937_v19, %v1936_v18 }
 0x3e2   : > { %v863_v24 = vpop.f32.mrb[12].mxu0 }
 0x3e3   : > { %v864_v25 = vadd.f32 %v1922_v23, %v863_v24  ;;  %v2101_v26 = vpop.f32.mrb[13].mxu0  ;;  %v1938_v24 = vld [vmem:[%s2730_s2 + $0x50] sm:$0xff] }
 0x3e4   : > { %v866_v27 = vpop.f32.mrb[14].mxu0 }
 0x3e5   : > { %v925_v29 = vpack.c.bf16 %v864_v25, %v864_v25  ;;  %v2102_v30 = vpop.f32.mrb[15].mxu0  ;;  %v1939_v25 = vld [vmem:[%s2730_s2 + $0x58] sm:$0xff] }
 0x3e6   : > { %v1135_v28 = vpack.c.bf16 %v1939_v25, %v1938_v24 }
 0x3e7   : > { %v930_v31 = vsel %vm641_vm2, %v925_v29, 0 }
 0x3e8   : > { %2112 = vmatpush3.bf16.xpose.msra.mxu0 %v930_v31 }
 0x3e9   : > { %2123 = vmatprep.subr.bf16.mxu0 %v2255_v3 }
 0x3ef   : > { %2114 = vmatmul.mubr.msk.bf16.vlgmr.msra.gmra.mrb[16].mxu0 %vm641_vm2, %v924_v33  ;;  %v1948_v33 = vld [vmem:[%s2734_s6 + $0x2] ss:$0 sm:$0xff] }
 0x3f0   : > { %2125 = vmatprep.mubr.msk.bf16.mxu0 %vm2256_vm0, %v2255_v3  ;;  %2124 = vmatpush3.bf16.msra.mxu0 %v1041_v63 }
 0x3f1   : > { %2135 = vmatprep.subr.bf16.mxu0 %v2255_v3 }
 0x4c2   : > { %v966_v41 = vpop.f32.mrb[16].mxu0 }
 0x4c3   : > { %v972_v42 = vmul.f32 0.35355338, %v966_v41  ;;  %v2115_v43 = vpop.f32.mrb[17].mxu0 }
 0x4c4   : > { %v969_v44 = vpop.f32.mrb[18].mxu0 }
 0x4c5   : > { %v2116_v45 = vpop.f32.mrb[19].mxu0  ;;  %v973_v46 = vadd.f32 %v2431_v39, %v972_v42 }
 0x4c7   : > { %v974_v47 = vsel %vm641_vm2, %v973_v46, -inf }
 0x4c8   : > { %975 = vmax.xlane.f32.xlu1 %v974_v47  ;;  %v1941_v47 = vld [vmem:[%s2733_s5 + $0x2] ss:$0 sm:$0xff] }
 0x555   : > { %v976_v56 = vpop.xlane.xlu1 %975 }
 0x556   : > { %v977_v57 = vsub.f32 %v973_v46, %v976_v56  ;;  %v1952_v56 = vld [vmem:[%s2732_s4 + $0x50] sm:$0xff] }
 0x558   : > { %v978_v58 = vmul.f32 1.442695, %v977_v57  ;;  %v1244_v57 = vpack.c.bf16 %v1951_v55, %v1950_v54  ;;  %v1973_v54 = vld [vmem:[%s2734_s6 + $0x3] ss:$0 sm:$0xff] }
 0x55a   : > { %2233 = vpow2.f32 %v978_v58  ;;  %v1953_v58 = vld [vmem:[%s2732_s4 + $0x58] sm:$0xff] }
 0x564   : > { %v2234_v59 = vpop.eup %2233 }
 0x565   : > { %v980_v60 = vsel %vm641_vm2, %v2234_v59, 0.0 }
 0x566   : > { %981 = vadd.xlane.f32.xlu1 %v980_v60 }
 0x5f3   : > { %v982_v0 = vpop.xlane.xlu1 %981 }
 0x5f4   : > { %2235 = vrcp.f32 %v982_v0 }
 0x5fe   : > { %v2236_v4 = vpop.eup %2235 }
 0x5ff   : > { %v984_v5 = vmul.f32 %v2236_v4, %v2234_v59  ;;  %v1245_v59 = vpack.c.bf16 %v1953_v58, %v1952_v56 }
 0x601   : > { %v985_v6 = vpack.c.bf16 %v984_v5, %v984_v5 }
 0x603   : > { %2120 = vmatmul.mubr.msk.bf16.vlgmr.msra.gmra.mrb[16].mxu1 %vm641_vm2, %v985_v6 }
 0x604   : > { %2130 = vmatpush3.bf16.msra.mxu1 %v1087_v7  ;;  %2131 = vmatprep.mubr.msk.bf16.mxu1 %vm2256_vm0, %v2255_v3 }
 0x605   : > { %2143 = vmatprep.subr.bf16.mxu1 %v2255_v3 }
 0x60b   : > { %2132 = vmatmul.mubr.msk.bf16.vlgmr.msra.gmra.mrb[20].mxu1 %vm641_vm2, %v756_v11 }
 0x60c   : > { %2144 = vmatpush3.bf16.msra.mxu1 %v1189_v10  ;;  %2147 = vmatprep.mubr.msk.bf16.mxu1 %vm2256_vm0, %v2255_v3 }
 0x60d   : > { %2145 = vmatprep.subr.bf16.mxu1 %v2255_v3 }
 0x610   : > { %2146 = vmatpush3.bf16.msra.mxu1 %v1190_v17 }
 0x611   : > { %2159 = vmatprep.subr.bf16.mxu1 %v2255_v3 }
 0x613   : > { %2148 = vmatmul.mubr.msk.bf16.vlgmr.msra.gmra.mrb[24].mxu1 %vm486_vm1, %v2382_v15 }
 0x614   : > { %2161 = vmatprep.mubr.msk.bf16.mxu1 %vm2256_vm0, %v2255_v3 }
 0x6d6   : > { %v1027_v20 = vpop.f32.mrb[16].mxu1 }
 0x6d7   : > { %v1033_v22 = vpack.c.bf16 %v1027_v20, %v1027_v20  ;;  %v2121_v23 = vpop.f32.mrb[17].mxu1  ;;  %v1959_v20 = vld [vmem:[%s2736_s8 + $0x10] sm:$0xff] }
 0x6d8   : > { %v1030_v26 = vpop.f32.mrb[18].mxu1 }
 0x6d9   : > { %v2122_v27 = vpop.f32.mrb[19].mxu1  ;;  %2126 = vmatmul.mubr.msk.bf16.vlgmr.msra.gmra.mrb[20].mxu0 %vm641_vm2, %v1033_v22 }
 0x6da   : > { %2136 = vmatpush3.bf16.msra.mxu0 %v1134_v21  ;;  %2139 = vmatprep.mubr.msk.bf16.mxu0 %vm2256_vm0, %v2255_v3  ;;  %v1406_v21 = vpack.c.bf16 %v1959_v20, %v1959_v20  ;;  %v1961_v27 = vld [vmem:[%s2730_s2 + $0x60] sm:$0xff] }
 0x6db   : > { %2137 = vmatprep.subr.bf16.mxu0 %v2255_v3 }
 0x6dc   : > { %v1411_v22 = vsel %vm712_vm3, %v1406_v21, 0 }
 0x6de   : > { %v1123_v29 = vpop.f32.mrb[20].mxu1  ;;  %2138 = vmatpush3.bf16.msra.mxu0 %v1135_v28  ;;  %v1962_v28 = vld [vmem:[%s2730_s2 + $0x68] sm:$0xff] }
 0x6df   : > { %v2133_v30 = vpop.f32.mrb[21].mxu1  ;;  %2151 = vmatprep.subr.bf16.mxu0 %v2255_v3 }
 0x6e0   : > { %v1126_v31 = vpop.f32.mrb[22].mxu1  ;;  %v1963_v30 = vld [vmem:[%s2730_s2 + $0x70] sm:$0xff] }
 0x6e1   : > { %v2134_v32 = vpop.f32.mrb[23].mxu1  ;;  %2140 = vmatmul.mubr.msk.bf16.vlgmr.msra.gmra.mrb[24].mxu0 %vm486_vm1, %v2386_v16  ;;  %v1964_v31 = vld [vmem:[%s2730_s2 + $0x78] sm:$0xff] }
 0x6e2   : > { %2155 = vmatprep.mubr.msk.bf16.mxu0 %vm2256_vm0, %v2255_v3  ;;  %2152 = vmatpush3.bf16.msra.mxu0 %v1244_v57  ;;  %v1460_v32 = vpack.c.bf16 %v1964_v31, %v1963_v30 }
 0x6e3   : > { %2153 = vmatprep.subr.bf16.mxu0 %v2255_v3 }
 0x6e6   : > { %v1233_v34 = vpop.f32.mrb[24].mxu1  ;;  %2154 = vmatpush3.bf16.msra.mxu0 %v1245_v59  ;;  %v1966_v59 = vld [vmem:[%s2733_s5 + $0x3] ss:$0 sm:$0xff] }
 0x6e7   : > { %v1234_v35 = vadd.f32 %v1948_v33, %v1233_v34  ;;  %v2149_v36 = vpop.f32.mrb[25].mxu1  ;;  %2165 = vmatprep.subr.bf16.mxu0 %v2255_v3  ;;  %v1968_v33 = vld [vmem:[%s2731_s3 + $0x60] sm:$0xff]  ;;  %v1969_v34 = vld [vmem:[%s2731_s3 + $0x68] sm:$0xff] }
 0x6e8   : > { %v1236_v37 = vpop.f32.mrb[26].mxu1  ;;  %v1514_v36 = vpack.c.bf16 %v1969_v34, %v1968_v33 }
 0x6e9   : > { %v1295_v38 = vpack.c.bf16 %v1234_v35, %v1234_v35  ;;  %v2150_v40 = vpop.f32.mrb[27].mxu1  ;;  %2156 = vmatmul.mubr.msk.bf16.vlgmr.msra.gmra.mrb[28].mxu0 %vm486_vm1, %v2382_v15 }
 0x6ea   : > { %2167 = vmatprep.mubr.msk.bf16.mxu0 %vm2256_vm0, %v2255_v3  ;;  %v1970_v40 = vld [vmem:[%s2731_s3 + $0x70] sm:$0xff] }
 0x6eb   : > { %v1300_v41 = vsel %vm641_vm2, %v1295_v38, 0 }
 0x6ec   : > { %2160 = vmatpush3.bf16.xpose.msra.mxu1 %v1300_v41 }
 0x6ed   : > { %2171 = vmatprep.subr.bf16.mxu1 %v2255_v3 }
 0x7ac   : > { %v1077_v42 = vpop.f32.mrb[20].mxu0 }
 0x7ad   : > { %v2581_v43 = vadd.f32 %v1123_v29, %v1077_v42  ;;  %v2127_v44 = vpop.f32.mrb[21].mxu0  ;;  %v1459_v29 = vpack.c.bf16 %v1962_v28, %v1961_v27  ;;  %v1984_v27 = vld [vmem:[%s2736_s8 + $0x18] sm:$0xff] }
 0x7ae   : > { %v1080_v45 = vpop.f32.mrb[22].mxu0  ;;  %v1731_v28 = vpack.c.bf16 %v1984_v27, %v1984_v27 }
 0x7af   : > { %v2128_v46 = vpop.f32.mrb[23].mxu0 }
 0x7b4   : > { %v1178_v48 = vpop.f32.mrb[24].mxu0 }
 0x7b5   : > { %v1179_v49 = vadd.f32 %v1941_v47, %v1178_v48  ;;  %v2141_v50 = vpop.f32.mrb[25].mxu0 }
 0x7b6   : > { %v1181_v51 = vpop.f32.mrb[26].mxu0 }
 0x7b7   : > { %v1294_v52 = vpack.c.bf16 %v1179_v49, %v1179_v49  ;;  %v2142_v53 = vpop.f32.mrb[27].mxu0 }
 0x7b9   : > { %2162 = vmatmul.mubr.msk.bf16.vlgmr.msra.gmra.mrb[28].mxu1 %vm641_vm2, %v1294_v52 }
 0x7ba   : > { %2173 = vmatprep.mubr.msk.bf16.mxu1 %vm2256_vm0, %v2255_v3  ;;  %2172 = vmatpush3.bf16.msra.mxu1 %v1411_v22 }
 0x7bb   : > { %2185 = vmatprep.subr.bf16.mxu1 %v2255_v3 }
 0x7bc   : > { %v1288_v9 = vpop.f32.mrb[28].mxu0 }
 0x7bd   : > { %v2157_v10 = vpop.f32.mrb[29].mxu0  ;;  %v1289_v17 = vadd.f32 %v1955_v12, %v1288_v9 }
 0x7be   : > { %v1291_v11 = vpop.f32.mrb[30].mxu0 }
 0x7bf   : > { %v2158_v13 = vpop.f32.mrb[31].mxu0  ;;  %v1356_v18 = vpack.c.bf16 %v1289_v17, %v1289_v17 }
 0x7c1   : > { %v1361_v19 = vsel %vm712_vm3, %v1356_v18, 0 }
 0x7c2   : > { %2166 = vmatpush3.bf16.msra.mxu0 %v1361_v19 }
 0x7c3   : > { %2177 = vmatprep.subr.bf16.mxu0 %v2255_v3 }
 0x88c   : > { %v1336_v60 = vpop.f32.mrb[28].mxu1 }
 0x88d   : > { %v1342_v61 = vmul.f32 0.35355338, %v1336_v60  ;;  %v2163_v62 = vpop.f32.mrb[29].mxu1 }
 0x88e   : > { %v1339_v63 = vpop.f32.mrb[30].mxu1 }
 0x88f   : > { %v2164_v0 = vpop.f32.mrb[31].mxu1  ;;  %v1343_v1 = vadd.f32 %v2431_v39, %v1342_v61 }
 0x890   : > { %v1975_v0 = vld [vmem:[%s2732_s4 + $0x60] sm:$0xff] }
 0x891   : > { %v1344_v2 = vsel %vm641_vm2, %v1343_v1, -inf }
 0x892   : > { %1345 = vmax.xlane.f32.xlu0 %v1344_v2  ;;  %v1977_v2 = vld [vmem:[%s2732_s4 + $0x70] sm:$0xff] }
 0x91f   : > { %v1346_v4 = vpop.xlane.xlu0 %1345 }
 0x920   : > { %v1347_v5 = vsub.f32 %v1343_v1, %v1346_v4  ;;  %v1976_v1 = vld [vmem:[%s2732_s4 + $0x68] sm:$0xff] }
 0x921   : > { %v1569_v4 = vpack.c.bf16 %v1976_v1, %v1975_v0 }
 0x922   : > { %v1348_v6 = vmul.f32 1.442695, %v1347_v5  ;;  %v1978_v5 = vld [vmem:[%s2732_s4 + $0x78] sm:$0xff] }
 0x924   : > { %2237 = vpow2.f32 %v1348_v6  ;;  %v1570_v6 = vpack.c.bf16 %v1978_v5, %v1977_v2 }
 0x92e   : > { %v2238_v7 = vpop.eup %2237 }
 0x92f   : > { %v1350_v8 = vsel %vm641_vm2, %v2238_v7, 0.0 }
 0x930   : > { %1351 = vadd.xlane.f32.xlu1 %v1350_v8 }
 0x9bd   : > { %v1352_v23 = vpop.xlane.xlu1 %1351 }
 0x9be   : > { %2239 = vrcp.f32 %v1352_v23  ;;  %v1980_v23 = vld [vmem:[%s2735_s7 + $0x3] ss:$0 sm:$0xff] }
 0x9c8   : > { %v2240_v24 = vpop.eup %2239 }
 0x9c9   : > { %v1354_v25 = vmul.f32 %v2240_v24, %v2238_v7 }
 0x9cb   : > { %v1355_v26 = vpack.c.bf16 %v1354_v25, %v1354_v25 }
 0x9cd   : > { %2168 = vmatmul.mubr.msk.bf16.vlgmr.msra.gmra.mrb[32].mxu0 %vm641_vm2, %v1355_v26 }
 0x9ce   : > { %2181 = vmatprep.mubr.msk.bf16.mxu0 %vm2256_vm0, %v2255_v3  ;;  %2178 = vmatpush3.bf16.msra.mxu0 %v1459_v29  ;;  %v1736_v29 = vsel %vm712_vm3, %v1731_v28, 0 }
 0x9cf   : > { %2179 = vmatprep.subr.bf16.mxu0 %v2255_v3 }
 0x9d2   : > { %2180 = vmatpush3.bf16.msra.mxu0 %v1460_v32 }
 0x9d3   : > { %2193 = vmatprep.subr.bf16.mxu0 %v2255_v3 }
 0x9d5   : > { %2182 = vmatmul.mubr.msk.bf16.vlgmr.msra.gmra.mrb[36].mxu0 %vm486_vm1, %v2386_v16  ;;  %v1971_v16 = vld [vmem:[%s2731_s3 + $0x78] sm:$0xff] }
 0x9d6   : > { %2197 = vmatprep.mubr.msk.bf16.mxu0 %vm2256_vm0, %v2255_v3  ;;  %v1515_v44 = vpack.c.bf16 %v1971_v16, %v1970_v40  ;;  %2194 = vmatpush3.bf16.msra.mxu0 %v1569_v4  ;;  %v1986_v16 = vld [vmem:[%s2737_s9] ss:$0 sm:$0xff] }
 0x9d7   : > { %2195 = vmatprep.subr.bf16.mxu0 %v2255_v3 }
 0x9da   : > { %2196 = vmatpush3.bf16.msra.mxu0 %v1570_v6 }
 0x9db   : > { %2207 = vmatprep.subr.bf16.mxu0 %v2255_v3 }
 0x9dd   : > { %2198 = vmatmul.mubr.msk.bf16.vlgmr.msra.gmra.mrb[40].mxu0 %vm486_vm1, %v2382_v15 }
 0x9de   : > { %2209 = vmatprep.mubr.msk.bf16.mxu0 %vm2256_vm0, %v2255_v3 }
 0xaa0   : > { %v1397_v35 = vpop.f32.mrb[32].mxu0 }
 0xaa1   : > { %v1403_v37 = vpack.c.bf16 %v1397_v35, %v1397_v35  ;;  %v2169_v38 = vpop.f32.mrb[33].mxu0 }
 0xaa2   : > { %v1400_v41 = vpop.f32.mrb[34].mxu0 }
 0xaa3   : > { %v2170_v42 = vpop.f32.mrb[35].mxu0  ;;  %2174 = vmatmul.mubr.msk.bf16.vlgmr.msra.gmra.mrb[32].mxu1 %vm641_vm2, %v1403_v37 }
 0xaa4   : > { %2186 = vmatpush3.bf16.msra.mxu1 %v1514_v36  ;;  %2189 = vmatprep.mubr.msk.bf16.mxu1 %vm2256_vm0, %v2255_v3 }
 0xaa5   : > { %2187 = vmatprep.subr.bf16.mxu1 %v2255_v3 }
 0xaa8   : > { %2188 = vmatpush3.bf16.msra.mxu1 %v1515_v44  ;;  %v1503_v45 = vpop.f32.mrb[36].mxu0 }
 0xaa9   : > { %2201 = vmatprep.subr.bf16.mxu1 %v2255_v3  ;;  %v2183_v46 = vpop.f32.mrb[37].mxu0  ;;  %v1504_v62 = vadd.f32 %v1966_v59, %v1503_v45  ;;  %v1988_v59 = vld [vmem:[%s2739_s11] ss:$0 sm:$0xff] }
 0xaaa   : > { %v1506_v47 = vpop.f32.mrb[38].mxu0 }
 0xaab   : > { %2190 = vmatmul.mubr.msk.bf16.vlgmr.msra.gmra.mrb[36].mxu1 %vm486_vm1, %v2382_v15  ;;  %v2184_v48 = vpop.f32.mrb[39].mxu0  ;;  %v1619_v63 = vpack.c.bf16 %v1504_v62, %v1504_v62 }
 0xaac   : > { %2203 = vmatprep.mubr.msk.bf16.mxu1 %vm2256_vm0, %v2255_v3 }
 0xab0   : > { %v1613_v21 = vpop.f32.mrb[40].mxu0 }
 0xb76   : > { %v1447_v49 = vpop.f32.mrb[32].mxu1 }
 0xb77   : > { %v2663_v50 = vadd.f32 %v1447_v49, %v2581_v43  ;;  %v2175_v51 = vpop.f32.mrb[33].mxu1 }
 0xb78   : > { %v1450_v52 = vpop.f32.mrb[34].mxu1 }
 0xb79   : > { %v2176_v53 = vpop.f32.mrb[35].mxu1 }
 0xb7e   : > { %v1558_v55 = vpop.f32.mrb[36].mxu1 }
 0xb7f   : > { %v1559_v56 = vadd.f32 %v1973_v54, %v1558_v55  ;;  %v2191_v57 = vpop.f32.mrb[37].mxu1 }
 0xb80   : > { %v1561_v58 = vpop.f32.mrb[38].mxu1 }
 0xb81   : > { %v1620_v60 = vpack.c.bf16 %v1559_v56, %v1559_v56  ;;  %v2192_v61 = vpop.f32.mrb[39].mxu1 }
 0xb83   : > { %v1625_v43 = vsel %vm641_vm2, %v1620_v60, 0 }
 0xb84   : > { %2202 = vmatpush3.bf16.xpose.msra.mxu1 %v1625_v43 }
 0xb85   : > { %2213 = vmatprep.subr.bf16.mxu1 %v2255_v3 }
 0xb8b   : > { %2204 = vmatmul.mubr.msk.bf16.vlgmr.msra.gmra.mrb[40].mxu1 %vm641_vm2, %v1619_v63 }
 0xb8c   : > { %2215 = vmatprep.mubr.msk.bf16.mxu1 %vm2256_vm0, %v2255_v3  ;;  %v2199_v3 = vpop.f32.mrb[41].mxu0  ;;  %2214 = vmatpush3.bf16.msra.mxu1 %v1736_v29 }
 0xb8d   : > { %v1616_v22 = vpop.f32.mrb[42].mxu0 }
 0xb8e   : > { %v2200_v24 = vpop.f32.mrb[43].mxu0 }
 0xc5e   : > { %v1661_v7 = vpop.f32.mrb[40].mxu1 }
 0xc5f   : > { %v1667_v8 = vmul.f32 0.35355338, %v1661_v7  ;;  %v2205_v9 = vpop.f32.mrb[41].mxu1 }
 0xc60   : > { %v1664_v10 = vpop.f32.mrb[42].mxu1 }
 0xc61   : > { %v2206_v11 = vpop.f32.mrb[43].mxu1  ;;  %v1668_v12 = vadd.f32 %v2431_v39, %v1667_v8  ;;  %v1614_v39 = vadd.f32 %v1980_v23, %v1613_v21 }
 0xc63   : > { %v1669_v13 = vsel %vm641_vm2, %v1668_v12, -inf  ;;  %v1681_v25 = vpack.c.bf16 %v1614_v39, %v1614_v39 }
 0xc64   : > { %1670 = vmax.xlane.f32.xlu0 %v1669_v13 }
 0xc65   : > { %v1686_v26 = vsel %vm712_vm3, %v1681_v25, 0 }
 0xc66   : > { %2208 = vmatpush3.bf16.msra.mxu0 %v1686_v26 }
 0xcf1   : > { %v1671_v17 = vpop.xlane.xlu0 %1670 }
 0xcf2   : > { %v1672_v18 = vsub.f32 %v1668_v12, %v1671_v17 }
 0xcf4   : > { %v1673_v19 = vmul.f32 1.442695, %v1672_v18 }
 0xcf6   : > { %2241 = vpow2.f32 %v1673_v19 }
 0xd00   : > { %v2242_v20 = vpop.eup %2241 }
 0xd01   : > { %v1675_v15 = vsel %vm641_vm2, %v2242_v20, 0.0 }
 0xd02   : > { %1676 = vadd.xlane.f32.xlu1 %v1675_v15 }
 0xd8f   : > { %v1677_v30 = vpop.xlane.xlu1 %1676 }
 0xd90   : > { %2243 = vrcp.f32 %v1677_v30 }
 0xd9a   : > { %v2244_v31 = vpop.eup %2243 }
 0xd9b   : > { %v1679_v32 = vmul.f32 %v2244_v31, %v2242_v20 }
 0xd9d   : > { %v1680_v33 = vpack.c.bf16 %v1679_v32, %v1679_v32 }
 0xd9f   : > { %2210 = vmatmul.mubr.msk.bf16.vlgmr.msra.gmra.mrb[44].mxu0 %vm641_vm2, %v1680_v33 }
 0xe72   : > { %v1722_v34 = vpop.f32.mrb[44].mxu0 }
 0xe73   : > { %v1728_v35 = vpack.c.bf16 %v1722_v34, %v1722_v34  ;;  %v2211_v36 = vpop.f32.mrb[45].mxu0 }
 0xe74   : > { %v1725_v37 = vpop.f32.mrb[46].mxu0 }
 0xe75   : > { %v2212_v38 = vpop.f32.mrb[47].mxu0  ;;  %2216 = vmatmul.mubr.msk.bf16.vlgmr.msra.gmra.mrb[44].mxu1 %vm641_vm2, %v1728_v35 }
 0xf48   : > { %v1772_v40 = vpop.f32.mrb[44].mxu1 }
 0xf49   : > { %v1778_v41 = vadd.f32 %v1772_v40, %v2663_v50  ;;  %v2217_v42 = vpop.f32.mrb[45].mxu1 }
 0xf4a   : > { %v1775_v44 = vpop.f32.mrb[46].mxu1 }
 0xf4b   : > { %v1786_v45 = vadd.f32 %v1986_v16, %v1778_v41  ;;  %v2218_v46 = vpop.f32.mrb[47].mxu1 }
 0xf4d   : > { %v1787_v47 = vadd.f32 %v1786_v45, %v2380_v14  ;;  %v1987_v14 = vld [vmem:[%s2738_s10] ss:$0 sm:$0xff] }
 0xf4f   : > { %v1790_v48 = vsel %vm486_vm1, %v1787_v47, 0.0 }
 0xf50   : > { %1791 = vadd.xlane.f32.xlu0 %v1790_v48 }
 0xfdd   : > { %v1792_v49 = vpop.xlane.xlu0 %1791 }
 0xfde   : > { %v1794_v51 = vmul.f32 0.03125, %v1792_v49 }
 0xfe0   : > { %v1795_v52 = vsub.f32 %v1787_v47, %v1794_v51 }
 0xfe2   : > { %v1796_v53 = vmul.f32 %v1795_v52, %v1795_v52 }
 0xfe4   : > { %v1797_v54 = vsel %vm486_vm1, %v1796_v53, 0.0 }
 0xfe5   : > { %1798 = vadd.xlane.f32.xlu1 %v1797_v54 }
0x1072   : > { %v1799_v55 = vpop.xlane.xlu1 %1798 }
0x1073   : > { %v1800_v56 = vmul.f32 0.03125, %v1799_v55 }
0x1075   : > { %v1801_v50 = vadd.f32 1e-06, %v1800_v56 }
0x1077   : > { %2245 = vrsqrt.f32 %v1801_v50 }
0x1081   : > { %v2246_v57 = vpop.eup %2245 }
0x1082   : > { %v1803_v58 = vmul.f32 %v2246_v57, %v1795_v52 }
0x1084   : > { %v1810_v60 = vmul.f32 %v1987_v14, %v1803_v58 }
0x1086   : > { %v1817_v61 = vadd.f32 %v1988_v59, %v1810_v60 }
0x1088   : > { %1818 = vst.msk [vmem:[%s466_s21] sm:$0xff] %vm486_vm1, %v1817_v61 }
0x1089 PF: > { %s23_s25 = sadd.s32 1, %s2253_s25  }
0x108a   : > { %p20_p4 = scmp.ge.s32.totalorder %s23_s25, 4  }
0x108c   :  { %22 = sbr.rel (!%p20_p4) target bundleno = 1 (0x1), region = 129 }

</bundles_post_ra>
